<compile_context>
chip_gen: v5e
topology: v5e:2x2
jax: 0.10.0
libtpu: 0.0.40
codegen_flags: <defaults>
</compile_context>

<pallas_src>
import math

import numpy as np

import jax
import jax.numpy as jnp
from jax import lax
from jax.experimental import pallas as pl
from jax.experimental.pallas import tpu as pltpu

N_PERTURB = 21          # as in the torch module
M_TRAIN = 128           # synthetic GP inducing/train points
LENGTHSCALE = 0.2       # synthetic GP RBF lengthscale
CHUNK = 128             # in-kernel lane-chunk size (keeps exp temp <= 17 vregs)
TN_MAX = 2048           # max tile size along the batch (N) lane axis

_SIGMA = 1.0 / N_PERTURB
_NORM_CONST = 1.0 / (_SIGMA * math.sqrt(2.0 * math.pi))


def _round_up(a, b):
    return ((a + b - 1) // b) * b


def gp_forward_kernel(x_ref, c_ref, s_ref, w_ref, f_ref):
    c = c_ref[...]        # (M_TOT, 1)   fused centers (Z ++ nonzero perturb) on sublanes
    s = s_ref[...]        # (M_TOT, 1)   per-row -1/(2*scale^2)
    w = w_ref[...]        # (1, M_TOT)   per-row weights (alpha ++ mag*norm_const)
    n_chunks = x_ref.shape[-1] // CHUNK

    def body(j, carry):
        off = pl.multiple_of(j * CHUNK, CHUNK)
        x = x_ref[:, pl.ds(off, CHUNK)]            # (1, CHUNK) batch points on lanes
        d = c - x                                   # (M_TOT, CHUNK)
        e = jnp.exp(d * d * s)                      # EUP exp, stays in vregs
        # (1, M_TOT) @ (M_TOT, CHUNK) -> lane-dense (1, CHUNK) on the MXU,
        # stored straight into the output row (no VMEM round trip of e).
        f_ref[:, pl.ds(off, CHUNK)] = jnp.dot(
            w, e, preferred_element_type=jnp.float32)
        return carry

    lax.fori_loop(0, n_chunks, body, 0, unroll=True)


def _choose_tiling(n):
    """Pick (TN, padded N) so TN <= TN_MAX, TN % CHUNK == 0, grid length even."""
    tn = min(TN_MAX, _round_up(pl.cdiv(n, 2), CHUNK))
    np_total = _round_up(n, 2 * tn)        # grid = np_total // tn is even (v7x 2-TC)
    return tn, np_total


def gp_model_forward(X, Z, alpha, grid21, mag21):
    """Equivalent of GPModel.forward(t, X, training=True) -> (N, 1, 2)."""
    N = X.shape[0]
    tn, np_total = _choose_tiling(N)

    x = X[:, 0].astype(jnp.float32)                 # (N,)
    v = X[:, 1:2].astype(jnp.float32)               # (N, 1) passthrough (never enters kernel)

    if np_total == N:
        x_row = x.reshape(1, N)                     # no pad copy needed
    else:
        x_row = jnp.zeros((1, np_total), jnp.float32).at[0, :N].set(x)

    # --- host-side pruning of zero-weight perturbation rows (static sparsity) ---
    mag_host = np.asarray(jax.device_get(mag21), dtype=np.float32)
    nz = np.flatnonzero(mag_host)                   # indices of nonzero perturb_mag
    n_pert = int(nz.size)
    m_raw = M_TRAIN + n_pert
    m_tot = _round_up(max(m_raw, 8), 8)             # sublane multiple of 8
    pad = m_tot - m_raw

    centers = jnp.concatenate([
        Z.astype(jnp.float32),
        grid21.astype(jnp.float32)[nz],
        jnp.zeros((pad,), jnp.float32),
    ])
    scales = jnp.concatenate([
        jnp.full((M_TRAIN,), -0.5 / (LENGTHSCALE * LENGTHSCALE), jnp.float32),
        jnp.full((n_pert,), -0.5 / (_SIGMA * _SIGMA), jnp.float32),
        jnp.full((pad,), -0.5, jnp.float32),        # padded rows: finite scale, weight 0
    ])
    weights = jnp.concatenate([
        alpha.astype(jnp.float32),
        mag21.astype(jnp.float32)[nz] * _NORM_CONST,  # norm const folded on host
        jnp.zeros((pad,), jnp.float32),
    ])

    c2d = centers.reshape(m_tot, 1)
    s2d = scales.reshape(m_tot, 1)
    w2d = weights.reshape(1, m_tot)

    f_row = pl.pallas_call(
        gp_forward_kernel,
        out_shape=jax.ShapeDtypeStruct((1, np_total), jnp.float32),
        grid_spec=pltpu.PrefetchScalarGridSpec(
            num_scalar_prefetch=0,
            grid=(np_total // tn,),
            in_specs=[
                pl.BlockSpec((1, tn), lambda i: (0, i)),         # x (lane-dense)
                pl.BlockSpec((m_tot, 1), lambda i: (0, 0)),      # centers
                pl.BlockSpec((m_tot, 1), lambda i: (0, 0)),      # scales
                pl.BlockSpec((1, m_tot), lambda i: (0, 0)),      # weights
            ],
            out_specs=pl.BlockSpec((1, tn), lambda i: (0, i)),   # F (lane-dense)
        ),
        compiler_params=pltpu.CompilerParams(
            dimension_semantics=("parallel",)),
    )(x_row, c2d, s2d, w2d)

    F = f_row[0, :N].reshape(N, 1)
    # torch.stack([v, F], dim=-1) with v, F of shape (N, 1) -> (N, 1, 2)
    return jnp.stack([v, F], axis=-1)


def ref_forward(X, Z, alpha, grid21, mag21):
    """Plain-JAX reference mirroring GPModel.forward (training=True)."""
    x = X[:, 0:1].astype(jnp.float32)
    v = X[:, 1:2].astype(jnp.float32)
    k = jnp.exp(-((x - Z[None, :]) ** 2) / (2.0 * LENGTHSCALE ** 2))
    F = k @ alpha[:, None]
    for m, mg in zip(grid21, mag21):
        F = F + mg * jnp.exp(-(x - m) ** 2 / (2.0 * _SIGMA ** 2)) * _NORM_CONST
    return jnp.stack([v, F], axis=-1)


if __name__ == "__main__":
    key = jax.random.PRNGKey(0)
    k_x, k_v, k_a = jax.random.split(key, 3)

    # N=4000 state points (position, velocity) -> TN=2048, padded to 4096 lanes,
    # even 2-step grid (shards across v7x's 2 TCs) and exercises the ragged edge.
    N = 4000
    xs = jax.random.uniform(k_x, (N,), jnp.float32, -1.0, 1.0)
    vs = jax.random.normal(k_v, (N,), jnp.float32)
    X = jnp.stack([xs, vs], axis=1)                  # (N, 2)

    # Deterministic synthetic GP parameters.
    Z = jnp.linspace(-1.0, 1.0, M_TRAIN, dtype=jnp.float32)
    alpha = 0.1 * jax.random.normal(k_a, (M_TRAIN,), jnp.float32)

    # Module parameters: grid = linspace(-1, 1, 21); perturb_mag with
    # perturb_0 = 0.3 -> indices 0 and 5 set, rest zero.
    grid21 = jnp.linspace(-1.0, 1.0, N_PERTURB, dtype=jnp.float32)
    mag21 = jnp.zeros((N_PERTURB,), jnp.float32).at[0].set(0.3).at[5].set(0.3)

    out = gp_model_forward(X, Z, alpha, grid21, mag21)
    out = jax.block_until_ready(out)

    ref = ref_forward(X, Z, alpha, grid21, mag21)
    assert out.shape == (N, 1, 2), out.shape
    assert jnp.allclose(out, ref, rtol=1e-5, atol=1e-4), "mismatch vs reference"

    print("KERNEL_OK")
</pallas_src>

<mosaic_0001>
module attributes {stable_mosaic.version = 11 : i64} {
  func.func @gp_forward_kernel(%arg0: i32, %arg1: memref<1x2048xf32, #tpu.memory_space<vmem>>, %arg2: memref<136x1xf32, #tpu.memory_space<vmem>>, %arg3: memref<136x1xf32, #tpu.memory_space<vmem>>, %arg4: memref<1x136xf32, #tpu.memory_space<vmem>>, %arg5: memref<1x2048xf32, #tpu.memory_space<vmem>>) attributes {dimension_semantics = [#tpu.dimension_semantics<parallel>], iteration_bounds = array<i64: 2>, scalar_prefetch = 0 : i64, scratch_operands = 0 : i64, tpu.core_type = #tpu.core_type<tc>, window_params = [{transform_indices = @transform_0, window_bounds = array<i64: 1, 2048>}, {pipeline_mode = #tpu.pipeline_mode<synchronous>, transform_indices = @transform_1, window_bounds = array<i64: 136, 1>}, {pipeline_mode = #tpu.pipeline_mode<synchronous>, transform_indices = @transform_2, window_bounds = array<i64: 136, 1>}, {pipeline_mode = #tpu.pipeline_mode<synchronous>, transform_indices = @transform_3, window_bounds = array<i64: 1, 136>}, {transform_indices = @transform_4, window_bounds = array<i64: 1, 2048>}]} {
    %c0 = arith.constant 0 : index
    %c0_0 = arith.constant 0 : index
    %0 = vector.load %arg2[%c0, %c0_0] : memref<136x1xf32, #tpu.memory_space<vmem>>, vector<136x1xf32>
    %c0_1 = arith.constant 0 : index
    %c0_2 = arith.constant 0 : index
    %1 = vector.load %arg3[%c0_1, %c0_2] : memref<136x1xf32, #tpu.memory_space<vmem>>, vector<136x1xf32>
    %c0_3 = arith.constant 0 : index
    %c0_4 = arith.constant 0 : index
    %2 = vector.load %arg4[%c0_3, %c0_4] : memref<1x136xf32, #tpu.memory_space<vmem>>, vector<1x136xf32>
    %c0_i32 = arith.constant 0 : i32
    %c128_i32 = arith.constant 128 : i32
    %3 = arith.muli %c0_i32, %c128_i32 : i32
    %4 = tpu.assume_multiple %3, 128 : i32
    %c0_5 = arith.constant 0 : index
    %5 = arith.index_cast %4 : i32 to index
    %6 = vector.load %arg1[%c0_5, %5] : memref<1x2048xf32, #tpu.memory_space<vmem>>, vector<1x128xf32>
    %7 = vector.broadcast %0 : vector<136x1xf32> to vector<136x128xf32>
    %8 = vector.broadcast %6 : vector<1x128xf32> to vector<136x128xf32>
    %9 = arith.subf %7, %8 : vector<136x128xf32>
    %10 = arith.mulf %9, %9 : vector<136x128xf32>
    %11 = vector.broadcast %1 : vector<136x1xf32> to vector<136x128xf32>
    %12 = arith.mulf %10, %11 : vector<136x128xf32>
    %13 = math.exp %12 : vector<136x128xf32>
    %cst = arith.constant dense<0.000000e+00> : vector<1x128xf32>
    %14 = tpu.matmul %2, %13, %cst {dimension_numbers = #tpu.dot_dimension_numbers<[1], [0], [0], [1], [0, 0, 1, 1], [], []>} : vector<1x136xf32>, vector<136x128xf32>, vector<1x128xf32> -> vector<1x128xf32>
    %c0_6 = arith.constant 0 : index
    %15 = arith.index_cast %4 : i32 to index
    %16 = vector.load %arg5[%c0_6, %15] : memref<1x2048xf32, #tpu.memory_space<vmem>>, vector<1x128xf32>
    tpu.vector_store %arg5[%c0_6, %15], %14 {strides = array<i32>} : memref<1x2048xf32, #tpu.memory_space<vmem>>, vector<1x128xf32>,
    %c1_i32 = arith.constant 1 : i32
    %c128_i32_7 = arith.constant 128 : i32
    %17 = arith.muli %c1_i32, %c128_i32_7 : i32
    %18 = tpu.assume_multiple %17, 128 : i32
    %c0_8 = arith.constant 0 : index
    %19 = arith.index_cast %18 : i32 to index
    %20 = vector.load %arg1[%c0_8, %19] : memref<1x2048xf32, #tpu.memory_space<vmem>>, vector<1x128xf32>
    %21 = vector.broadcast %0 : vector<136x1xf32> to vector<136x128xf32>
    %22 = vector.broadcast %20 : vector<1x128xf32> to vector<136x128xf32>
    %23 = arith.subf %21, %22 : vector<136x128xf32>
    %24 = arith.mulf %23, %23 : vector<136x128xf32>
    %25 = vector.broadcast %1 : vector<136x1xf32> to vector<136x128xf32>
    %26 = arith.mulf %24, %25 : vector<136x128xf32>
    %27 = math.exp %26 : vector<136x128xf32>
    %cst_9 = arith.constant dense<0.000000e+00> : vector<1x128xf32>
    %28 = tpu.matmul %2, %27, %cst_9 {dimension_numbers = #tpu.dot_dimension_numbers<[1], [0], [0], [1], [0, 0, 1, 1], [], []>} : vector<1x136xf32>, vector<136x128xf32>, vector<1x128xf32> -> vector<1x128xf32>
    %c0_10 = arith.constant 0 : index
    %29 = arith.index_cast %18 : i32 to index
    %30 = vector.load %arg5[%c0_10, %29] : memref<1x2048xf32, #tpu.memory_space<vmem>>, vector<1x128xf32>
    tpu.vector_store %arg5[%c0_10, %29], %28 {strides = array<i32>} : memref<1x2048xf32, #tpu.memory_space<vmem>>, vector<1x128xf32>,
    %c2_i32 = arith.constant 2 : i32
    %c128_i32_11 = arith.constant 128 : i32
    %31 = arith.muli %c2_i32, %c128_i32_11 : i32
    %32 = tpu.assume_multiple %31, 128 : i32
    %c0_12 = arith.constant 0 : index
    %33 = arith.index_cast %32 : i32 to index
    %34 = vector.load %arg1[%c0_12, %33] : memref<1x2048xf32, #tpu.memory_space<vmem>>, vector<1x128xf32>
    %35 = vector.broadcast %0 : vector<136x1xf32> to vector<136x128xf32>
    %36 = vector.broadcast %34 : vector<1x128xf32> to vector<136x128xf32>
    %37 = arith.subf %35, %36 : vector<136x128xf32>
    %38 = arith.mulf %37, %37 : vector<136x128xf32>
    %39 = vector.broadcast %1 : vector<136x1xf32> to vector<136x128xf32>
    %40 = arith.mulf %38, %39 : vector<136x128xf32>
    %41 = math.exp %40 : vector<136x128xf32>
    %cst_13 = arith.constant dense<0.000000e+00> : vector<1x128xf32>
    %42 = tpu.matmul %2, %41, %cst_13 {dimension_numbers = #tpu.dot_dimension_numbers<[1], [0], [0], [1], [0, 0, 1, 1], [], []>} : vector<1x136xf32>, vector<136x128xf32>, vector<1x128xf32> -> vector<1x128xf32>
    %c0_14 = arith.constant 0 : index
    %43 = arith.index_cast %32 : i32 to index
    %44 = vector.load %arg5[%c0_14, %43] : memref<1x2048xf32, #tpu.memory_space<vmem>>, vector<1x128xf32>
    tpu.vector_store %arg5[%c0_14, %43], %42 {strides = array<i32>} : memref<1x2048xf32, #tpu.memory_space<vmem>>, vector<1x128xf32>,
    %c3_i32 = arith.constant 3 : i32
    %c128_i32_15 = arith.constant 128 : i32
    %45 = arith.muli %c3_i32, %c128_i32_15 : i32
    %46 = tpu.assume_multiple %45, 128 : i32
    %c0_16 = arith.constant 0 : index
    %47 = arith.index_cast %46 : i32 to index
    %48 = vector.load %arg1[%c0_16, %47] : memref<1x2048xf32, #tpu.memory_space<vmem>>, vector<1x128xf32>
    %49 = vector.broadcast %0 : vector<136x1xf32> to vector<136x128xf32>
    %50 = vector.broadcast %48 : vector<1x128xf32> to vector<136x128xf32>
    %51 = arith.subf %49, %50 : vector<136x128xf32>
    %52 = arith.mulf %51, %51 : vector<136x128xf32>
    %53 = vector.broadcast %1 : vector<136x1xf32> to vector<136x128xf32>
    %54 = arith.mulf %52, %53 : vector<136x128xf32>
    %55 = math.exp %54 : vector<136x128xf32>
    %cst_17 = arith.constant dense<0.000000e+00> : vector<1x128xf32>
    %56 = tpu.matmul %2, %55, %cst_17 {dimension_numbers = #tpu.dot_dimension_numbers<[1], [0], [0], [1], [0, 0, 1, 1], [], []>} : vector<1x136xf32>, vector<136x128xf32>, vector<1x128xf32> -> vector<1x128xf32>
    %c0_18 = arith.constant 0 : index
    %57 = arith.index_cast %46 : i32 to index
    %58 = vector.load %arg5[%c0_18, %57] : memref<1x2048xf32, #tpu.memory_space<vmem>>, vector<1x128xf32>
    tpu.vector_store %arg5[%c0_18, %57], %56 {strides = array<i32>} : memref<1x2048xf32, #tpu.memory_space<vmem>>, vector<1x128xf32>,
    %c4_i32 = arith.constant 4 : i32
    %c128_i32_19 = arith.constant 128 : i32
    %59 = arith.muli %c4_i32, %c128_i32_19 : i32
    %60 = tpu.assume_multiple %59, 128 : i32
    %c0_20 = arith.constant 0 : index
    %61 = arith.index_cast %60 : i32 to index
    %62 = vector.load %arg1[%c0_20, %61] : memref<1x2048xf32, #tpu.memory_space<vmem>>, vector<1x128xf32>
    %63 = vector.broadcast %0 : vector<136x1xf32> to vector<136x128xf32>
    %64 = vector.broadcast %62 : vector<1x128xf32> to vector<136x128xf32>
    %65 = arith.subf %63, %64 : vector<136x128xf32>
    %66 = arith.mulf %65, %65 : vector<136x128xf32>
    %67 = vector.broadcast %1 : vector<136x1xf32> to vector<136x128xf32>
    %68 = arith.mulf %66, %67 : vector<136x128xf32>
    %69 = math.exp %68 : vector<136x128xf32>
    %cst_21 = arith.constant dense<0.000000e+00> : vector<1x128xf32>
    %70 = tpu.matmul %2, %69, %cst_21 {dimension_numbers = #tpu.dot_dimension_numbers<[1], [0], [0], [1], [0, 0, 1, 1], [], []>} : vector<1x136xf32>, vector<136x128xf32>, vector<1x128xf32> -> vector<1x128xf32>
    %c0_22 = arith.constant 0 : index
    %71 = arith.index_cast %60 : i32 to index
    %72 = vector.load %arg5[%c0_22, %71] : memref<1x2048xf32, #tpu.memory_space<vmem>>, vector<1x128xf32>
    tpu.vector_store %arg5[%c0_22, %71], %70 {strides = array<i32>} : memref<1x2048xf32, #tpu.memory_space<vmem>>, vector<1x128xf32>,
    %c5_i32 = arith.constant 5 : i32
    %c128_i32_23 = arith.constant 128 : i32
    %73 = arith.muli %c5_i32, %c128_i32_23 : i32
    %74 = tpu.assume_multiple %73, 128 : i32
    %c0_24 = arith.constant 0 : index
    %75 = arith.index_cast %74 : i32 to index
    %76 = vector.load %arg1[%c0_24, %75] : memref<1x2048xf32, #tpu.memory_space<vmem>>, vector<1x128xf32>
    %77 = vector.broadcast %0 : vector<136x1xf32> to vector<136x128xf32>
    %78 = vector.broadcast %76 : vector<1x128xf32> to vector<136x128xf32>
    %79 = arith.subf %77, %78 : vector<136x128xf32>
    %80 = arith.mulf %79, %79 : vector<136x128xf32>
    %81 = vector.broadcast %1 : vector<136x1xf32> to vector<136x128xf32>
    %82 = arith.mulf %80, %81 : vector<136x128xf32>
    %83 = math.exp %82 : vector<136x128xf32>
    %cst_25 = arith.constant dense<0.000000e+00> : vector<1x128xf32>
    %84 = tpu.matmul %2, %83, %cst_25 {dimension_numbers = #tpu.dot_dimension_numbers<[1], [0], [0], [1], [0, 0, 1, 1], [], []>} : vector<1x136xf32>, vector<136x128xf32>, vector<1x128xf32> -> vector<1x128xf32>
    %c0_26 = arith.constant 0 : index
    %85 = arith.index_cast %74 : i32 to index
    %86 = vector.load %arg5[%c0_26, %85] : memref<1x2048xf32, #tpu.memory_space<vmem>>, vector<1x128xf32>
    tpu.vector_store %arg5[%c0_26, %85], %84 {strides = array<i32>} : memref<1x2048xf32, #tpu.memory_space<vmem>>, vector<1x128xf32>,
    %c6_i32 = arith.constant 6 : i32
    %c128_i32_27 = arith.constant 128 : i32
    %87 = arith.muli %c6_i32, %c128_i32_27 : i32
    %88 = tpu.assume_multiple %87, 128 : i32
    %c0_28 = arith.constant 0 : index
    %89 = arith.index_cast %88 : i32 to index
    %90 = vector.load %arg1[%c0_28, %89] : memref<1x2048xf32, #tpu.memory_space<vmem>>, vector<1x128xf32>
    %91 = vector.broadcast %0 : vector<136x1xf32> to vector<136x128xf32>
    %92 = vector.broadcast %90 : vector<1x128xf32> to vector<136x128xf32>
    %93 = arith.subf %91, %92 : vector<136x128xf32>
    %94 = arith.mulf %93, %93 : vector<136x128xf32>
    %95 = vector.broadcast %1 : vector<136x1xf32> to vector<136x128xf32>
    %96 = arith.mulf %94, %95 : vector<136x128xf32>
    %97 = math.exp %96 : vector<136x128xf32>
    %cst_29 = arith.constant dense<0.000000e+00> : vector<1x128xf32>
    %98 = tpu.matmul %2, %97, %cst_29 {dimension_numbers = #tpu.dot_dimension_numbers<[1], [0], [0], [1], [0, 0, 1, 1], [], []>} : vector<1x136xf32>, vector<136x128xf32>, vector<1x128xf32> -> vector<1x128xf32>
    %c0_30 = arith.constant 0 : index
    %99 = arith.index_cast %88 : i32 to index
    %100 = vector.load %arg5[%c0_30, %99] : memref<1x2048xf32, #tpu.memory_space<vmem>>, vector<1x128xf32>
    tpu.vector_store %arg5[%c0_30, %99], %98 {strides = array<i32>} : memref<1x2048xf32, #tpu.memory_space<vmem>>, vector<1x128xf32>,
    %c7_i32 = arith.constant 7 : i32
    %c128_i32_31 = arith.constant 128 : i32
    %101 = arith.muli %c7_i32, %c128_i32_31 : i32
    %102 = tpu.assume_multiple %101, 128 : i32
    %c0_32 = arith.constant 0 : index
    %103 = arith.index_cast %102 : i32 to index
    %104 = vector.load %arg1[%c0_32, %103] : memref<1x2048xf32, #tpu.memory_space<vmem>>, vector<1x128xf32>
    %105 = vector.broadcast %0 : vector<136x1xf32> to vector<136x128xf32>
    %106 = vector.broadcast %104 : vector<1x128xf32> to vector<136x128xf32>
    %107 = arith.subf %105, %106 : vector<136x128xf32>
    %108 = arith.mulf %107, %107 : vector<136x128xf32>
    %109 = vector.broadcast %1 : vector<136x1xf32> to vector<136x128xf32>
    %110 = arith.mulf %108, %109 : vector<136x128xf32>
    %111 = math.exp %110 : vector<136x128xf32>
    %cst_33 = arith.constant dense<0.000000e+00> : vector<1x128xf32>
    %112 = tpu.matmul %2, %111, %cst_33 {dimension_numbers = #tpu.dot_dimension_numbers<[1], [0], [0], [1], [0, 0, 1, 1], [], []>} : vector<1x136xf32>, vector<136x128xf32>, vector<1x128xf32> -> vector<1x128xf32>
    %c0_34 = arith.constant 0 : index
    %113 = arith.index_cast %102 : i32 to index
    %114 = vector.load %arg5[%c0_34, %113] : memref<1x2048xf32, #tpu.memory_space<vmem>>, vector<1x128xf32>
    tpu.vector_store %arg5[%c0_34, %113], %112 {strides = array<i32>} : memref<1x2048xf32, #tpu.memory_space<vmem>>, vector<1x128xf32>,
    %c8_i32 = arith.constant 8 : i32
    %c128_i32_35 = arith.constant 128 : i32
    %115 = arith.muli %c8_i32, %c128_i32_35 : i32
    %116 = tpu.assume_multiple %115, 128 : i32
    %c0_36 = arith.constant 0 : index
    %117 = arith.index_cast %116 : i32 to index
    %118 = vector.load %arg1[%c0_36, %117] : memref<1x2048xf32, #tpu.memory_space<vmem>>, vector<1x128xf32>
    %119 = vector.broadcast %0 : vector<136x1xf32> to vector<136x128xf32>
    %120 = vector.broadcast %118 : vector<1x128xf32> to vector<136x128xf32>
    %121 = arith.subf %119, %120 : vector<136x128xf32>
    %122 = arith.mulf %121, %121 : vector<136x128xf32>
    %123 = vector.broadcast %1 : vector<136x1xf32> to vector<136x128xf32>
    %124 = arith.mulf %122, %123 : vector<136x128xf32>
    %125 = math.exp %124 : vector<136x128xf32>
    %cst_37 = arith.constant dense<0.000000e+00> : vector<1x128xf32>
    %126 = tpu.matmul %2, %125, %cst_37 {dimension_numbers = #tpu.dot_dimension_numbers<[1], [0], [0], [1], [0, 0, 1, 1], [], []>} : vector<1x136xf32>, vector<136x128xf32>, vector<1x128xf32> -> vector<1x128xf32>
    %c0_38 = arith.constant 0 : index
    %127 = arith.index_cast %116 : i32 to index
    %128 = vector.load %arg5[%c0_38, %127] : memref<1x2048xf32, #tpu.memory_space<vmem>>, vector<1x128xf32>
    tpu.vector_store %arg5[%c0_38, %127], %126 {strides = array<i32>} : memref<1x2048xf32, #tpu.memory_space<vmem>>, vector<1x128xf32>,
    %c9_i32 = arith.constant 9 : i32
    %c128_i32_39 = arith.constant 128 : i32
    %129 = arith.muli %c9_i32, %c128_i32_39 : i32
    %130 = tpu.assume_multiple %129, 128 : i32
    %c0_40 = arith.constant 0 : index
    %131 = arith.index_cast %130 : i32 to index
    %132 = vector.load %arg1[%c0_40, %131] : memref<1x2048xf32, #tpu.memory_space<vmem>>, vector<1x128xf32>
    %133 = vector.broadcast %0 : vector<136x1xf32> to vector<136x128xf32>
    %134 = vector.broadcast %132 : vector<1x128xf32> to vector<136x128xf32>
    %135 = arith.subf %133, %134 : vector<136x128xf32>
    %136 = arith.mulf %135, %135 : vector<136x128xf32>
    %137 = vector.broadcast %1 : vector<136x1xf32> to vector<136x128xf32>
    %138 = arith.mulf %136, %137 : vector<136x128xf32>
    %139 = math.exp %138 : vector<136x128xf32>
    %cst_41 = arith.constant dense<0.000000e+00> : vector<1x128xf32>
    %140 = tpu.matmul %2, %139, %cst_41 {dimension_numbers = #tpu.dot_dimension_numbers<[1], [0], [0], [1], [0, 0, 1, 1], [], []>} : vector<1x136xf32>, vector<136x128xf32>, vector<1x128xf32> -> vector<1x128xf32>
    %c0_42 = arith.constant 0 : index
    %141 = arith.index_cast %130 : i32 to index
    %142 = vector.load %arg5[%c0_42, %141] : memref<1x2048xf32, #tpu.memory_space<vmem>>, vector<1x128xf32>
    tpu.vector_store %arg5[%c0_42, %141], %140 {strides = array<i32>} : memref<1x2048xf32, #tpu.memory_space<vmem>>, vector<1x128xf32>,
    %c10_i32 = arith.constant 10 : i32
    %c128_i32_43 = arith.constant 128 : i32
    %143 = arith.muli %c10_i32, %c128_i32_43 : i32
    %144 = tpu.assume_multiple %143, 128 : i32
    %c0_44 = arith.constant 0 : index
    %145 = arith.index_cast %144 : i32 to index
    %146 = vector.load %arg1[%c0_44, %145] : memref<1x2048xf32, #tpu.memory_space<vmem>>, vector<1x128xf32>
    %147 = vector.broadcast %0 : vector<136x1xf32> to vector<136x128xf32>
    %148 = vector.broadcast %146 : vector<1x128xf32> to vector<136x128xf32>
    %149 = arith.subf %147, %148 : vector<136x128xf32>
    %150 = arith.mulf %149, %149 : vector<136x128xf32>
    %151 = vector.broadcast %1 : vector<136x1xf32> to vector<136x128xf32>
    %152 = arith.mulf %150, %151 : vector<136x128xf32>
    %153 = math.exp %152 : vector<136x128xf32>
    %cst_45 = arith.constant dense<0.000000e+00> : vector<1x128xf32>
    %154 = tpu.matmul %2, %153, %cst_45 {dimension_numbers = #tpu.dot_dimension_numbers<[1], [0], [0], [1], [0, 0, 1, 1], [], []>} : vector<1x136xf32>, vector<136x128xf32>, vector<1x128xf32> -> vector<1x128xf32>
    %c0_46 = arith.constant 0 : index
    %155 = arith.index_cast %144 : i32 to index
    %156 = vector.load %arg5[%c0_46, %155] : memref<1x2048xf32, #tpu.memory_space<vmem>>, vector<1x128xf32>
    tpu.vector_store %arg5[%c0_46, %155], %154 {strides = array<i32>} : memref<1x2048xf32, #tpu.memory_space<vmem>>, vector<1x128xf32>,
    %c11_i32 = arith.constant 11 : i32
    %c128_i32_47 = arith.constant 128 : i32
    %157 = arith.muli %c11_i32, %c128_i32_47 : i32
    %158 = tpu.assume_multiple %157, 128 : i32
    %c0_48 = arith.constant 0 : index
    %159 = arith.index_cast %158 : i32 to index
    %160 = vector.load %arg1[%c0_48, %159] : memref<1x2048xf32, #tpu.memory_space<vmem>>, vector<1x128xf32>
    %161 = vector.broadcast %0 : vector<136x1xf32> to vector<136x128xf32>
    %162 = vector.broadcast %160 : vector<1x128xf32> to vector<136x128xf32>
    %163 = arith.subf %161, %162 : vector<136x128xf32>
    %164 = arith.mulf %163, %163 : vector<136x128xf32>
    %165 = vector.broadcast %1 : vector<136x1xf32> to vector<136x128xf32>
    %166 = arith.mulf %164, %165 : vector<136x128xf32>
    %167 = math.exp %166 : vector<136x128xf32>
    %cst_49 = arith.constant dense<0.000000e+00> : vector<1x128xf32>
    %168 = tpu.matmul %2, %167, %cst_49 {dimension_numbers = #tpu.dot_dimension_numbers<[1], [0], [0], [1], [0, 0, 1, 1], [], []>} : vector<1x136xf32>, vector<136x128xf32>, vector<1x128xf32> -> vector<1x128xf32>
    %c0_50 = arith.constant 0 : index
    %169 = arith.index_cast %158 : i32 to index
    %170 = vector.load %arg5[%c0_50, %169] : memref<1x2048xf32, #tpu.memory_space<vmem>>, vector<1x128xf32>
    tpu.vector_store %arg5[%c0_50, %169], %168 {strides = array<i32>} : memref<1x2048xf32, #tpu.memory_space<vmem>>, vector<1x128xf32>,
    %c12_i32 = arith.constant 12 : i32
    %c128_i32_51 = arith.constant 128 : i32
    %171 = arith.muli %c12_i32, %c128_i32_51 : i32
    %172 = tpu.assume_multiple %171, 128 : i32
    %c0_52 = arith.constant 0 : index
    %173 = arith.index_cast %172 : i32 to index
    %174 = vector.load %arg1[%c0_52, %173] : memref<1x2048xf32, #tpu.memory_space<vmem>>, vector<1x128xf32>
    %175 = vector.broadcast %0 : vector<136x1xf32> to vector<136x128xf32>
    %176 = vector.broadcast %174 : vector<1x128xf32> to vector<136x128xf32>
    %177 = arith.subf %175, %176 : vector<136x128xf32>
    %178 = arith.mulf %177, %177 : vector<136x128xf32>
    %179 = vector.broadcast %1 : vector<136x1xf32> to vector<136x128xf32>
    %180 = arith.mulf %178, %179 : vector<136x128xf32>
    %181 = math.exp %180 : vector<136x128xf32>
    %cst_53 = arith.constant dense<0.000000e+00> : vector<1x128xf32>
    %182 = tpu.matmul %2, %181, %cst_53 {dimension_numbers = #tpu.dot_dimension_numbers<[1], [0], [0], [1], [0, 0, 1, 1], [], []>} : vector<1x136xf32>, vector<136x128xf32>, vector<1x128xf32> -> vector<1x128xf32>
    %c0_54 = arith.constant 0 : index
    %183 = arith.index_cast %172 : i32 to index
    %184 = vector.load %arg5[%c0_54, %183] : memref<1x2048xf32, #tpu.memory_space<vmem>>, vector<1x128xf32>
    tpu.vector_store %arg5[%c0_54, %183], %182 {strides = array<i32>} : memref<1x2048xf32, #tpu.memory_space<vmem>>, vector<1x128xf32>,
    %c13_i32 = arith.constant 13 : i32
    %c128_i32_55 = arith.constant 128 : i32
    %185 = arith.muli %c13_i32, %c128_i32_55 : i32
    %186 = tpu.assume_multiple %185, 128 : i32
    %c0_56 = arith.constant 0 : index
    %187 = arith.index_cast %186 : i32 to index
    %188 = vector.load %arg1[%c0_56, %187] : memref<1x2048xf32, #tpu.memory_space<vmem>>, vector<1x128xf32>
    %189 = vector.broadcast %0 : vector<136x1xf32> to vector<136x128xf32>
    %190 = vector.broadcast %188 : vector<1x128xf32> to vector<136x128xf32>
    %191 = arith.subf %189, %190 : vector<136x128xf32>
    %192 = arith.mulf %191, %191 : vector<136x128xf32>
    %193 = vector.broadcast %1 : vector<136x1xf32> to vector<136x128xf32>
    %194 = arith.mulf %192, %193 : vector<136x128xf32>
    %195 = math.exp %194 : vector<136x128xf32>
    %cst_57 = arith.constant dense<0.000000e+00> : vector<1x128xf32>
    %196 = tpu.matmul %2, %195, %cst_57 {dimension_numbers = #tpu.dot_dimension_numbers<[1], [0], [0], [1], [0, 0, 1, 1], [], []>} : vector<1x136xf32>, vector<136x128xf32>, vector<1x128xf32> -> vector<1x128xf32>
    %c0_58 = arith.constant 0 : index
    %197 = arith.index_cast %186 : i32 to index
    %198 = vector.load %arg5[%c0_58, %197] : memref<1x2048xf32, #tpu.memory_space<vmem>>, vector<1x128xf32>
    tpu.vector_store %arg5[%c0_58, %197], %196 {strides = array<i32>} : memref<1x2048xf32, #tpu.memory_space<vmem>>, vector<1x128xf32>,
    %c14_i32 = arith.constant 14 : i32
    %c128_i32_59 = arith.constant 128 : i32
    %199 = arith.muli %c14_i32, %c128_i32_59 : i32
    %200 = tpu.assume_multiple %199, 128 : i32
    %c0_60 = arith.constant 0 : index
    %201 = arith.index_cast %200 : i32 to index
    %202 = vector.load %arg1[%c0_60, %201] : memref<1x2048xf32, #tpu.memory_space<vmem>>, vector<1x128xf32>
    %203 = vector.broadcast %0 : vector<136x1xf32> to vector<136x128xf32>
    %204 = vector.broadcast %202 : vector<1x128xf32> to vector<136x128xf32>
    %205 = arith.subf %203, %204 : vector<136x128xf32>
    %206 = arith.mulf %205, %205 : vector<136x128xf32>
    %207 = vector.broadcast %1 : vector<136x1xf32> to vector<136x128xf32>
    %208 = arith.mulf %206, %207 : vector<136x128xf32>
    %209 = math.exp %208 : vector<136x128xf32>
    %cst_61 = arith.constant dense<0.000000e+00> : vector<1x128xf32>
    %210 = tpu.matmul %2, %209, %cst_61 {dimension_numbers = #tpu.dot_dimension_numbers<[1], [0], [0], [1], [0, 0, 1, 1], [], []>} : vector<1x136xf32>, vector<136x128xf32>, vector<1x128xf32> -> vector<1x128xf32>
    %c0_62 = arith.constant 0 : index
    %211 = arith.index_cast %200 : i32 to index
    %212 = vector.load %arg5[%c0_62, %211] : memref<1x2048xf32, #tpu.memory_space<vmem>>, vector<1x128xf32>
    tpu.vector_store %arg5[%c0_62, %211], %210 {strides = array<i32>} : memref<1x2048xf32, #tpu.memory_space<vmem>>, vector<1x128xf32>,
    %c15_i32 = arith.constant 15 : i32
    %c128_i32_63 = arith.constant 128 : i32
    %213 = arith.muli %c15_i32, %c128_i32_63 : i32
    %214 = tpu.assume_multiple %213, 128 : i32
    %c0_64 = arith.constant 0 : index
    %215 = arith.index_cast %214 : i32 to index
    %216 = vector.load %arg1[%c0_64, %215] : memref<1x2048xf32, #tpu.memory_space<vmem>>, vector<1x128xf32>
    %217 = vector.broadcast %0 : vector<136x1xf32> to vector<136x128xf32>
    %218 = vector.broadcast %216 : vector<1x128xf32> to vector<136x128xf32>
    %219 = arith.subf %217, %218 : vector<136x128xf32>
    %220 = arith.mulf %219, %219 : vector<136x128xf32>
    %221 = vector.broadcast %1 : vector<136x1xf32> to vector<136x128xf32>
    %222 = arith.mulf %220, %221 : vector<136x128xf32>
    %223 = math.exp %222 : vector<136x128xf32>
    %cst_65 = arith.constant dense<0.000000e+00> : vector<1x128xf32>
    %224 = tpu.matmul %2, %223, %cst_65 {dimension_numbers = #tpu.dot_dimension_numbers<[1], [0], [0], [1], [0, 0, 1, 1], [], []>} : vector<1x136xf32>, vector<136x128xf32>, vector<1x128xf32> -> vector<1x128xf32>
    %c0_66 = arith.constant 0 : index
    %225 = arith.index_cast %214 : i32 to index
    %226 = vector.load %arg5[%c0_66, %225] : memref<1x2048xf32, #tpu.memory_space<vmem>>, vector<1x128xf32>
    tpu.vector_store %arg5[%c0_66, %225], %224 {strides = array<i32>} : memref<1x2048xf32, #tpu.memory_space<vmem>>, vector<1x128xf32>,
    %c16_i32 = arith.constant 16 : i32
    return
  }
  func.func @transform_0(%arg0: i32) -> (i32, i32) {
    %c0_i32 = arith.constant 0 : i32
    %c0_i32_0 = arith.constant 0 : i32
    return %c0_i32, %arg0 : i32, i32
  }
  func.func @transform_1(%arg0: i32) -> (i32, i32) {
    %c0_i32 = arith.constant 0 : i32
    %c0_i32_0 = arith.constant 0 : i32
    %c0_i32_1 = arith.constant 0 : i32
    return %c0_i32, %c0_i32_0 : i32, i32
  }
  func.func @transform_2(%arg0: i32) -> (i32, i32) {
    %c0_i32 = arith.constant 0 : i32
    %c0_i32_0 = arith.constant 0 : i32
    %c0_i32_1 = arith.constant 0 : i32
    return %c0_i32, %c0_i32_0 : i32, i32
  }
  func.func @transform_3(%arg0: i32) -> (i32, i32) {
    %c0_i32 = arith.constant 0 : i32
    %c0_i32_0 = arith.constant 0 : i32
    %c0_i32_1 = arith.constant 0 : i32
    return %c0_i32, %c0_i32_0 : i32, i32
  }
  func.func @transform_4(%arg0: i32) -> (i32, i32) {
    %c0_i32 = arith.constant 0 : i32
    %c0_i32_0 = arith.constant 0 : i32
    return %c0_i32, %arg0 : i32, i32
  }
}

</mosaic_0001>

<bundles_post_ra>
// kernel: tpu_custom_call.1
= control target key start
LH: loop header
LB: loop body
LE: loop exit
PB: predicated region body
PF: predicated region fallthrough
CT: control target
= control target key end

     0   :  { %9 = vsyncpa [#allocation3], 0  ;;  %s4839_s0 = inlined_call_operand.vmem [shape: f32[1,4096], index: 0, kind: input, shape index: {}]   ;;  %s4840_s1 = inlined_call_operand.vmem [shape: f32[136,1], index: 1, kind: input, shape index: {}]   ;;  %s4841_s2 = inlined_call_operand.vmem [shape: f32[136,1], index: 2, kind: input, shape index: {}]   ;;  %s4842_s3 = inlined_call_operand.vmem [shape: f32[1,136], index: 3, kind: input, shape index: {}]   ;;  %s4843_s4 = inlined_call_operand.hbm [shape: f32[1,4096], index: 4, kind: output, shape index: {}]  }
   0x1   :  { %11 = vsyncpa [#allocation3 + $0x1], 0  ;;  %s3353_s15 = smov 0   ;;  %s3355_s16 = smov 0  }
   0x2   :  { %s3357_s17 = smov 0   ;;  %s3359_s18 = smov 0  }
   0x3 LB: > { %s2593_s19 = sadd.s32 4294967295, %s3325_s18   ;;  %s2594_s20 = sadd.s32 4294967294, %s3325_s18   ;;  %s3325_s18 = sphi %s3359_s18, %s4947_s18   ;;  %s3321_s17 = sphi %s3357_s17, %s4946_s17   ;;  %s3317_s16 = sphi %s3355_s16, %s4945_s16   ;;  %s3313_s15 = sphi %s3353_s15, %s4944_s15  }
   0x4   : > { %s3376_s21 = sadd.s32 1, %s3325_s18   ;;  %s113_s22 = sadd.s32 1, %s3321_s17 }
   0x5   : > { %s110_s23 = ssub.s32 %s3325_s18, %s3376_s21  ;;  %p123_p0 = scmp.ne.s32.totalorder %s3321_s17, %s3317_s16 }
   0x6   : > { %p111_p1 = scmp.eq.s32.totalorder %s110_s23, 0  ;;  %p124_p2 = scmp.eq.s32.totalorder %s2593_s19, 1 }
   0x7   : > { %p129_p3 = scmp.ne.s32.totalorder %s3317_s16, %s3313_s15  ;;  %p130_p4 = scmp.eq.s32.totalorder %s2594_s20, 1 }
   0x8   : > { %s3386_s24 = scalar_select %p111_p1, %s3321_s17, %s113_s22  }
   0x9   : > { %p3388_p5 = por %p124_p2, %p123_p0  ;;  %p3392_p6 = por %p130_p4, %p129_p3 }
   0xa   : > { %p2597_p7 = scmp.ge.s32.totalorder %s3325_s18, 1  ;;  %p165_p8 = scmp.lt.s32.totalorder %s3325_s18, 3 }
   0xc   : > { %p166_p9 = pnand %p2597_p7, %p165_p8 }
   0xe   : > { %169 = sbr.rel (%p166_p9) target bundleno = 631 (0x277), region = 36 }
  0x13   : > { %v211_v0 = vld [vmem:[%s4840_s1 + $0x78] sm:$0xff]  ;;  %v209_v1 = vld [vmem:[%s4840_s1 + $0x68] sm:$0xff]  ;;  %v208_v2 = vld [vmem:[%s4840_s1 + $0x60] sm:$0xff]  ;;  %s3407_s7 = sshll.u32 %s2593_s19, 4  ;;  %v3327_v3 = vmov 0   ;;  %vm494_vm0 = vcmask 64512  }
  0x14   : > { %2692 = vset.pattern.permute.xlu2 %v3327_v3  ;;  %2691 = vset.pattern.permute.xlu1 %v3327_v3  ;;  %p191_p10 = scmp.lt.s32.totalorder %s3407_s7, 31  ;;  %v228_v4 = vld [vmem:[%s4841_s2 + $0x78] sm:$0xff]  ;;  %v210_v5 = vld [vmem:[%s4840_s1 + $0x70] sm:$0xff]  ;;  %v226_v7 = vld [vmem:[%s4841_s2 + $0x68] sm:$0xff]  ;;  %s187_s11 = sand.u32 1, %s3317_s16  }
  0x15   : > { %2690 = vset.pattern.permute.xlu0 %v3327_v3  ;;  %299 = vperm.xlu1 %2691, %v209_v1   ;;  %v227_v6 = vld [vmem:[%s4841_s2 + $0x70] sm:$0xff]  ;;  %v207_v8 = vld [vmem:[%s4840_s1 + $0x58] sm:$0xff]  ;;  %v205_v10 = vld [vmem:[%s4840_s1 + $0x48] sm:$0xff]  ;;  %s4729_s12 = sshll.u32 %s187_s11, 4  ;;  %s2533_s20 = scalar_lea.hbm %s4843_s4, %s3407_s7 }
  0x16   : > { %309 = vperm.xlu0 %2690, %v211_v0   ;;  %294 = vperm.xlu2 %2692, %v208_v2   ;;  %s192_s8 = scalar_select %p191_p10, %s3407_s7, 31  ;;  %v206_v9 = vld [vmem:[%s4840_s1 + $0x50] sm:$0xff]  ;;  %v225_v11 = vld [vmem:[%s4841_s2 + $0x60] sm:$0xff]  ;;  %v224_v12 = vld [vmem:[%s4841_s2 + $0x58] sm:$0xff] }
  0x17   : > { %v223_v13 = vld [vmem:[%s4841_s2 + $0x50] sm:$0xff]  ;;  %v204_v14 = vld [vmem:[%s4840_s1 + $0x40] sm:$0xff]  ;;  %v203_v15 = vld [vmem:[%s4840_s1 + $0x38] sm:$0xff]  ;;  %s2537_s23 = sshll.u32 %s2533_s20, 4  ;;  %s2523_s27 = scalar_lea.sflag [#allocation3], %s187_s11  ;;  %s2538_s23 = int_to_ptr.hbm [resolvable:$true] %s2537_s23 }
  0x18   : > { %s3417_s13 = scalar_lea.vmem %s4839_s0, %s192_s8  ;;  %v202_v16 = vld [vmem:[%s4840_s1 + $0x30] sm:$0xff]  ;;  %v222_v17 = vld [vmem:[%s4841_s2 + $0x48] sm:$0xff]  ;;  %v221_v18 = vld [vmem:[%s4841_s2 + $0x40] sm:$0xff]  ;;  %s3277_s28 = sshra.s32 %s2538_s23, 4  ;;  %s3278_s28 = int_to_ptr.hbm [resolvable:$true] %s3277_s28 }
  0x19   : > { %v220_v19 = vld [vmem:[%s4841_s2 + $0x38] sm:$0xff]  ;;  %v201_v20 = vld [vmem:[%s4840_s1 + $0x28] sm:$0xff]  ;;  %v200_v21 = vld [vmem:[%s4840_s1 + $0x20] sm:$0xff]  ;;  %s3279_s29 = scalar_lea.hbm %s3278_s28, 16  ;;  %s3283_s5 = scalar_lea.hbm %s4843_s4, 32 }
  0x1a   : > { %v212_v22 = vld [vmem:[%s4840_s1 + $0x80] sm:$0xff]  ;;  %v219_v23 = vld [vmem:[%s4841_s2 + $0x30] sm:$0xff]  ;;  %v199_v24 = vld [vmem:[%s4840_s1 + $0x18] sm:$0xff]  ;;  %p3280_p11 = scmp.ne.s32.totalorder %s3278_s28, %s3279_s29  ;;  %p3284_p0 = scmp.lt.s32.totalorder %s3278_s28, %s4843_s4 }
  0x1b   : > { %v198_v25 = vld [vmem:[%s4840_s1 + $0x10] sm:$0xff]  ;;  %v218_v26 = vld [vmem:[%s4841_s2 + $0x28] sm:$0xff]  ;;  %v217_v27 = vld [vmem:[%s4841_s2 + $0x20] sm:$0xff]  ;;  %p3285_p1 = scmp.lt.s32.totalorder %s3283_s5, %s3279_s29 }
  0x1c   : > { %v197_v28 = vld [vmem:[%s4840_s1 + $0x8] sm:$0xff]  ;;  %v229_v29 = vld [vmem:[%s4841_s2 + $0x80] sm:$0xff]  ;;  %v216_v30 = vld [vmem:[%s4841_s2 + $0x18] sm:$0xff]  ;;  %p3281_p12 = pnand %p3280_p11, %p3388_p5 }
  0x1d   : > { %431 = vperm.xlu1 %2691, %v228_v4   ;;  %v215_v31 = vld [vmem:[%s4841_s2 + $0x10] sm:$0xff]  ;;  %v214_v32 = vld [vmem:[%s4841_s2 + $0x8] sm:$0xff]  ;;  %v196_v33 = vld [vmem:[%s4840_s1] sm:$0xff]  ;;  %p3286_p2 = por %p3285_p1, %p3284_p0 }
  0x1e   : > { %304 = vperm.xlu0 %2690, %v210_v5   ;;  %426 = vperm.xlu2 %2692, %v227_v6   ;;  %v213_v34 = vld [vmem:[%s4841_s2] sm:$0xff]  ;;  %p3282_p13 = pneg %p3281_p12 }
  0x1f   : > { %v3516_v38 = vld [vmem:[%s3417_s13] ss:$0 sm:$0xff]  ;;  %v3519_v39 = vld [vmem:[%s3417_s13 + $0x1] ss:$0 sm:$0xff]  ;;  %v3522_v40 = vld [vmem:[%s3417_s13 + $0x2] ss:$0 sm:$0xff] }
  0x20   : > { %v3525_v41 = vld [vmem:[%s3417_s13 + $0x3] ss:$0 sm:$0xff]  ;;  %v3566_v61 = vld [vmem:[%s3417_s13 + $0x4] ss:$0 sm:$0xff]  ;;  %p3287_p3 = pnand %p3286_p2, %p3282_p13 }
  0x25   : > { %421 = vperm.xlu1 %2691, %v226_v7  }
  0x26   : > { %289 = vperm.xlu0 %2690, %v207_v8   ;;  %284 = vperm.xlu2 %2692, %v206_v9  }
  0x2d   : > { %279 = vperm.xlu1 %2691, %v205_v10  }
  0x2e   : > { %416 = vperm.xlu0 %2690, %v225_v11   ;;  %411 = vperm.xlu2 %2692, %v224_v12  }
  0x35   : > { %406 = vperm.xlu1 %2691, %v223_v13  }
  0x36   : > { %274 = vperm.xlu0 %2690, %v204_v14   ;;  %269 = vperm.xlu2 %2692, %v203_v15  }
  0x3d   : > { %264 = vperm.xlu1 %2691, %v202_v16  }
  0x3e   : > { %401 = vperm.xlu0 %2690, %v222_v17   ;;  %396 = vperm.xlu2 %2692, %v221_v18  }
  0x45   : > { %391 = vperm.xlu1 %2691, %v220_v19  }
  0x46   : > { %259 = vperm.xlu0 %2690, %v201_v20   ;;  %254 = vperm.xlu2 %2692, %v200_v21  }
  0x4d   : > { %314 = vperm.xlu1 %2691, %v212_v22  }
  0x4e   : > { %386 = vperm.xlu0 %2690, %v219_v23   ;;  %249 = vperm.xlu2 %2692, %v199_v24  }
  0x55   : > { %244 = vperm.xlu1 %2691, %v198_v25  }
  0x56   : > { %381 = vperm.xlu0 %2690, %v218_v26   ;;  %376 = vperm.xlu2 %2692, %v217_v27  }
  0x5d   : > { %239 = vperm.xlu1 %2691, %v197_v28  }
  0x5e   : > { %436 = vperm.xlu0 %2690, %v229_v29   ;;  %371 = vperm.xlu2 %2692, %v216_v30  }
  0x65   : > { %366 = vperm.xlu1 %2691, %v215_v31  }
  0x66   : > { %361 = vperm.xlu2 %2692, %v214_v32   ;;  %234 = vperm.xlu0 %2690, %v196_v33  }
  0x6e   : > { %356 = vperm.xlu0 %2690, %v213_v34  }
  0x70   : > { %v3509_v35 = vpop.permute.xlu2 %294 }
  0x71   : > { %4885 = vst [vmem:[#allocation5_spill] sm:$0xff] %v3509_v35  ;;  %v332_v43 = vsub.f32 %v3509_v35, %v3516_v38  ;;  %v559_v46 = vsub.f32 %v3509_v35, %v3519_v39  ;;  %v691_v47 = vsub.f32 %v3509_v35, %v3522_v40  ;;  %v823_v49 = vsub.f32 %v3509_v35, %v3525_v41 }
  0x73   : > { %v3561_v59 = vmul.f32 %v332_v43, %v332_v43  ;;  %v3568_v62 = vmul.f32 %v559_v46, %v559_v46  ;;  %v3570_v63 = vmul.f32 %v691_v47, %v691_v47  ;;  %v3574_v1 = vmul.f32 %v823_v49, %v823_v49 }
  0x78   : > { %v3511_v36 = vpop.permute.xlu2 %426 }
  0x80   : > { %v3513_v37 = vpop.permute.xlu2 %284 }
  0x81   : > { %4886 = vst [vmem:[#allocation6_spill] sm:$0xff] %v3513_v37  ;;  %v330_v48 = vsub.f32 %v3513_v37, %v3516_v38  ;;  %v557_v51 = vsub.f32 %v3513_v37, %v3519_v39  ;;  %v689_v52 = vsub.f32 %v3513_v37, %v3522_v40  ;;  %v821_v5 = vsub.f32 %v3513_v37, %v3525_v41 }
  0x83   : > { %v3572_v0 = vmul.f32 %v330_v48, %v330_v48  ;;  %v3576_v3 = vmul.f32 %v557_v51, %v557_v51  ;;  %v3578_v4 = vmul.f32 %v689_v52, %v689_v52  ;;  %v3604_v32 = vmul.f32 %v821_v5, %v821_v5 }
  0x87   : > { %v3527_v42 = vpop.permute.xlu1 %299 }
  0x88   : > { %4887 = vst [vmem:[#allocation7_spill] sm:$0xff] %v3527_v42  ;;  %v3531_v44 = vpop.permute.xlu0 %309  ;;  %v3533_v45 = vpop.permute.xlu2 %411  ;;  %v333_v50 = vsub.f32 %v3527_v42, %v3516_v38  ;;  %v560_v57 = vsub.f32 %v3527_v42, %v3519_v39  ;;  %v692_v58 = vsub.f32 %v3527_v42, %v3522_v40  ;;  %v824_v60 = vsub.f32 %v3527_v42, %v3525_v41 }
  0x89   : > { %4888 = vst [vmem:[#allocation8_spill] sm:$0xff] %v3531_v44  ;;  %v335_v53 = vsub.f32 %v3531_v44, %v3516_v38  ;;  %v562_v54 = vsub.f32 %v3531_v44, %v3519_v39  ;;  %v694_v55 = vsub.f32 %v3531_v44, %v3522_v40  ;;  %v826_v56 = vsub.f32 %v3531_v44, %v3525_v41 }
  0x8a   : > { %4889 = vst [vmem:[#allocation9_spill] sm:$0xff] %v3533_v45  ;;  %v350_v2 = vmul.f32 %v333_v50, %v333_v50  ;;  %v577_v11 = vmul.f32 %v560_v57, %v560_v57  ;;  %v709_v12 = vmul.f32 %v692_v58, %v692_v58  ;;  %v841_v13 = vmul.f32 %v824_v60, %v824_v60 }
  0x8b   : > { %v352_v6 = vmul.f32 %v335_v53, %v335_v53  ;;  %v579_v7 = vmul.f32 %v562_v54, %v562_v54  ;;  %v711_v8 = vmul.f32 %v694_v55, %v694_v55  ;;  %v843_v9 = vmul.f32 %v826_v56, %v826_v56 }
  0x8c   : > { %v958_v14 = vsub.f32 %v3531_v44, %v3566_v61 }
  0x8e   : > { %v3608_v43 = vmul.f32 %v958_v14, %v958_v14 }
  0x8f   : > { %v3582_v10 = vpop.permute.xlu1 %431 }
  0x90   : > { %v3586_v15 = vpop.permute.xlu0 %304  ;;  %v3588_v16 = vpop.permute.xlu2 %269  ;;  %v454_v17 = vmul.f32 %v3582_v10, %v352_v6  ;;  %v596_v18 = vmul.f32 %v579_v7, %v3582_v10  ;;  %v728_v19 = vmul.f32 %v711_v8, %v3582_v10  ;;  %v860_v20 = vmul.f32 %v843_v9, %v3582_v10 }
  0x91   : > { %4890 = vst [vmem:[#allocation10_spill] sm:$0xff] %v3588_v16  ;;  %v334_v21 = vsub.f32 %v3586_v15, %v3516_v38  ;;  %v561_v22 = vsub.f32 %v3586_v15, %v3519_v39  ;;  %v693_v23 = vsub.f32 %v3586_v15, %v3522_v40  ;;  %v327_v24 = vsub.f32 %v3588_v16, %v3516_v38 }
  0x92   : > { %v486_v25 = vmul.f32 1.442695, %v454_v17  ;;  %v628_v26 = vmul.f32 1.442695, %v596_v18  ;;  %v760_v27 = vmul.f32 1.442695, %v728_v19  ;;  %v554_v28 = vsub.f32 %v3588_v16, %v3519_v39 }
  0x93   : > { %v351_v29 = vmul.f32 %v334_v21, %v334_v21  ;;  %v578_v30 = vmul.f32 %v561_v22, %v561_v22  ;;  %v710_v31 = vmul.f32 %v693_v23, %v693_v23  ;;  %v3606_v33 = vmul.f32 %v327_v24, %v327_v24 }
  0x94   : > { %2709 = vpow2.f32 %v486_v25  ;;  %v892_v34 = vmul.f32 1.442695, %v860_v20  ;;  %v3613_v49 = vmul.f32 %v554_v28, %v554_v28  ;;  %v686_v50 = vsub.f32 %v3588_v16, %v3522_v40 }
  0x95   : > { %2711 = vpow2.f32 %v628_v26  ;;  %v453_v46 = vmul.f32 %v3511_v36, %v351_v29  ;;  %v595_v47 = vmul.f32 %v578_v30, %v3511_v36  ;;  %v727_v48 = vmul.f32 %v710_v31, %v3511_v36 }
  0x96   : > { %2713 = vpow2.f32 %v760_v27  ;;  %v825_v51 = vsub.f32 %v3586_v15, %v3525_v41  ;;  %v3643_v29 = vmul.f32 %v686_v50, %v686_v50 }
  0x97   : > { %v3619_v52 = vpop.permute.xlu1 %421  ;;  %v484_v53 = vmul.f32 1.442695, %v453_v46  ;;  %v626_v54 = vmul.f32 1.442695, %v595_v47  ;;  %v758_v55 = vmul.f32 1.442695, %v727_v48  ;;  %2715 = vpow2.f32 %v892_v34 }
  0x98   : > { %4891 = vst [vmem:[#allocation11_spill] sm:$0xff] %v3619_v52  ;;  %v3621_v56 = vpop.permute.xlu0 %289  ;;  %v3623_v57 = vpop.permute.xlu2 %396  ;;  %v452_v58 = vmul.f32 %v3619_v52, %v350_v2  ;;  %v594_v60 = vmul.f32 %v577_v11, %v3619_v52  ;;  %v726_v5 = vmul.f32 %v709_v12, %v3619_v52  ;;  %v842_v6 = vmul.f32 %v825_v51, %v825_v51 }
  0x99   : > { %4892 = vst [vmem:[#allocation12_spill] sm:$0xff] %v3621_v56  ;;  %2717 = vpow2.f32 %v484_v53  ;;  %v331_v7 = vsub.f32 %v3621_v56, %v3516_v38  ;;  %v558_v8 = vsub.f32 %v3621_v56, %v3519_v39  ;;  %v690_v9 = vsub.f32 %v3621_v56, %v3522_v40 }
  0x9a   : > { %4893 = vst [vmem:[#allocation13_spill] sm:$0xff] %v3623_v57  ;;  %v2710_v14 = vpop.eup %2709  ;;  %2719 = vpow2.f32 %v626_v54  ;;  %v482_v17 = vmul.f32 1.442695, %v452_v58  ;;  %v624_v18 = vmul.f32 1.442695, %v594_v60  ;;  %v859_v22 = vmul.f32 %v842_v6, %v3511_v36 }
  0x9b   : > { %v756_v2 = vmul.f32 1.442695, %v726_v5  ;;  %v2712_v19 = vpop.eup %2711  ;;  %497 = vmatpush.msra.mxu0 %v2710_v14  ;;  %2721 = vpow2.f32 %v758_v55  ;;  %v348_v11 = vmul.f32 %v331_v7, %v331_v7  ;;  %v575_v12 = vmul.f32 %v558_v8, %v558_v8 }
  0x9c   : > { %v707_v20 = vmul.f32 %v690_v9, %v690_v9  ;;  %v2714_v21 = vpop.eup %2713  ;;  %632 = vmatpush.msra.mxu2 %v2712_v19  ;;  %2723 = vpow2.f32 %v482_v17  ;;  %v858_v23 = vmul.f32 %v841_v13, %v3619_v52  ;;  %v822_v24 = vsub.f32 %v3621_v56, %v3525_v41 }
  0x9d   : > { %v3638_v25 = vpop.eup %2715  ;;  %764 = vmatpush.msra.mxu1 %v2714_v21  ;;  %2725 = vpow2.f32 %v624_v18  ;;  %v450_v26 = vmul.f32 %v3533_v45, %v348_v11  ;;  %v592_v27 = vmul.f32 %v575_v12, %v3533_v45  ;;  %v890_v30 = vmul.f32 1.442695, %v859_v22 }
  0x9e   : > { %v724_v28 = vmul.f32 %v707_v20, %v3533_v45  ;;  %2727 = vpow2.f32 %v756_v2  ;;  %v888_v31 = vmul.f32 1.442695, %v858_v23  ;;  %v839_v51 = vmul.f32 %v822_v24, %v822_v24 }
  0x9f   : > { %v2718_v34 = vpop.eup %2717  ;;  %v3645_v13 = vpop.permute.xlu1 %279  ;;  %v478_v46 = vmul.f32 1.442695, %v450_v26  ;;  %v620_v47 = vmul.f32 1.442695, %v592_v27  ;;  %2729 = vpow2.f32 %v890_v30  ;;  %v3669_v18 = vmul.f32 %v3608_v43, %v3582_v10 }
  0xa0   : > { %v752_v48 = vmul.f32 1.442695, %v724_v28  ;;  %v2720_v53 = vpop.eup %2719  ;;  %v3647_v54 = vpop.permute.xlu0 %416  ;;  %498 = vmatpush.msra.mxu0 %v2718_v34  ;;  %v329_v58 = vsub.f32 %v3645_v13, %v3516_v38  ;;  %v556_v50 = vsub.f32 %v3645_v13, %v3519_v39  ;;  %v688_v60 = vsub.f32 %v3645_v13, %v3522_v40 }
  0xa1   : > { %4894 = vst [vmem:[#allocation14_spill] sm:$0xff] %v3647_v54  ;;  %v3649_v55 = vpop.permute.xlu2 %254  ;;  %v2722_v5 = vpop.eup %2721  ;;  %633 = vmatpush.msra.mxu2 %v2720_v53  ;;  %v451_v6 = vmul.f32 %v3647_v54, %v3561_v59  ;;  %v593_v7 = vmul.f32 %v3568_v62, %v3647_v54  ;;  %v725_v8 = vmul.f32 %v3570_v63, %v3647_v54  ;;  %2731 = vpow2.f32 %v478_v46 }
  0xa2   : > { %4895 = vst [vmem:[#allocation15_spill] sm:$0xff] %v3649_v55  ;;  %v2724_v9 = vpop.eup %2723  ;;  %765 = vmatpush.msra.mxu1 %v2722_v5  ;;  %2733 = vpow2.f32 %v620_v47  ;;  %v3663_v14 = vmul.f32 %v329_v58, %v329_v58  ;;  %v3665_v17 = vmul.f32 %v556_v50, %v556_v50  ;;  %v324_v63 = vsub.f32 %v3649_v55, %v3516_v38 }
  0xa3   : > { %v2726_v2 = vpop.eup %2725  ;;  %499 = vmatpush.msra.mxu0 %v2724_v9  ;;  %v480_v59 = vmul.f32 1.442695, %v451_v6  ;;  %v622_v19 = vmul.f32 1.442695, %v593_v7  ;;  %v754_v62 = vmul.f32 1.442695, %v725_v8  ;;  %2735 = vpow2.f32 %v752_v48 }
  0xa4   : > { %v2728_v11 = vpop.eup %2727  ;;  %634 = vmatpush.msra.mxu2 %v2726_v2  ;;  %v551_v12 = vsub.f32 %v3649_v55, %v3519_v39  ;;  %v683_v20 = vsub.f32 %v3649_v55, %v3522_v40  ;;  %2737 = vpow2.f32 %v888_v31  ;;  %v3677_v43 = vmul.f32 %v688_v60, %v688_v60 }
  0xa5   : > { %766 = vmatpush.msra.mxu1 %v2728_v11  ;;  %2739 = vpow2.f32 %v480_v59  ;;  %v857_v21 = vmul.f32 %v3574_v1, %v3647_v54  ;;  %v856_v22 = vmul.f32 %v839_v51, %v3533_v45  ;;  %v3682_v23 = vpop.eup %2729  ;;  %v3684_v24 = vmul.f32 %v324_v63, %v324_v63 }
  0xa6   : > { %2741 = vpow2.f32 %v622_v19  ;;  %v3686_v26 = vmul.f32 %v551_v12, %v551_v12  ;;  %v820_v27 = vsub.f32 %v3645_v13, %v3525_v41  ;;  %v3692_v31 = vmul.f32 %v683_v20, %v683_v20 }
  0xa7   : > { %v2732_v28 = vpop.eup %2731  ;;  %v3690_v30 = vpop.permute.xlu1 %406  ;;  %2743 = vpow2.f32 %v754_v62  ;;  %v886_v34 = vmul.f32 1.442695, %v857_v21  ;;  %v884_v1 = vmul.f32 1.442695, %v856_v22 }
  0xa8   : > { %v2734_v46 = vpop.eup %2733  ;;  %v3694_v47 = vpop.permute.xlu0 %274  ;;  %v449_v51 = vmul.f32 %v3690_v30, %v3572_v0  ;;  %v591_v53 = vmul.f32 %v3576_v3, %v3690_v30  ;;  %v723_v58 = vmul.f32 %v3578_v4, %v3690_v30  ;;  %v855_v50 = vmul.f32 %v3604_v32, %v3690_v30 }
  0xa9   : > { %4896 = vst [vmem:[#allocation16_spill] sm:$0xff] %v3694_v47  ;;  %v3696_v48 = vpop.permute.xlu2 %249  ;;  %v2736_v60 = vpop.eup %2735  ;;  %v328_v5 = vsub.f32 %v3694_v47, %v3516_v38  ;;  %v555_v6 = vsub.f32 %v3694_v47, %v3519_v39  ;;  %v687_v7 = vsub.f32 %v3694_v47, %v3522_v40  ;;  %v837_v11 = vmul.f32 %v820_v27, %v820_v27 }
  0xaa   : > { %v323_v0 = vsub.f32 %v3696_v48, %v3516_v38  ;;  %v3714_v3 = vpop.eup %2737  ;;  %v476_v8 = vmul.f32 1.442695, %v449_v51  ;;  %v618_v4 = vmul.f32 1.442695, %v591_v53  ;;  %v750_v9 = vmul.f32 1.442695, %v723_v58 }
  0xab   : > { %v550_v32 = vsub.f32 %v3696_v48, %v3519_v39  ;;  %v2740_v2 = vpop.eup %2739  ;;  %v345_v59 = vmul.f32 %v328_v5, %v328_v5  ;;  %v572_v19 = vmul.f32 %v555_v6, %v555_v6  ;;  %v704_v62 = vmul.f32 %v687_v7, %v687_v7 }
  0xac   : > { %v2742_v63 = vpop.eup %2741  ;;  %500 = vmatpush.msra.mxu0 %v2740_v2  ;;  %2745 = vpow2.f32 %v476_v8  ;;  %v3718_v12 = vmul.f32 %v323_v0, %v323_v0  ;;  %v682_v21 = vsub.f32 %v3696_v48, %v3522_v40  ;;  %v882_v5 = vmul.f32 1.442695, %v855_v50 }
  0xad   : > { %v3720_v20 = vmul.f32 %v550_v32, %v550_v32  ;;  %v2744_v22 = vpop.eup %2743  ;;  %635 = vmatpush.msra.mxu2 %v2742_v63  ;;  %2747 = vpow2.f32 %v618_v4  ;;  %v447_v51 = vmul.f32 %v3623_v57, %v345_v59  ;;  %v589_v53 = vmul.f32 %v572_v19, %v3623_v57 }
  0xae   : > { %v721_v58 = vmul.f32 %v704_v62, %v3623_v57  ;;  %767 = vmatpush.msra.mxu1 %v2744_v22  ;;  %501 = vmatpush.msra.mxu0 %v2732_v28  ;;  %2749 = vpow2.f32 %v750_v9  ;;  %v3727_v27 = vmul.f32 %v682_v21, %v682_v21  ;;  %v819_v6 = vsub.f32 %v3694_v47, %v3525_v41 }
  0xaf   : > { %636 = vmatpush.msra.mxu2 %v2734_v46  ;;  %v3731_v7 = vpop.permute.xlu1 %264  ;;  %v472_v0 = vmul.f32 1.442695, %v447_v51  ;;  %v614_v8 = vmul.f32 1.442695, %v589_v53  ;;  %2751 = vpow2.f32 %v886_v34  ;;  %v3742_v46 = vmul.f32 1.442695, %v3669_v18 }
  0xb0   : > { %4897 = vst [vmem:[#allocation17_spill] sm:$0xff] %v3731_v7  ;;  %v746_v4 = vmul.f32 1.442695, %v721_v58  ;;  %768 = vmatpush.msra.mxu1 %v2736_v60  ;;  %v3733_v32 = vpop.permute.xlu0 %401  ;;  %v326_v28 = vsub.f32 %v3731_v7, %v3516_v38  ;;  %v553_v50 = vsub.f32 %v3731_v7, %v3519_v39  ;;  %2753 = vpow2.f32 %v884_v1 }
  0xb1   : > { %4898 = vst [vmem:[#allocation18_spill] sm:$0xff] %v3733_v32  ;;  %v3735_v2 = vpop.permute.xlu2 %376  ;;  %v448_v9 = vmul.f32 %v3733_v32, %v3663_v14  ;;  %v590_v34 = vmul.f32 %v3665_v17, %v3733_v32  ;;  %v722_v60 = vmul.f32 %v3677_v43, %v3733_v32  ;;  %2755 = vpow2.f32 %v472_v0 }
  0xb2   : > { %v2746_v59 = vpop.eup %2745  ;;  %2757 = vpow2.f32 %v614_v8  ;;  %v3750_v19 = vmul.f32 %v326_v28, %v326_v28  ;;  %v3752_v62 = vmul.f32 %v553_v50, %v553_v50  ;;  %v685_v18 = vsub.f32 %v3731_v7, %v3522_v40 }
  0xb3   : > { %v2748_v1 = vpop.eup %2747  ;;  %502 = vmatpush.msra.mxu0 %v2746_v59  ;;  %v474_v63 = vmul.f32 1.442695, %v448_v9  ;;  %v616_v14 = vmul.f32 1.442695, %v590_v34  ;;  %v748_v21 = vmul.f32 1.442695, %v722_v60  ;;  %2759 = vpow2.f32 %v746_v4 }
  0xb4   : > { %v2750_v17 = vpop.eup %2749  ;;  %637 = vmatpush.msra.mxu2 %v2748_v1  ;;  %v443_v43 = vmul.f32 %v3735_v2, %v3684_v24  ;;  %v585_v22 = vmul.f32 %v3686_v26, %v3735_v2  ;;  %v717_v51 = vmul.f32 %v3692_v31, %v3735_v2  ;;  %2761 = vpow2.f32 %v882_v5 }
  0xb5   : > { %v3762_v53 = vpop.eup %2751  ;;  %769 = vmatpush.msra.mxu1 %v2750_v17  ;;  %2763 = vpow2.f32 %v474_v63  ;;  %v854_v58 = vmul.f32 %v837_v11, %v3733_v32  ;;  %v836_v0 = vmul.f32 %v819_v6, %v819_v6  ;;  %v818_v8 = vsub.f32 %v3588_v16, %v3525_v41 }
  0xb6   : > { %v3767_v4 = vpop.eup %2753  ;;  %2765 = vpow2.f32 %v616_v14  ;;  %v3769_v24 = vmul.f32 %v685_v18, %v685_v18  ;;  %v464_v26 = vmul.f32 1.442695, %v443_v43  ;;  %v606_v28 = vmul.f32 1.442695, %v585_v22 }
  0xb7   : > { %4899 = vst [vmem:[#allocation19_spill] sm:$0xff] %v3767_v4  ;;  %v2756_v50 = vpop.eup %2755  ;;  %v3771_v31 = vpop.permute.xlu1 %391  ;;  %2767 = vpow2.f32 %v748_v21  ;;  %v738_v5 = vmul.f32 1.442695, %v717_v51  ;;  %v3773_v9 = vmul.f32 1.442695, %v854_v58  ;;  %v853_v11 = vmul.f32 %v836_v0, %v3623_v57 }
  0xb8   : > { %4900 = vst [vmem:[#allocation20_spill] sm:$0xff] %v3771_v31  ;;  %v2758_v6 = vpop.eup %2757  ;;  %v3776_v34 = vpop.permute.xlu0 %259  ;;  %v446_v59 = vmul.f32 %v3771_v31, %v3606_v33  ;;  %v588_v18 = vmul.f32 %v3613_v49, %v3771_v31  ;;  %v720_v1 = vmul.f32 %v3643_v29, %v3771_v31  ;;  %v3786_v63 = vmul.f32 %v818_v8, %v818_v8 }
  0xb9   : > { %v3778_v60 = vpop.permute.xlu2 %371  ;;  %v2760_v14 = vpop.eup %2759  ;;  %v325_v21 = vsub.f32 %v3776_v34, %v3516_v38  ;;  %v552_v17 = vsub.f32 %v3776_v34, %v3519_v39  ;;  %v684_v43 = vsub.f32 %v3776_v34, %v3522_v40  ;;  %2769 = vpow2.f32 %v464_v26 }
  0xba   : > { %v3794_v33 = vpop.eup %2761  ;;  %v470_v22 = vmul.f32 1.442695, %v446_v59  ;;  %v612_v49 = vmul.f32 1.442695, %v588_v18  ;;  %v744_v51 = vmul.f32 1.442695, %v720_v1  ;;  %2771 = vpow2.f32 %v606_v28 }
  0xbb   : > { %4901 = vst [vmem:[#allocation21_spill] sm:$0xff] %v3794_v33  ;;  %v2764_v29 = vpop.eup %2763  ;;  %v3796_v58 = vmul.f32 %v325_v21, %v325_v21  ;;  %v3798_v0 = vmul.f32 %v552_v17, %v552_v17  ;;  %2773 = vpow2.f32 %v738_v5  ;;  %v442_v8 = vmul.f32 %v3778_v60, %v3718_v12  ;;  %v3811_v5 = vld [vmem:[%s4842_s3] sm:$0x3] }
  0xbc   : > { %v2766_v57 = vpop.eup %2765  ;;  %503 = vmatpush.msra.mxu0 %v2764_v29  ;;  %2775 = vpow2.f32 %v470_v22  ;;  %v3802_v16 = vmul.f32 %v684_v43, %v684_v43  ;;  %v584_v26 = vmul.f32 %v3720_v20, %v3778_v60  ;;  %v716_v28 = vmul.f32 %v3727_v27, %v3778_v60 }
  0xbd   : > { %v2768_v59 = vpop.eup %2767  ;;  %638 = vmatpush.msra.mxu2 %v2766_v57  ;;  %2777 = vpow2.f32 %v612_v49  ;;  %v462_v18 = vmul.f32 1.442695, %v442_v8  ;;  %v878_v12 = vmul.f32 1.442695, %v853_v11  ;;  %v957_v1 = vsub.f32 %v3586_v15, %v3566_v61 }
  0xbe   : > { %770 = vmatpush.msra.mxu1 %v2768_v59  ;;  %504 = vmatpush.msra.mxu0 %v2756_v50  ;;  %2779 = vpow2.f32 %v744_v51  ;;  %v604_v20 = vmul.f32 1.442695, %v584_v26  ;;  %v736_v21 = vmul.f32 1.442695, %v716_v28  ;;  %v3816_v27 = vperm.slane %v3811_v5, 1 }
  0xbf   : > { %v3818_v57 = vpop.eup %2769  ;;  %639 = vmatpush.msra.mxu2 %v2758_v6  ;;  %v3820_v17 = vpop.permute.xlu1 %314  ;;  %2781 = vpow2.f32 %v462_v18  ;;  %v974_v43 = vmul.f32 %v957_v1, %v957_v1  ;;  %v956_v11 = vsub.f32 %v3527_v42, %v3566_v61  ;;  %v955_v50 = vsub.f32 %v3509_v35, %v3566_v61  ;;  %v3845_v59 = vld [vmem:[%s3417_s13 + $0x5] ss:$0 sm:$0xff] }
  0xc0   : > { %4902 = vst [vmem:[#allocation22_spill] sm:$0xff] %v3820_v17  ;;  %v3826_v22 = vpop.eup %2771  ;;  %771 = vmatpush.msra.mxu1 %v2760_v14  ;;  %v3828_v49 = vpop.permute.xlu0 %386  ;;  %2783 = vpow2.f32 %v604_v20  ;;  %v563_v6 = vsub.f32 %v3820_v17, %v3519_v39  ;;  %v695_v51 = vsub.f32 %v3820_v17, %v3522_v40  ;;  %v336_v29 = vsub.f32 %v3820_v17, %v3516_v38 }
  0xc1   : > { %v3836_v8 = vpop.eup %2773  ;;  %v445_v26 = vmul.f32 %v3828_v49, %v3750_v19  ;;  %v587_v14 = vmul.f32 %v3752_v62, %v3828_v49  ;;  %v719_v28 = vmul.f32 %v3769_v24, %v3828_v49  ;;  %2785 = vpow2.f32 %v736_v21  ;;  %4903 = vst [vmem:[#allocation23_spill] sm:$0xff] %v3845_v59 }
  0xc2   : > { %v2776_v18 = vpop.eup %2775  ;;  %v3847_v1 = vmul.f32 %v563_v6, %v563_v6  ;;  %v3849_v20 = vmul.f32 %v695_v51, %v695_v51  ;;  %2787 = vpow2.f32 %v3773_v9  ;;  %v3852_v35 = vmul.f32 %v336_v29, %v336_v29 }
  0xc3   : > { %v2778_v47 = vpop.eup %2777  ;;  %505 = vmatpush.msra.mxu0 %v2776_v18  ;;  %v468_v19 = vmul.f32 1.442695, %v445_v26  ;;  %v610_v32 = vmul.f32 1.442695, %v587_v14  ;;  %v742_v62 = vmul.f32 1.442695, %v719_v28  ;;  %2789 = vpow2.f32 %v878_v12 }
  0xc4   : > { %v2780_v33 = vpop.eup %2779  ;;  %640 = vmatpush.msra.mxu2 %v2778_v47  ;;  %2791 = vpow2.f32 %v3742_v46  ;;  %v991_v24 = vmul.f32 %v974_v43, %v3511_v36  ;;  %v817_v21 = vsub.f32 %v3731_v7, %v3525_v41  ;;  %v973_v6 = vmul.f32 %v956_v11, %v956_v11  ;;  %v3897_v7 = vld [vmem:[%s3417_s13 + $0x7] ss:$0 sm:$0xff] }
  0xc5   : > { %v3858_v51 = vpop.eup %2781  ;;  %772 = vmatpush.msra.mxu1 %v2780_v33  ;;  %2793 = vpow2.f32 %v468_v19  ;;  %v972_v9 = vmul.f32 %v955_v50, %v955_v50  ;;  %v954_v29 = vsub.f32 %v3621_v56, %v3566_v61  ;;  %v1090_v12 = vsub.f32 %v3531_v44, %v3845_v59 }
  0xc6   : > { %v3864_v47 = vpop.eup %2783  ;;  %2795 = vpow2.f32 %v610_v32  ;;  %v1022_v46 = vmul.f32 1.442695, %v991_v24  ;;  %v3866_v43 = vmul.f32 %v817_v21, %v817_v21  ;;  %v990_v26 = vmul.f32 %v973_v6, %v3619_v52 }
  0xc7   : > { %v3869_v11 = vpop.eup %2785  ;;  %v3871_v14 = vpop.permute.xlu1 %244  ;;  %2797 = vpow2.f32 %v742_v62  ;;  %v989_v33 = vmul.f32 %v972_v9, %v3647_v54  ;;  %v815_v50 = vsub.f32 %v3649_v55, %v3525_v41  ;;  %v971_v28 = vmul.f32 %v954_v29, %v954_v29 }
  0xc8   : > { %v3876_v18 = vpop.eup %2787  ;;  %v3878_v32 = vpop.permute.xlu0 %381  ;;  %v322_v19 = vsub.f32 %v3871_v14, %v3516_v38  ;;  %v549_v24 = vsub.f32 %v3871_v14, %v3519_v39  ;;  %v681_v21 = vsub.f32 %v3871_v14, %v3522_v40  ;;  %v852_v62 = vmul.f32 %v3786_v63, %v3771_v31 }
  0xc9   : > { %4904 = vst [vmem:[#allocation24_spill] sm:$0xff] %v3876_v18  ;;  %v3888_v6 = vpop.eup %2789  ;;  %v444_v9 = vmul.f32 %v3878_v32, %v3796_v58  ;;  %v586_v29 = vmul.f32 %v3798_v0, %v3878_v32  ;;  %v718_v55 = vmul.f32 %v3802_v16, %v3878_v32  ;;  %2799 = vpow2.f32 %v1022_v46 }
  0xca   : > { %4905 = vst [vmem:[#allocation25_spill] sm:$0xff] %v3888_v6  ;;  %v3899_v56 = vpop.eup %2791  ;;  %v3901_v54 = vmul.f32 %v322_v19, %v322_v19  ;;  %v3903_v18 = vmul.f32 %v549_v24, %v549_v24  ;;  %v3905_v63 = vmul.f32 %v681_v21, %v681_v21  ;;  %v876_v31 = vmul.f32 1.442695, %v852_v62 }
  0xcb   : > { %4906 = vst [vmem:[#allocation26_spill] sm:$0xff] %v3899_v56  ;;  %v2794_v6 = vpop.eup %2793  ;;  %v466_v58 = vmul.f32 1.442695, %v444_v9  ;;  %v608_v52 = vmul.f32 1.442695, %v586_v29  ;;  %v3907_v0 = vmul.f32 %v815_v50, %v815_v50  ;;  %v988_v19 = vmul.f32 %v971_v28, %v3533_v45 }
  0xcc   : > { %v740_v4 = vmul.f32 1.442695, %v718_v55  ;;  %v2796_v42 = vpop.eup %2795  ;;  %506 = vmatpush.msra.mxu0 %v2794_v6  ;;  %2801 = vpow2.f32 %v876_v31  ;;  %v3909_v16 = vmul.f32 1.442695, %v990_v26  ;;  %v3911_v46 = vmul.f32 1.442695, %v989_v33 }
  0xcd   : > { %v2798_v24 = vpop.eup %2797  ;;  %641 = vmatpush.msra.mxu2 %v2796_v42  ;;  %2803 = vpow2.f32 %v466_v58  ;;  %v1107_v21 = vmul.f32 %v1090_v12, %v1090_v12  ;;  %v1354_v62 = vsub.f32 %v3531_v44, %v3897_v7  ;;  %v953_v55 = vsub.f32 %v3513_v37, %v3566_v61 }
  0xce   : > { %773 = vmatpush.msra.mxu1 %v2798_v24  ;;  %2805 = vpow2.f32 %v608_v52  ;;  %v3919_v31 = vperm.slane %v3811_v5, 0  ;;  %v3921_v26 = vmul.f32 1.442695, %v988_v19  ;;  %v3925_v33 = vsub.f32 %v3586_v15, %v3845_v59 }
  0xcf   : > { %v3927_v42 = vpop.eup %2799  ;;  %v3929_v12 = vpop.permute.xlu1 %239  ;;  %2807 = vpow2.f32 %v740_v4  ;;  %v3932_v50 = vmul.f32 %v1107_v21, %v3582_v10  ;;  %v3934_v28 = vmul.f32 %v1354_v62, %v1354_v62  ;;  %v3936_v52 = vmul.f32 %v953_v55, %v953_v55 }
  0xd0   : > { %4907 = vst [vmem:[#allocation27_spill] sm:$0xff] %v3919_v31  ;;  %v3938_v5 = vpop.permute.xlu0 %436  ;;  %v321_v6 = vsub.f32 %v3929_v12, %v3516_v38  ;;  %v548_v9 = vsub.f32 %v3929_v12, %v3519_v39  ;;  %v680_v29 = vsub.f32 %v3929_v12, %v3522_v40  ;;  %v1091_v4 = vsub.f32 %v3820_v17, %v3845_v59  ;;  %v3961_v31 = vpop.permute.xlu2 %361 }
  0xd1   : > { %4908 = vst [vmem:[#allocation28_spill] sm:$0xff] %v3921_v26  ;;  %v597_v58 = vmul.f32 %v3847_v1, %v3938_v5  ;;  %v729_v19 = vmul.f32 %v3849_v20, %v3938_v5  ;;  %v455_v24 = vmul.f32 %v3938_v5, %v3852_v35  ;;  %v827_v21 = vsub.f32 %v3820_v17, %v3525_v41 }
  0xd2   : > { %4909 = vst [vmem:[#allocation29_spill] sm:$0xff] %v3927_v42  ;;  %v3956_v62 = vpop.eup %2801  ;;  %v338_v55 = vmul.f32 %v321_v6, %v321_v6  ;;  %v565_v45 = vmul.f32 %v548_v9, %v548_v9  ;;  %v697_v37 = vmul.f32 %v680_v29, %v680_v29  ;;  %v1108_v44 = vmul.f32 %v1091_v4, %v1091_v4  ;;  %v3959_v42 = vld [vmem:[%s3417_s13 + $0x6] ss:$0 sm:$0xff] }
  0xd3   : > { %4910 = vst [vmem:[#allocation30_spill] sm:$0xff] %v3929_v12  ;;  %v2804_v56 = vpop.eup %2803  ;;  %v630_v1 = vmul.f32 1.442695, %v597_v58  ;;  %v762_v26 = vmul.f32 1.442695, %v729_v19  ;;  %v844_v12 = vmul.f32 %v827_v21, %v827_v21  ;;  %v1223_v58 = vsub.f32 %v3820_v17, %v3959_v42 }
  0xd4   : > { %4911 = vst [vmem:[#allocation31_spill] sm:$0xff] %v3938_v5  ;;  %v488_v20 = vmul.f32 1.442695, %v455_v24  ;;  %v2806_v35 = vpop.eup %2805  ;;  %507 = vmatpush.msra.mxu0 %v2804_v56  ;;  %v440_v59 = vmul.f32 %v3961_v31, %v338_v55  ;;  %v714_v6 = vmul.f32 %v697_v37, %v3961_v31  ;;  %v1125_v9 = vmul.f32 %v1108_v44, %v3938_v5 }
  0xd5   : > { %4912 = vst [vmem:[#allocation32_spill] sm:$0xff] %v3956_v62  ;;  %v582_v62 = vmul.f32 %v565_v45, %v3961_v31  ;;  %v2808_v29 = vpop.eup %2807  ;;  %642 = vmatpush.msra.mxu2 %v2806_v35  ;;  %2809 = vpow2.f32 %v630_v1  ;;  %v861_v4 = vmul.f32 %v844_v12, %v3938_v5  ;;  %v851_v19 = vmul.f32 %v3866_v43, %v3828_v49 }
  0xd6   : > { %774 = vmatpush.msra.mxu1 %v2808_v29  ;;  %508 = vmatpush.msra.mxu0 %v3818_v57  ;;  %2811 = vpow2.f32 %v762_v26  ;;  %v458_v45 = vmul.f32 1.442695, %v440_v59  ;;  %v732_v37 = vmul.f32 1.442695, %v714_v6  ;;  %v1158_v24 = vmul.f32 1.442695, %v1125_v9 }
  0xd7   : > { %v600_v56 = vmul.f32 1.442695, %v582_v62  ;;  %643 = vmatpush.msra.mxu2 %v3826_v22  ;;  %v3974_v44 = vpop.permute.xlu1 %366  ;;  %2813 = vpow2.f32 %v488_v20  ;;  %v894_v12 = vmul.f32 1.442695, %v861_v4  ;;  %v1240_v21 = vmul.f32 %v1223_v58, %v1223_v58 }
  0xd8   : > { %775 = vmatpush.msra.mxu1 %v3836_v8  ;;  %v3977_v55 = vpop.permute.xlu0 %234  ;;  %509 = vmatpush.msra.mxu0 %v3858_v51  ;;  %v441_v57 = vmul.f32 %v3974_v44, %v3901_v54  ;;  %v583_v59 = vmul.f32 %v3903_v18, %v3974_v44  ;;  %v715_v22 = vmul.f32 %v3905_v63, %v3974_v44  ;;  %2815 = vpow2.f32 %v458_v45 }
  0xd9   : > { %644 = vmatpush.msra.mxu2 %v3864_v47  ;;  %2817 = vpow2.f32 %v600_v56  ;;  %v320_v8 = vsub.f32 %v3977_v55, %v3516_v38  ;;  %v547_v43 = vsub.f32 %v3977_v55, %v3519_v39  ;;  %v679_v51 = vsub.f32 %v3977_v55, %v3522_v40 }
  0xda   : > { %776 = vmatpush.msra.mxu1 %v3869_v11  ;;  %v460_v54 = vmul.f32 1.442695, %v441_v57  ;;  %v602_v18 = vmul.f32 1.442695, %v583_v59  ;;  %v734_v26 = vmul.f32 1.442695, %v715_v22  ;;  %2819 = vpow2.f32 %v732_v37 }
  0xdb   : > { %v2810_v63 = vpop.eup %2809  ;;  %v337_v62 = vmul.f32 %v320_v8, %v320_v8  ;;  %v564_v1 = vmul.f32 %v547_v43, %v547_v43  ;;  %v696_v47 = vmul.f32 %v679_v51, %v679_v51  ;;  %2821 = vpow2.f32 %v1158_v24 }
  0xdc   : > { %v2812_v20 = vpop.eup %2811  ;;  %667 = vmatpush.msra.mxu3 %v2810_v63  ;;  %2823 = vpow2.f32 %v460_v54  ;;  %v1257_v38 = vmul.f32 %v1240_v21, %v3938_v5  ;;  %v874_v39 = vmul.f32 1.442695, %v851_v19  ;;  %v816_v40 = vsub.f32 %v3776_v34, %v3525_v41 }
  0xdd   : > { %v3997_v35 = vpop.eup %2813  ;;  %2825 = vpow2.f32 %v602_v18  ;;  %v849_v11 = vmul.f32 %v3907_v0, %v3735_v2  ;;  %v4002_v6 = vmul.f32 1.442695, %v3932_v50  ;;  %v1388_v9 = vmul.f32 %v3934_v28, %v3582_v10  ;;  %2602 = vmatmul.msk.f32.vlgmr.msra.gmra.mxu3 %vm494_vm0, %v3816_v27 }
  0xde   : > { %799 = vmatpush.msrb.mxu3 %v2812_v20  ;;  %v2816_v29 = vpop.eup %2815  ;;  %2827 = vpow2.f32 %v734_v26  ;;  %v1290_v4 = vmul.f32 1.442695, %v1257_v38  ;;  %v833_v58 = vmul.f32 %v816_v40, %v816_v40  ;;  %v814_v19 = vsub.f32 %v3696_v48, %v3525_v41  ;;  %v4914_v20 = vld [vmem:[#allocation7_spill] sm:$0xff] }
  0xdf   : > { %v2818_v45 = vpop.eup %2817  ;;  %2829 = vpow2.f32 %v894_v12  ;;  %v870_v0 = vmul.f32 1.442695, %v849_v11  ;;  %v4011_v50 = vmul.f32 1.442695, %v1388_v9  ;;  %v987_v28 = vmul.f32 %v3936_v52, %v3690_v30 }
  0xe0   : > { %896 = vmatpush.msra.mxu3 %v3638_v25  ;;  %v2820_v56 = vpop.eup %2819  ;;  %v4015_v37 = vpop.permute.xlu0 %356  ;;  %2831 = vpow2.f32 %v1290_v4  ;;  %v850_v24 = vmul.f32 %v833_v58, %v3878_v32  ;;  %v831_v21 = vmul.f32 %v814_v19, %v814_v19  ;;  %v1106_v41 = vmul.f32 %v3925_v33, %v3925_v33  ;;  %v4915_v4 = vld [vmem:[#allocation19_spill] sm:$0xff] }
  0xe1   : > { %v4020_v57 = vpop.eup %2821  ;;  %v439_v25 = vmul.f32 %v4015_v37, %v337_v62  ;;  %v581_v12 = vmul.f32 %v564_v1, %v4015_v37  ;;  %v713_v52 = vmul.f32 %v696_v47, %v4015_v37  ;;  %2833 = vpow2.f32 %v874_v39  ;;  %v4913_v47 = vld [vmem:[#allocation23_spill] sm:$0xff] }
  0xe2   : > { %897 = vmatpush.msra.mxu3 %v3682_v23  ;;  %v2824_v59 = vpop.eup %2823  ;;  %2835 = vpow2.f32 %v3909_v16  ;;  %v872_v22 = vmul.f32 1.442695, %v850_v24  ;;  %v848_v8 = vmul.f32 %v831_v21, %v3778_v60  ;;  %v4028_v43 = vmul.f32 1.442695, %v987_v28  ;;  %v4916_v24 = vld [vmem:[#allocation30_spill] sm:$0xff] }
  0xe3   : > { %v2826_v33 = vpop.eup %2825  ;;  %510 = vmatpush.msra.mxu0 %v2824_v59  ;;  %v456_v23 = vmul.f32 1.442695, %v439_v25  ;;  %v598_v51 = vmul.f32 1.442695, %v581_v12  ;;  %v730_v54 = vmul.f32 1.442695, %v713_v52  ;;  %2837 = vpow2.f32 %v3911_v46 }
  0xe4   : > { %898 = vmatpush.msra.mxu3 %v3714_v3  ;;  %v2828_v18 = vpop.eup %2827  ;;  %645 = vmatpush.msra.mxu2 %v2826_v33  ;;  %2839 = vpow2.f32 %v872_v22  ;;  %v868_v26 = vmul.f32 1.442695, %v848_v8  ;;  %v1123_v16 = vmul.f32 %v1106_v41, %v3511_v36  ;;  %v1353_v63 = vsub.f32 %v3586_v15, %v3897_v7  ;;  %v3253_v3 = vld [vmem:[%s3417_s13 + $0x3] ss:$0 sm:$0xff]  ;;  %v4918_v25 = vld [vmem:[#allocation28_spill] sm:$0xff]  ;;  %v4919_v52 = vld [vmem:[#allocation18_spill] sm:$0xff] }
  0xe5   : > { %v4035_v62 = vpop.eup %2829  ;;  %777 = vmatpush.msra.mxu1 %v2828_v18  ;;  %2841 = vpow2.f32 %v456_v23  ;;  %v813_v1 = vsub.f32 %v3871_v14, %v3253_v3  ;;  %v952_v46 = vsub.f32 %v3645_v13, %v3566_v61  ;;  %v1088_v38 = vsub.f32 %v4914_v20, %v4913_v47  ;;  %511 = vmatpush.msra.mxu0 %v2816_v29  ;;  %v4920_v22 = vld [vmem:[#allocation11_spill] sm:$0xff]  ;;  %v4921_v18 = vld [vmem:[#allocation24_spill] sm:$0xff] }
  0xe6   : > { %899 = vmatpush.msra.mxu3 %v3762_v53  ;;  %v4044_v39 = vpop.eup %2831  ;;  %646 = vmatpush.msra.mxu2 %v2818_v45  ;;  %2843 = vpow2.f32 %v598_v51  ;;  %v1154_v40 = vmul.f32 1.442695, %v1123_v16  ;;  %v1370_v11 = vmul.f32 %v1353_v63, %v1353_v63  ;;  %v1352_v53 = vsub.f32 %v4914_v20, %v3897_v7 }
  0xe7   : > { %v4048_v9 = vpop.eup %2833  ;;  %778 = vmatpush.msra.mxu1 %v2820_v56  ;;  %2845 = vpow2.f32 %v730_v54  ;;  %v830_v61 = vmul.f32 %v813_v1, %v813_v1  ;;  %v969_v58 = vmul.f32 %v952_v46, %v952_v46  ;;  %v1105_v19 = vmul.f32 %v1088_v38, %v1088_v38  ;;  %2605 = vmatmul.msk.f32.vlgmr.msrb.gmra.mxu3 %vm494_vm0, %v3816_v27  ;;  %v4917_v56 = vld [vmem:[#allocation21_spill] sm:$0xff] }
  0xe8   : > { %900 = vmatpush.msra.mxu3 %v4915_v4  ;;  %v4051_v28 = vpop.eup %2835  ;;  %2847 = vpow2.f32 %v870_v0  ;;  %v1387_v29 = vmul.f32 %v1370_v11, %v3511_v36  ;;  %v1369_v45 = vmul.f32 %v1352_v53, %v1352_v53  ;;  %v812_v21 = vsub.f32 %v4916_v24, %v3253_v3  ;;  %v4072_v53 = vld [vmem:[%s3417_s13 + $0x4] ss:$0 sm:$0xff] }
  0xe9   : > { %v4057_v41 = vpop.eup %2837  ;;  %2849 = vpow2.f32 %v4918_v25  ;;  %v847_v12 = vmul.f32 %v830_v61, %v3974_v44  ;;  %v986_v59 = vmul.f32 %v969_v58, %v4919_v52  ;;  %v1122_v0 = vmul.f32 %v1105_v19, %v4920_v22  ;;  %v4923_v58 = vld [vmem:[#allocation25_spill] sm:$0xff] }
  0xea   : > { %901 = vmatpush.msra.mxu3 %v4917_v56  ;;  %v4064_v8 = vpop.eup %2839  ;;  %2851 = vpow2.f32 %v4002_v6  ;;  %v1418_v33 = vmul.f32 1.442695, %v1387_v29  ;;  %v1386_v23 = vmul.f32 %v1369_v45, %v4920_v22  ;;  %v829_v51 = vmul.f32 %v812_v21, %v812_v21  ;;  %v4922_v6 = vld [vmem:[#allocation16_spill] sm:$0xff]  ;;  %v4925_v21 = vld [vmem:[#allocation27_spill] sm:$0xff] }
  0xeb   : > { %v2842_v54 = vpop.eup %2841  ;;  %2853 = vpow2.f32 %v4011_v50  ;;  %v866_v16 = vmul.f32 1.442695, %v847_v12  ;;  %v1012_v63 = vmul.f32 1.442695, %v986_v59  ;;  %v1152_v1 = vmul.f32 1.442695, %v1122_v0 }
  0xec   : > { %902 = vmatpush.msra.mxu3 %v4921_v18  ;;  %v2844_v46 = vpop.eup %2843  ;;  %512 = vmatpush.msra.mxu0 %v2842_v54  ;;  %2855 = vpow2.f32 %v868_v26  ;;  %v1416_v38 = vmul.f32 1.442695, %v1386_v23  ;;  %v846_v11 = vmul.f32 %v829_v51, %v3961_v31  ;;  %v951_v4 = vsub.f32 %v4922_v6, %v4072_v53  ;;  %v4924_v50 = vld [vmem:[#allocation5_spill] sm:$0xff]  ;;  %v4926_v12 = vld [vmem:[#allocation10_spill] sm:$0xff] }
  0xed   : > { %v2846_v61 = vpop.eup %2845  ;;  %647 = vmatpush.msra.mxu2 %v2844_v46  ;;  %2857 = vpow2.f32 %v4028_v43  ;;  %v1087_v19 = vsub.f32 %v4924_v50, %v4913_v47  ;;  %v1351_v26 = vsub.f32 %v4924_v50, %v3897_v7  ;;  %v811_v29 = vsub.f32 %v3977_v55, %v3253_v3  ;;  %513 = vmatmul.f32.vlgmr.msra.gmra.mxu0 %v4925_v21  ;;  %v4927_v54 = vld [vmem:[#allocation26_spill] sm:$0xff] }
  0xee   : > { %903 = vmatpush.msra.mxu3 %v4923_v58  ;;  %v2848_v45 = vpop.eup %2847  ;;  %779 = vmatpush.msra.mxu1 %v2846_v61  ;;  %2859 = vpow2.f32 %v1154_v40  ;;  %v864_v56 = vmul.f32 1.442695, %v846_v11  ;;  %v968_v25 = vmul.f32 %v951_v4, %v951_v4  ;;  %v950_v59 = vsub.f32 %v4926_v12, %v4072_v53  ;;  %v4928_v40 = vld [vmem:[#allocation13_spill] sm:$0xff] }
  0xef   : > { %v4086_v0 = vpop.eup %2849  ;;  %532 = vmatpush.msrb.mxu0 %v3997_v35  ;;  %648 = vmatmul.f32.vlgmr.msra.gmra.mxu2 %v4925_v21  ;;  %2861 = vpow2.f32 %v1418_v33  ;;  %v1104_v43 = vmul.f32 %v1087_v19, %v1087_v19  ;;  %v1368_v23 = vmul.f32 %v1351_v26, %v1351_v26  ;;  %v828_v3 = vmul.f32 %v811_v29, %v811_v29  ;;  %v4929_v35 = vld [vmem:[#allocation32_spill] sm:$0xff]  ;;  %v4930_v33 = vld [vmem:[#allocation14_spill] sm:$0xff] }
  0xf0   : > { %v2852_v51 = vpop.eup %2851  ;;  %780 = vmatmul.f32.vlgmr.msra.gmra.mxu1 %v4925_v21  ;;  %1028 = vmatpush.msrb.mxu2 %v4927_v54  ;;  %2863 = vpow2.f32 %v866_v16  ;;  %v985_v18 = vmul.f32 %v968_v25, %v4928_v40  ;;  %v967_v46 = vmul.f32 %v950_v59, %v950_v59  ;;  %v959_v11 = vsub.f32 %v3820_v17, %v4072_v53  ;;  %v4931_v29 = vld [vmem:[#allocation20_spill] sm:$0xff]  ;;  %v4932_v54 = vld [vmem:[#allocation29_spill] sm:$0xff] }
  0xf1   : > { %v2854_v4 = vpop.eup %2853  ;;  %1195 = vmatpush.msrb.mxu1 %v4020_v57  ;;  %904 = vmatpush.msra.mxu3 %v4929_v35  ;;  %2865 = vpow2.f32 %v1012_v63  ;;  %v1121_v61 = vmul.f32 %v1104_v43, %v4930_v33  ;;  %v1385_v58 = vmul.f32 %v1368_v23, %v4930_v33  ;;  %v845_v19 = vmul.f32 %v828_v3, %v4015_v37 }
  0xf2   : > { %v2856_v26 = vpop.eup %2855  ;;  %931 = vmatpush.msra.mxu0 %v4035_v62  ;;  %2867 = vpow2.f32 %v1152_v1  ;;  %v1010_v16 = vmul.f32 1.442695, %v985_v18  ;;  %v984_v25 = vmul.f32 %v967_v46, %v4931_v29  ;;  %v976_v59 = vmul.f32 %v959_v11, %v959_v11  ;;  %1029 = vmatpush.msrb.mxu2 %v4932_v54 }
  0xf3   : > { %1327 = vmatpush.msra.mxu1 %v4044_v39  ;;  %v2858_v57 = vpop.eup %2857  ;;  %905 = vmatpush.msra.mxu3 %v4048_v9  ;;  %2869 = vpow2.f32 %v1416_v38  ;;  %v1150_v63 = vmul.f32 1.442695, %v1121_v61  ;;  %v1414_v43 = vmul.f32 1.442695, %v1385_v58  ;;  %v862_v23 = vmul.f32 1.442695, %v845_v19 }
  0xf4   : > { %v2860_v3 = vpop.eup %2859  ;;  %2871 = vpow2.f32 %v864_v56  ;;  %v1008_v35 = vmul.f32 1.442695, %v984_v25  ;;  %v993_v62 = vmul.f32 %v976_v59, %v3938_v5  ;;  %v4933_v39 = vld [vmem:[#allocation12_spill] sm:$0xff]  ;;  %1030 = vmatpush.msrb.mxu2 %v4051_v28  ;;  %v4935_v56 = vld [vmem:[#allocation17_spill] sm:$0xff]  ;;  %v4936_v28 = vld [vmem:[#allocation6_spill] sm:$0xff] }
  0xf5   : > { %v1086_v1 = vsub.f32 %v4933_v39, %v4913_v47  ;;  %v2862_v18 = vpop.eup %2861  ;;  %906 = vmatpush.msra.mxu3 %v4064_v8  ;;  %2873 = vpow2.f32 %v1010_v16  ;;  %v1350_v9 = vsub.f32 %v4933_v39, %v3897_v7  ;;  %v4934_v38 = vld [vmem:[#allocation8_spill] sm:$0xff]  ;;  %v949_v11 = vsub.f32 %v4935_v56, %v4072_v53  ;;  %2600 = vmatmul.msk.f32.vlgmr.msrb.gmra.mxu0 %vm494_vm0, %v3816_v27 }
  0xf6   : > { %v1222_v46 = vsub.f32 %v4934_v38, %v3959_v42  ;;  %v2864_v61 = vpop.eup %2863  ;;  %2875 = vpow2.f32 %v1150_v63  ;;  %v1026_v58 = vmul.f32 1.442695, %v993_v62  ;;  %v1085_v8 = vsub.f32 %v4936_v28, %v4913_v47  ;;  %1031 = vmatpush.msrb.mxu2 %v4057_v41  ;;  %1160 = vmatpush.msrb.mxu0 %v2852_v51  ;;  %v4937_v63 = vld [vmem:[#allocation9_spill] sm:$0xff] }
  0xf7   : > { %v1103_v19 = vmul.f32 %v1086_v1, %v1086_v1  ;;  %v2866_v16 = vpop.eup %2865  ;;  %907 = vmatpush.msra.mxu3 %v2848_v45  ;;  %2877 = vpow2.f32 %v1414_v43  ;;  %v1367_v25 = vmul.f32 %v1350_v9, %v1350_v9  ;;  %v966_v54 = vmul.f32 %v949_v11, %v949_v11 }
  0xf8   : > { %v1239_v59 = vmul.f32 %v1222_v46, %v1222_v46  ;;  %v2868_v38 = vpop.eup %2867  ;;  %2614 = vmatmul.msk.f32.vlgmr.msrb.gmra.mxu1 %vm494_vm0, %v3816_v27  ;;  %2879 = vpow2.f32 %v862_v23  ;;  %v1102_v1 = vmul.f32 %v1085_v8, %v1085_v8  ;;  %v1349_v5 = vsub.f32 %v4936_v28, %v3897_v7  ;;  %1032 = vmatpush.msrb.mxu2 %v4086_v0 }
  0xf9   : > { %v1120_v62 = vmul.f32 %v1103_v19, %v4937_v63  ;;  %v2870_v17 = vpop.eup %2869  ;;  %1424 = vmatpush.msrb.mxu1 %v2854_v4  ;;  %2881 = vpow2.f32 %v1008_v35  ;;  %v1384_v41 = vmul.f32 %v1367_v25, %v4937_v63  ;;  %v983_v51 = vmul.f32 %v966_v54, %v3828_v49  ;;  %908 = vmatpush.msra.mxu3 %v2856_v26 }
  0xfa   : > { %v1256_v45 = vmul.f32 %v1239_v59, %v3582_v10  ;;  %v2872_v43 = vpop.eup %2871  ;;  %1161 = vmatpush.msrb.mxu0 %v2860_v3  ;;  %2883 = vpow2.f32 %v1026_v58  ;;  %v1119_v9 = vmul.f32 %v1102_v1, %v3690_v30  ;;  %v1366_v46 = vmul.f32 %v1349_v5, %v1349_v5  ;;  %1033 = vmatpush.msrb.mxu2 %v2858_v57 }
  0xfb   : > { %v1148_v23 = vmul.f32 1.442695, %v1120_v62  ;;  %v2874_v11 = vpop.eup %2873  ;;  %1425 = vmatpush.msrb.mxu1 %v2862_v18  ;;  %v1412_v0 = vmul.f32 1.442695, %v1384_v41  ;;  %v1006_v35 = vmul.f32 1.442695, %v983_v51  ;;  %v1221_v19 = vsub.f32 %v3586_v15, %v3959_v42  ;;  %909 = vmatpush.msra.mxu3 %v2864_v61 }
  0xfc   : > { %v1288_v4 = vmul.f32 1.442695, %v1256_v45  ;;  %v2876_v8 = vpop.eup %2875  ;;  %1162 = vmatpush.msrb.mxu0 %v2868_v38  ;;  %v1146_v26 = vmul.f32 1.442695, %v1119_v9  ;;  %v1383_v3 = vmul.f32 %v1366_v46, %v3690_v30  ;;  %v948_v58 = vsub.f32 %v3776_v34, %v4072_v53  ;;  %1034 = vmatpush.msrb.mxu2 %v2866_v16 }
  0xfd   : > { %2885 = vpow2.f32 %v1148_v23  ;;  %v2878_v5 = vpop.eup %2877  ;;  %1426 = vmatpush.msrb.mxu1 %v2870_v17  ;;  %v1238_v57 = vmul.f32 %v1221_v19, %v1221_v19  ;;  %v1084_v18 = vsub.f32 %v3645_v13, %v4913_v47  ;;  %v1348_v25 = vsub.f32 %v3645_v13, %v3897_v7  ;;  %910 = vmatpush.msra.mxu3 %v2872_v43  ;;  %v4938_v43 = vld [vmem:[#allocation15_spill] sm:$0xff] }
  0xfe   : > { %2887 = vpow2.f32 %v1412_v0  ;;  %v2880_v61 = vpop.eup %2879  ;;  %1163 = vmatpush.msrb.mxu0 %v2876_v8  ;;  %v1410_v38 = vmul.f32 1.442695, %v1383_v3  ;;  %v965_v59 = vmul.f32 %v948_v58, %v948_v58  ;;  %v1220_v54 = vsub.f32 %v4914_v20, %v3959_v42  ;;  %1035 = vmatpush.msrb.mxu2 %v2874_v11 }
  0xff   : > { %2889 = vpow2.f32 %v1288_v4  ;;  %v2882_v62 = vpop.eup %2881  ;;  %1427 = vmatpush.msrb.mxu1 %v2878_v5  ;;  %v1255_v17 = vmul.f32 %v1238_v57, %v3511_v36  ;;  %v1101_v16 = vmul.f32 %v1084_v18, %v1084_v18  ;;  %v1365_v1 = vmul.f32 %v1348_v25, %v1348_v25  ;;  %911 = vmatpush.msra.mxu3 %v2880_v61 }
 0x100   : > { %2891 = vpow2.f32 %v1006_v35  ;;  %v2884_v41 = vpop.eup %2883  ;;  %v982_v45 = vmul.f32 %v965_v59, %v3878_v32  ;;  %v1237_v51 = vmul.f32 %v1220_v54, %v1220_v54  ;;  %v947_v23 = vsub.f32 %v4938_v43, %v4072_v53  ;;  %2608 = vmatmul.msk.f32.vlgmr.msra.gmra.mxu0 %vm494_vm0, %v3816_v27  ;;  %1036 = vmatpush.msrb.mxu2 %v2882_v62 }
 0x101   : > { %2893 = vpow2.f32 %v1146_v26  ;;  %1063 = vmatpush.msrb.mxu3 %v2884_v41  ;;  %v1286_v9 = vmul.f32 1.442695, %v1255_v17  ;;  %v1118_v46 = vmul.f32 %v1101_v16, %v4919_v52  ;;  %v1382_v11 = vmul.f32 %v1365_v1, %v4919_v52  ;;  %2617 = vmatmul.msk.f32.vlgmr.msra.gmra.mxu1 %vm494_vm0, %v3816_v27 }
 0x102   : > { %2895 = vpow2.f32 %v1410_v38  ;;  %912 = vmatmul.f32.vlgmr.msra.gmra.mxu3 %v4925_v21  ;;  %v1004_v4 = vmul.f32 1.442695, %v982_v45  ;;  %v1254_v35 = vmul.f32 %v1237_v51, %v4920_v22  ;;  %v964_v19 = vmul.f32 %v947_v23, %v947_v23 }
 0x103   : > { %v2886_v0 = vpop.eup %2885  ;;  %v1083_v8 = vsub.f32 %v4922_v6, %v4913_v47  ;;  %2897 = vpow2.f32 %v1286_v9  ;;  %v1144_v3 = vmul.f32 1.442695, %v1118_v46  ;;  %v1408_v58 = vmul.f32 1.442695, %v1382_v11 }
 0x104   : > { %v2888_v26 = vpop.eup %2887  ;;  %1164 = vmatpush.msrb.mxu0 %v2886_v0  ;;  %v1347_v5 = vsub.f32 %v4922_v6, %v3897_v7  ;;  %2899 = vpow2.f32 %v1004_v4  ;;  %v1284_v18 = vmul.f32 1.442695, %v1254_v35  ;;  %v981_v25 = vmul.f32 %v964_v19, %v3735_v2 }
 0x105   : > { %v2890_v57 = vpop.eup %2889  ;;  %1428 = vmatpush.msrb.mxu1 %v2888_v26  ;;  %v1100_v61 = vmul.f32 %v1083_v8, %v1083_v8  ;;  %2901 = vpow2.f32 %v1144_v3  ;;  %v1219_v54 = vsub.f32 %v4924_v50, %v3959_v42  ;;  %v946_v62 = vsub.f32 %v3696_v48, %v4072_v53 }
 0x106   : > { %v2892_v38 = vpop.eup %2891  ;;  %1292 = vmatpush.msra.mxu3 %v2890_v57  ;;  %v1364_v59 = vmul.f32 %v1347_v5, %v1347_v5  ;;  %2903 = vpow2.f32 %v1408_v58  ;;  %v1002_v16 = vmul.f32 1.442695, %v981_v25  ;;  %v1082_v41 = vsub.f32 %v4926_v12, %v4913_v47 }
 0x107   : > { %v2894_v17 = vpop.eup %2893  ;;  %1037 = vmatpush.msrb.mxu2 %v2892_v38  ;;  %v1117_v1 = vmul.f32 %v1100_v61, %v4928_v40  ;;  %2905 = vpow2.f32 %v1284_v18  ;;  %v1236_v23 = vmul.f32 %v1219_v54, %v1219_v54  ;;  %v963_v9 = vmul.f32 %v946_v62, %v946_v62 }
 0x108   : > { %v2896_v45 = vpop.eup %2895  ;;  %1165 = vmatpush.msrb.mxu0 %v2894_v17  ;;  %v1381_v51 = vmul.f32 %v1364_v59, %v4928_v40  ;;  %2907 = vpow2.f32 %v1002_v16  ;;  %v1099_v11 = vmul.f32 %v1082_v41, %v1082_v41  ;;  %v1346_v0 = vsub.f32 %v4926_v12, %v3897_v7 }
 0x109   : > { %1429 = vmatpush.msrb.mxu1 %v2896_v45  ;;  %v1142_v46 = vmul.f32 1.442695, %v1117_v1  ;;  %v2898_v4 = vpop.eup %2897  ;;  %v1253_v19 = vmul.f32 %v1236_v23, %v4930_v33  ;;  %v980_v8 = vmul.f32 %v963_v9, %v3778_v60  ;;  %v1218_v26 = vsub.f32 %v4933_v39, %v3959_v42 }
 0x10a   : > { %v1406_v35 = vmul.f32 1.442695, %v1381_v51  ;;  %v2900_v3 = vpop.eup %2899  ;;  %1293 = vmatpush.msra.mxu3 %v2898_v4  ;;  %v1116_v58 = vmul.f32 %v1099_v11, %v4931_v29  ;;  %v1363_v5 = vmul.f32 %v1346_v0, %v1346_v0  ;;  %v945_v57 = vsub.f32 %v3871_v14, %v4072_v53 }
 0x10b   : > { %2909 = vpow2.f32 %v1142_v46  ;;  %v2902_v18 = vpop.eup %2901  ;;  %1038 = vmatpush.msrb.mxu2 %v2900_v3  ;;  %v1282_v25 = vmul.f32 1.442695, %v1253_v19  ;;  %v1000_v61 = vmul.f32 1.442695, %v980_v8  ;;  %v1235_v38 = vmul.f32 %v1218_v26, %v1218_v26  ;;  %2611 = vmatmul.msk.f32.vlgmr.msrb.gmra.mxu3 %vm494_vm0, %v3816_v27 }
 0x10c   : > { %2911 = vpow2.f32 %v1406_v35  ;;  %v2904_v59 = vpop.eup %2903  ;;  %1166 = vmatpush.msrb.mxu0 %v2902_v18  ;;  %v1140_v54 = vmul.f32 1.442695, %v1116_v58  ;;  %v1380_v62 = vmul.f32 %v1363_v5, %v4931_v29  ;;  %v962_v17 = vmul.f32 %v945_v57, %v945_v57 }
 0x10d   : > { %v1081_v16 = vsub.f32 %v4935_v56, %v4913_v47  ;;  %v2906_v1 = vpop.eup %2905  ;;  %1430 = vmatpush.msrb.mxu1 %v2904_v59  ;;  %2913 = vpow2.f32 %v1282_v25  ;;  %v1252_v41 = vmul.f32 %v1235_v38, %v4937_v63  ;;  %v1345_v45 = vsub.f32 %v4935_v56, %v3897_v7 }
 0x10e   : > { %v1217_v51 = vsub.f32 %v4936_v28, %v3959_v42  ;;  %v2908_v23 = vpop.eup %2907  ;;  %1294 = vmatpush.msra.mxu3 %v2906_v1  ;;  %2915 = vpow2.f32 %v1000_v61  ;;  %v1404_v9 = vmul.f32 1.442695, %v1380_v62  ;;  %v979_v46 = vmul.f32 %v962_v17, %v3974_v44 }
 0x10f   : > { %v1098_v11 = vmul.f32 %v1081_v16, %v1081_v16  ;;  %1039 = vmatpush.msrb.mxu2 %v2908_v23  ;;  %2917 = vpow2.f32 %v1140_v54  ;;  %v1280_v0 = vmul.f32 1.442695, %v1252_v41  ;;  %v1362_v4 = vmul.f32 %v1345_v45, %v1345_v45 }
 0x110   : > { %v1234_v35 = vmul.f32 %v1217_v51, %v1217_v51  ;;  %2919 = vpow2.f32 %v1404_v9  ;;  %v998_v8 = vmul.f32 1.442695, %v979_v46  ;;  %v944_v3 = vsub.f32 %v4916_v24, %v4072_v53 }
 0x111   : > { %v2910_v19 = vpop.eup %2909  ;;  %v1115_v26 = vmul.f32 %v1098_v11, %v3828_v49  ;;  %2921 = vpow2.f32 %v1280_v0  ;;  %v1379_v5 = vmul.f32 %v1362_v4, %v3828_v49  ;;  %v1080_v18 = vsub.f32 %v3776_v34, %v4913_v47 }
 0x112   : > { %v2912_v58 = vpop.eup %2911  ;;  %1167 = vmatpush.msrb.mxu0 %v2910_v19  ;;  %v1251_v57 = vmul.f32 %v1234_v35, %v3690_v30  ;;  %2923 = vpow2.f32 %v998_v8  ;;  %v961_v61 = vmul.f32 %v944_v3, %v944_v3  ;;  %v1344_v38 = vsub.f32 %v3776_v34, %v3897_v7 }
 0x113   : > { %1431 = vmatpush.msrb.mxu1 %v2912_v58  ;;  %v1138_v25 = vmul.f32 1.442695, %v1115_v26  ;;  %v2914_v59 = vpop.eup %2913  ;;  %v1402_v54 = vmul.f32 1.442695, %v1379_v5  ;;  %v1097_v17 = vmul.f32 %v1080_v18, %v1080_v18  ;;  %v1216_v16 = vsub.f32 %v3645_v13, %v3959_v42 }
 0x114   : > { %v1278_v62 = vmul.f32 1.442695, %v1251_v57  ;;  %v2916_v1 = vpop.eup %2915  ;;  %1295 = vmatpush.msra.mxu3 %v2914_v59  ;;  %v978_v41 = vmul.f32 %v961_v61, %v3961_v31  ;;  %v1361_v45 = vmul.f32 %v1344_v38, %v1344_v38  ;;  %v943_v51 = vsub.f32 %v3977_v55, %v4072_v53 }
 0x115   : > { %2925 = vpow2.f32 %v1138_v25  ;;  %v2918_v23 = vpop.eup %2917  ;;  %1040 = vmatpush.msrb.mxu2 %v2916_v1  ;;  %v1114_v9 = vmul.f32 %v1097_v17, %v3878_v32  ;;  %v1233_v46 = vmul.f32 %v1216_v16, %v1216_v16  ;;  %v1079_v11 = vsub.f32 %v4938_v43, %v4913_v47  ;;  %v4939_v17 = vld [vmem:[#allocation22_spill] sm:$0xff] }
 0x116   : > { %2927 = vpow2.f32 %v1402_v54  ;;  %v2920_v0 = vpop.eup %2919  ;;  %1168 = vmatpush.msrb.mxu0 %v2918_v23  ;;  %v996_v4 = vmul.f32 1.442695, %v978_v41  ;;  %v1378_v35 = vmul.f32 %v1361_v45, %v3878_v32  ;;  %v960_v19 = vmul.f32 %v943_v51, %v943_v51  ;;  %v4216_v51 = vld [vmem:[%s3417_s13 + $0x5] ss:$0 sm:$0xff] }
 0x117   : > { %2929 = vpow2.f32 %v1278_v62  ;;  %v2922_v8 = vpop.eup %2921  ;;  %1432 = vmatpush.msrb.mxu1 %v2920_v0  ;;  %v1136_v26 = vmul.f32 1.442695, %v1114_v9  ;;  %v1250_v53 = vmul.f32 %v1233_v46, %v4919_v52  ;;  %v1096_v3 = vmul.f32 %v1079_v11, %v1079_v11  ;;  %v4221_v9 = vld [vmem:[%s3417_s13 + $0x8] ss:$0 sm:$0xff] }
 0x118   : > { %v1343_v58 = vsub.f32 %v4938_v43, %v3897_v7  ;;  %v2924_v5 = vpop.eup %2923  ;;  %1296 = vmatpush.msra.mxu3 %v2922_v8  ;;  %2931 = vpow2.f32 %v996_v4  ;;  %v1400_v47 = vmul.f32 1.442695, %v1378_v35  ;;  %v977_v57 = vmul.f32 %v960_v19, %v4015_v37 }
 0x119   : > { %v1215_v18 = vsub.f32 %v4922_v6, %v3959_v42  ;;  %1041 = vmatpush.msrb.mxu2 %v2924_v5  ;;  %2933 = vpow2.f32 %v1136_v26  ;;  %v1276_v25 = vmul.f32 1.442695, %v1250_v53  ;;  %v1113_v61 = vmul.f32 %v1096_v3, %v3735_v2  ;;  %v4940_v3 = vld [vmem:[#allocation31_spill] sm:$0xff] }
 0x11a   : > { %v1360_v38 = vmul.f32 %v1343_v58, %v1343_v58  ;;  %2935 = vpow2.f32 %v1400_v47  ;;  %v994_v54 = vmul.f32 1.442695, %v977_v57  ;;  %v1355_v16 = vsub.f32 %v4939_v17, %v3897_v7 }
 0x11b   : > { %v2926_v59 = vpop.eup %2925  ;;  %v1232_v62 = vmul.f32 %v1215_v18, %v1215_v18  ;;  %2937 = vpow2.f32 %v1276_v25  ;;  %v1134_v41 = vmul.f32 1.442695, %v1113_v61  ;;  %v1078_v23 = vsub.f32 %v3696_v48, %v4216_v51 }
 0x11c   : > { %v2928_v1 = vpop.eup %2927  ;;  %1169 = vmatpush.msrb.mxu0 %v2926_v59  ;;  %v1377_v45 = vmul.f32 %v1360_v38, %v3735_v2  ;;  %2939 = vpow2.f32 %v994_v54  ;;  %v1372_v0 = vmul.f32 %v1355_v16, %v1355_v16  ;;  %v1342_v4 = vsub.f32 %v3696_v48, %v3897_v7 }
 0x11d   : > { %v2930_v46 = vpop.eup %2929  ;;  %1433 = vmatpush.msrb.mxu1 %v2928_v1  ;;  %v1249_v11 = vmul.f32 %v1232_v62, %v4928_v40  ;;  %2941 = vpow2.f32 %v1134_v41  ;;  %v1095_v19 = vmul.f32 %v1078_v23, %v1078_v23  ;;  %v1487_v8 = vsub.f32 %v4939_v17, %v4221_v9 }
 0x11e   : > { %1297 = vmatpush.msra.mxu3 %v2930_v46  ;;  %v1398_v35 = vmul.f32 1.442695, %v1377_v45  ;;  %v2932_v26 = vpop.eup %2931  ;;  %v1389_v58 = vmul.f32 %v1372_v0, %v4940_v3  ;;  %v1359_v5 = vmul.f32 %v1342_v4, %v1342_v4  ;;  %v1214_v47 = vsub.f32 %v4926_v12, %v3959_v42  ;;  %v3256_v45 = vld [vmem:[%s3417_s13 + $0x7] ss:$0 sm:$0xff] }
 0x11f   : > { %v1274_v53 = vmul.f32 1.442695, %v1249_v11  ;;  %v2934_v57 = vpop.eup %2933  ;;  %1042 = vmatpush.msrb.mxu2 %v2932_v26  ;;  %v1112_v7 = vmul.f32 %v1095_v19, %v3778_v60  ;;  %v1504_v18 = vmul.f32 %v1487_v8, %v1487_v8  ;;  %v1077_v25 = vsub.f32 %v3871_v14, %v4216_v51 }
 0x120   : > { %2943 = vpow2.f32 %v1398_v35  ;;  %v2936_v61 = vpop.eup %2935  ;;  %1170 = vmatpush.msrb.mxu0 %v2934_v57  ;;  %v1422_v38 = vmul.f32 1.442695, %v1389_v58  ;;  %v1376_v59 = vmul.f32 %v1359_v5, %v3778_v60  ;;  %v1231_v54 = vmul.f32 %v1214_v47, %v1214_v47 }
 0x121   : > { %2945 = vpow2.f32 %v1274_v53  ;;  %v2938_v62 = vpop.eup %2937  ;;  %1434 = vmatpush.msrb.mxu1 %v2936_v61  ;;  %v1132_v16 = vmul.f32 1.442695, %v1112_v7  ;;  %v1521_v1 = vmul.f32 %v1504_v18, %v4940_v3  ;;  %v1094_v41 = vmul.f32 %v1077_v25, %v1077_v25 }
 0x122   : > { %v1341_v23 = vsub.f32 %v3871_v14, %v3256_v45  ;;  %v2940_v46 = vpop.eup %2939  ;;  %1298 = vmatpush.msra.mxu3 %v2938_v62  ;;  %2947 = vpow2.f32 %v1422_v38  ;;  %v1396_v11 = vmul.f32 1.442695, %v1376_v59  ;;  %v1248_v0 = vmul.f32 %v1231_v54, %v4931_v29  ;;  %v4249_v38 = vld [vmem:[%s3417_s13 + $0x6] ss:$0 sm:$0xff] }
 0x123   : > { %v1213_v4 = vsub.f32 %v4935_v56, %v3959_v42  ;;  %v2942_v35 = vpop.eup %2941  ;;  %1043 = vmatpush.msrb.mxu2 %v2940_v46  ;;  %2949 = vpow2.f32 %v1132_v16  ;;  %v1554_v19 = vmul.f32 1.442695, %v1521_v1  ;;  %v1111_v8 = vmul.f32 %v1094_v41, %v3974_v44 }
 0x124   : > { %v1358_v26 = vmul.f32 %v1341_v23, %v1341_v23  ;;  %1171 = vmatpush.msrb.mxu0 %v2942_v35  ;;  %1044 = vmatmul.f32.vlgmr.msrb.gmra.mxu2 %v4925_v21  ;;  %2951 = vpow2.f32 %v1396_v11  ;;  %v1272_v53 = vmul.f32 1.442695, %v1248_v0  ;;  %v1076_v5 = vsub.f32 %v4916_v24, %v4216_v51 }
 0x125   : > { %v1230_v58 = vmul.f32 %v1213_v4, %v1213_v4  ;;  %2953 = vpow2.f32 %v1554_v19  ;;  %v1130_v42 = vmul.f32 1.442695, %v1111_v8  ;;  %v1340_v7 = vsub.f32 %v4916_v24, %v3256_v45 }
 0x126   : > { %v2944_v47 = vpop.eup %2943  ;;  %v1375_v57 = vmul.f32 %v1358_v26, %v3974_v44  ;;  %2955 = vpow2.f32 %v1272_v53  ;;  %v1093_v61 = vmul.f32 %v1076_v5, %v1076_v5  ;;  %v1212_v59 = vsub.f32 %v3776_v34, %v4249_v38 }
 0x127   : > { %v2946_v18 = vpop.eup %2945  ;;  %1435 = vmatpush.msrb.mxu1 %v2944_v47  ;;  %v1247_v25 = vmul.f32 %v1230_v58, %v3828_v49  ;;  %2957 = vpow2.f32 %v1130_v42  ;;  %v1357_v62 = vmul.f32 %v1340_v7, %v1340_v7  ;;  %v1075_v16 = vsub.f32 %v3977_v55, %v4216_v51  ;;  %v4262_v58 = vld [vmem:[%s3417_s13 + $0x9] ss:$0 sm:$0xff] }
 0x128   : > { %1299 = vmatpush.msra.mxu3 %v2946_v18  ;;  %v1394_v54 = vmul.f32 1.442695, %v1375_v57  ;;  %v2948_v1 = vpop.eup %2947  ;;  %v1110_v23 = vmul.f32 %v1093_v61, %v3961_v31  ;;  %v1229_v46 = vmul.f32 %v1212_v59, %v1212_v59  ;;  %v1339_v11 = vsub.f32 %v3977_v55, %v3256_v45  ;;  %v4941_v57 = vld [vmem:[#allocation8_spill] sm:$0xff]  ;;  %v4268_v18 = vld [vmem:[%s3417_s13 + $0xb] ss:$0 sm:$0xff] }
 0x129   : > { %v1270_v41 = vmul.f32 1.442695, %v1247_v25  ;;  %v2950_v0 = vpop.eup %2949  ;;  %1459 = vmatpush.msra.mxu2 %v2948_v1  ;;  %v1374_v4 = vmul.f32 %v1357_v62, %v3961_v31  ;;  %v1092_v35 = vmul.f32 %v1075_v16, %v1075_v16  ;;  %v1211_v19 = vsub.f32 %v4938_v43, %v4249_v38  ;;  %v4274_v62 = vld [vmem:[%s3417_s13 + $0xa] ss:$0 sm:$0xff] }
 0x12a   : > { %2959 = vpow2.f32 %v1394_v54  ;;  %v2952_v8 = vpop.eup %2951  ;;  %1172 = vmatpush.msrb.mxu0 %v2950_v0  ;;  %v1128_v51 = vmul.f32 1.442695, %v1110_v23  ;;  %v1246_v26 = vmul.f32 %v1229_v46, %v3878_v32  ;;  %v1356_v53 = vmul.f32 %v1339_v11, %v1339_v11 }
 0x12b   : > { %2961 = vpow2.f32 %v1270_v41  ;;  %v2954_v45 = vpop.eup %2953  ;;  %1436 = vmatpush.msrb.mxu1 %v2952_v8  ;;  %v1392_v5 = vmul.f32 1.442695, %v1374_v4  ;;  %v1109_v47 = vmul.f32 %v1092_v35, %v4015_v37  ;;  %v1228_v42 = vmul.f32 %v1211_v19, %v1211_v19 }
 0x12c   : > { %v1486_v7 = vsub.f32 %v4941_v57, %v4221_v9  ;;  %v2956_v25 = vpop.eup %2955  ;;  %1591 = vmatpush.msrb.mxu2 %v2954_v45  ;;  %2963 = vpow2.f32 %v1128_v51  ;;  %v1268_v61 = vmul.f32 1.442695, %v1246_v26  ;;  %v1373_v59 = vmul.f32 %v1356_v53, %v4015_v37 }
 0x12d   : > { %v1619_v54 = vsub.f32 %v4939_v17, %v4262_v58  ;;  %v2958_v16 = vpop.eup %2957  ;;  %1300 = vmatpush.msra.mxu3 %v2956_v25  ;;  %2965 = vpow2.f32 %v1392_v5  ;;  %v1126_v1 = vmul.f32 1.442695, %v1109_v47  ;;  %v1245_v41 = vmul.f32 %v1228_v42, %v3735_v2  ;;  %2620 = vmatmul.msk.f32.vlgmr.msra.gmra.mxu2 %vm494_vm0, %v3816_v27 }
 0x12e   : > { %v1503_v23 = vmul.f32 %v1486_v7, %v1486_v7  ;;  %1173 = vmatpush.msrb.mxu0 %v2958_v16  ;;  %2967 = vpow2.f32 %v1268_v61  ;;  %v1390_v46 = vmul.f32 1.442695, %v1373_v59  ;;  %v1751_v0 = vsub.f32 %v4939_v17, %v4274_v62 }
 0x12f   : > { %v1636_v11 = vmul.f32 %v1619_v54, %v1619_v54  ;;  %2969 = vpow2.f32 %v1126_v1  ;;  %v1266_v35 = vmul.f32 1.442695, %v1245_v41  ;;  %v1882_v8 = vsub.f32 %v4941_v57, %v4268_v18 }
 0x130   : > { %v2960_v4 = vpop.eup %2959  ;;  %v1520_v19 = vmul.f32 %v1503_v23, %v3582_v10  ;;  %2971 = vpow2.f32 %v1390_v46  ;;  %v1768_v53 = vmul.f32 %v1751_v0, %v1751_v0  ;;  %v1210_v45 = vsub.f32 %v3696_v48, %v4249_v38 }
 0x131   : > { %v2962_v51 = vpop.eup %2961  ;;  %1437 = vmatpush.msrb.mxu1 %v2960_v4  ;;  %v1653_v26 = vmul.f32 %v1636_v11, %v4940_v3  ;;  %2973 = vpow2.f32 %v1266_v35  ;;  %v1899_v47 = vmul.f32 %v1882_v8, %v1882_v8  ;;  %v1485_v42 = vsub.f32 %v3586_v15, %v4221_v9 }
 0x132   : > { %1301 = vmatpush.msra.mxu3 %v2962_v51  ;;  %v1552_v5 = vmul.f32 1.442695, %v1520_v19  ;;  %v2964_v7 = vpop.eup %2963  ;;  %v1785_v61 = vmul.f32 %v1768_v53, %v4940_v3  ;;  %v1227_v59 = vmul.f32 %v1210_v45, %v1210_v45  ;;  %v1881_v54 = vsub.f32 %v3586_v15, %v4268_v18 }
 0x133   : > { %v1686_v25 = vmul.f32 1.442695, %v1653_v26  ;;  %v2966_v16 = vpop.eup %2965  ;;  %1174 = vmatpush.msrb.mxu0 %v2964_v7  ;;  %v1916_v1 = vmul.f32 %v1899_v47, %v3582_v10  ;;  %v1502_v41 = vmul.f32 %v1485_v42, %v1485_v42  ;;  %v1209_v23 = vsub.f32 %v3871_v14, %v4249_v38 }
 0x134   : > { %2975 = vpow2.f32 %v1552_v5  ;;  %v2968_v46 = vpop.eup %2967  ;;  %1438 = vmatpush.msrb.mxu1 %v2966_v16  ;;  %v1818_v11 = vmul.f32 1.442695, %v1785_v61  ;;  %v1244_v0 = vmul.f32 %v1227_v59, %v3778_v60  ;;  %v1898_v4 = vmul.f32 %v1881_v54, %v1881_v54 }
 0x135   : > { %2977 = vpow2.f32 %v1686_v25  ;;  %v2970_v35 = vpop.eup %2969  ;;  %1302 = vmatpush.msra.mxu3 %v2968_v46  ;;  %v1948_v19 = vmul.f32 1.442695, %v1916_v1  ;;  %v1519_v8 = vmul.f32 %v1502_v41, %v3511_v36  ;;  %v1226_v51 = vmul.f32 %v1209_v23, %v1209_v23  ;;  %2623 = vmatmul.msk.f32.vlgmr.msrb.gmra.mxu2 %vm494_vm0, %v3816_v27 }
 0x136   : > { %v1484_v26 = vsub.f32 %v4914_v20, %v4221_v9  ;;  %v2972_v53 = vpop.eup %2971  ;;  %1175 = vmatpush.msrb.mxu0 %v2970_v35  ;;  %2979 = vpow2.f32 %v1818_v11  ;;  %v1264_v45 = vmul.f32 1.442695, %v1244_v0  ;;  %v1915_v5 = vmul.f32 %v1898_v4, %v3511_v36 }
 0x137   : > { %v1880_v47 = vsub.f32 %v4914_v20, %v4268_v18  ;;  %v2974_v42 = vpop.eup %2973  ;;  %1439 = vmatpush.msrb.mxu1 %v2972_v53  ;;  %1176 = vmatmul.f32.vlgmr.msrb.gmra.mxu0 %v4925_v21  ;;  %2981 = vpow2.f32 %v1948_v19  ;;  %v1550_v7 = vmul.f32 1.442695, %v1519_v8  ;;  %v1243_v25 = vmul.f32 %v1226_v51, %v3974_v44 }
 0x138   : > { %v1501_v61 = vmul.f32 %v1484_v26, %v1484_v26  ;;  %1303 = vmatpush.msra.mxu3 %v2974_v42  ;;  %1440 = vmatmul.f32.vlgmr.msrb.gmra.mxu1 %v4925_v21  ;;  %2983 = vpow2.f32 %v1264_v45  ;;  %v1946_v59 = vmul.f32 1.442695, %v1915_v5  ;;  %v1208_v16 = vsub.f32 %v4916_v24, %v4249_v38 }
 0x139   : > { %v1897_v54 = vmul.f32 %v1880_v47, %v1880_v47  ;;  %2985 = vpow2.f32 %v1550_v7  ;;  %v1262_v41 = vmul.f32 1.442695, %v1243_v25  ;;  %v1483_v46 = vsub.f32 %v4924_v50, %v4221_v9 }
 0x13a   : > { %v2976_v1 = vpop.eup %2975  ;;  %v1518_v23 = vmul.f32 %v1501_v61, %v4920_v22  ;;  %2987 = vpow2.f32 %v1946_v59  ;;  %v1225_v4 = vmul.f32 %v1208_v16, %v1208_v16  ;;  %v1879_v35 = vsub.f32 %v4924_v50, %v4268_v18 }
 0x13b   : > { %v2978_v11 = vpop.eup %2977  ;;  %1556 = vmatpush.msra.mxu0 %v2976_v1  ;;  %v1914_v0 = vmul.f32 %v1897_v54, %v4920_v22  ;;  %2989 = vpow2.f32 %v1262_v41  ;;  %v1500_v8 = vmul.f32 %v1483_v46, %v1483_v46  ;;  %v1207_v51 = vsub.f32 %v3977_v55, %v4249_v38 }
 0x13c   : > { %1723 = vmatpush.msra.mxu2 %v2978_v11  ;;  %v1548_v19 = vmul.f32 1.442695, %v1518_v23  ;;  %v2980_v26 = vpop.eup %2979  ;;  %v1242_v45 = vmul.f32 %v1225_v4, %v3961_v31  ;;  %v1896_v5 = vmul.f32 %v1879_v35, %v1879_v35  ;;  %v1482_v47 = vsub.f32 %v4933_v39, %v4221_v9 }
 0x13d   : > { %v1944_v53 = vmul.f32 1.442695, %v1914_v0  ;;  %v2982_v42 = vpop.eup %2981  ;;  %1855 = vmatpush.msra.mxu1 %v2980_v26  ;;  %v1517_v7 = vmul.f32 %v1500_v8, %v4930_v33  ;;  %v1224_v25 = vmul.f32 %v1207_v51, %v1207_v51  ;;  %v1750_v61 = vsub.f32 %v4941_v57, %v4274_v62  ;;  %2626 = vmatmul.msk.f32.vlgmr.msra.gmra.mxu2 %vm494_vm0, %v3816_v27 }
 0x13e   : > { %2991 = vpow2.f32 %v1548_v19  ;;  %v2984_v38 = vpop.eup %2983  ;;  %v1260_v59 = vmul.f32 1.442695, %v1242_v45  ;;  %v1913_v54 = vmul.f32 %v1896_v5, %v4930_v33  ;;  %v1499_v16 = vmul.f32 %v1482_v47, %v1482_v47 }
 0x13f   : > { %1952 = vmatpush.msrb.mxu1 %v2982_v42  ;;  %2993 = vpow2.f32 %v1944_v53  ;;  %v2986_v1 = vpop.eup %2985  ;;  %1304 = vmatpush.msra.mxu3 %v2984_v38  ;;  %v1546_v41 = vmul.f32 1.442695, %v1517_v7  ;;  %v1241_v23 = vmul.f32 %v1224_v25, %v4015_v37  ;;  %v1767_v46 = vmul.f32 %v1750_v61, %v1750_v61 }
 0x140   : > { %v1618_v11 = vsub.f32 %v4941_v57, %v4262_v58  ;;  %v2988_v0 = vpop.eup %2987  ;;  %1557 = vmatpush.msra.mxu0 %v2986_v1  ;;  %2995 = vpow2.f32 %v1260_v59  ;;  %v1942_v4 = vmul.f32 1.442695, %v1913_v54  ;;  %v1516_v35 = vmul.f32 %v1499_v16, %v4937_v63  ;;  %2629 = vmatmul.msk.f32.vlgmr.msra.gmra.mxu1 %vm494_vm0, %v3816_v27 }
 0x141   : > { %v1878_v19 = vsub.f32 %v4933_v39, %v4268_v18  ;;  %v2990_v8 = vpop.eup %2989  ;;  %1953 = vmatpush.msrb.mxu1 %v2988_v0  ;;  %2997 = vpow2.f32 %v1546_v41  ;;  %v1258_v51 = vmul.f32 1.442695, %v1241_v23  ;;  %v1784_v26 = vmul.f32 %v1767_v46, %v3582_v10 }
 0x142   : > { %v1635_v53 = vmul.f32 %v1618_v11, %v1618_v11  ;;  %1305 = vmatpush.msra.mxu3 %v2990_v8  ;;  %2999 = vpow2.f32 %v1942_v4  ;;  %v1544_v45 = vmul.f32 1.442695, %v1516_v35  ;;  %v1481_v47 = vsub.f32 %v4936_v28, %v4221_v9 }
 0x143   : > { %v1895_v5 = vmul.f32 %v1878_v19, %v1878_v19  ;;  %3001 = vpow2.f32 %v1258_v51  ;;  %v1816_v7 = vmul.f32 1.442695, %v1784_v26  ;;  %v1749_v61 = vsub.f32 %v3586_v15, %v4274_v62 }
 0x144   : > { %v2992_v42 = vpop.eup %2991  ;;  %v1652_v25 = vmul.f32 %v1635_v53, %v3582_v10  ;;  %3003 = vpow2.f32 %v1544_v45  ;;  %v1498_v54 = vmul.f32 %v1481_v47, %v1481_v47  ;;  %v1617_v16 = vsub.f32 %v3586_v15, %v4262_v58 }
 0x145   : > { %v2994_v38 = vpop.eup %2993  ;;  %1558 = vmatpush.msra.mxu0 %v2992_v42  ;;  %v1912_v59 = vmul.f32 %v1895_v5, %v4937_v63  ;;  %3005 = vpow2.f32 %v1816_v7  ;;  %v1766_v41 = vmul.f32 %v1749_v61, %v1749_v61  ;;  %v1877_v23 = vsub.f32 %v4936_v28, %v4268_v18 }
 0x146   : > { %1954 = vmatpush.msrb.mxu1 %v2994_v38  ;;  %v1684_v1 = vmul.f32 1.442695, %v1652_v25  ;;  %v2996_v46 = vpop.eup %2995  ;;  %v1515_v0 = vmul.f32 %v1498_v54, %v3690_v30  ;;  %v1634_v4 = vmul.f32 %v1617_v16, %v1617_v16  ;;  %v1480_v35 = vsub.f32 %v3645_v13, %v4221_v9 }
 0x147   : > { %v1940_v11 = vmul.f32 1.442695, %v1912_v59  ;;  %v2998_v19 = vpop.eup %2997  ;;  %1306 = vmatpush.msra.mxu3 %v2996_v46  ;;  %v1783_v8 = vmul.f32 %v1766_v41, %v3511_v36  ;;  %v1894_v51 = vmul.f32 %v1877_v23, %v1877_v23  ;;  %v1748_v26 = vsub.f32 %v4914_v20, %v4274_v62 }
 0x148   : > { %3007 = vpow2.f32 %v1684_v1  ;;  %v3000_v53 = vpop.eup %2999  ;;  %1559 = vmatpush.msra.mxu0 %v2998_v19  ;;  %v1542_v45 = vmul.f32 1.442695, %v1515_v0  ;;  %v1651_v5 = vmul.f32 %v1634_v4, %v3511_v36  ;;  %v1497_v47 = vmul.f32 %v1480_v35, %v1480_v35 }
 0x149   : > { %3009 = vpow2.f32 %v1940_v11  ;;  %v3002_v42 = vpop.eup %3001  ;;  %1955 = vmatpush.msrb.mxu1 %v3000_v53  ;;  %v1814_v7 = vmul.f32 1.442695, %v1783_v8  ;;  %v1911_v25 = vmul.f32 %v1894_v51, %v3690_v30  ;;  %v1765_v61 = vmul.f32 %v1748_v26, %v1748_v26 }
 0x14a   : > { %v1616_v38 = vsub.f32 %v4914_v20, %v4262_v58  ;;  %v3004_v59 = vpop.eup %3003  ;;  %1307 = vmatpush.msra.mxu3 %v3002_v42  ;;  %3011 = vpow2.f32 %v1542_v45  ;;  %v1682_v54 = vmul.f32 1.442695, %v1651_v5  ;;  %v1514_v16 = vmul.f32 %v1497_v47, %v4919_v52 }
 0x14b   : > { %v1876_v1 = vsub.f32 %v3645_v13, %v4268_v18  ;;  %v3006_v41 = vpop.eup %3005  ;;  %1560 = vmatpush.msra.mxu0 %v3004_v59  ;;  %1308 = vmatmul.f32.vlgmr.msra.gmra.mxu3 %v4925_v21  ;;  %3013 = vpow2.f32 %v1814_v7  ;;  %v1938_v23 = vmul.f32 1.442695, %v1911_v25  ;;  %v1782_v46 = vmul.f32 %v1765_v61, %v4920_v22 }
 0x14c   : > { %v1633_v11 = vmul.f32 %v1616_v38, %v1616_v38  ;;  %1820 = vmatpush.msrb.mxu2 %v3006_v41  ;;  %3015 = vpow2.f32 %v1682_v54  ;;  %v1540_v0 = vmul.f32 1.442695, %v1514_v16  ;;  %v1479_v35 = vsub.f32 %v4922_v6, %v4221_v9 }
 0x14d   : > { %v1893_v4 = vmul.f32 %v1876_v1, %v1876_v1  ;;  %3017 = vpow2.f32 %v1938_v23  ;;  %v1812_v8 = vmul.f32 1.442695, %v1782_v46  ;;  %v1747_v26 = vsub.f32 %v4924_v50, %v4274_v62 }
 0x14e   : > { %v3008_v19 = vpop.eup %3007  ;;  %v1650_v51 = vmul.f32 %v1633_v11, %v4920_v22  ;;  %3019 = vpow2.f32 %v1540_v0  ;;  %v1496_v5 = vmul.f32 %v1479_v35, %v1479_v35  ;;  %v1615_v47 = vsub.f32 %v4924_v50, %v4262_v58 }
 0x14f   : > { %v3010_v53 = vpop.eup %3009  ;;  %1688 = vmatpush.msrb.mxu3 %v3008_v19  ;;  %v1910_v45 = vmul.f32 %v1893_v4, %v4919_v52  ;;  %3021 = vpow2.f32 %v1812_v8  ;;  %v1764_v7 = vmul.f32 %v1747_v26, %v1747_v26  ;;  %v1875_v25 = vsub.f32 %v4922_v6, %v4268_v18 }
 0x150   : > { %1956 = vmatpush.msrb.mxu1 %v3010_v53  ;;  %v1680_v42 = vmul.f32 1.442695, %v1650_v51  ;;  %v3012_v61 = vpop.eup %3011  ;;  %v1513_v59 = vmul.f32 %v1496_v5, %v4928_v40  ;;  %v1632_v54 = vmul.f32 %v1615_v47, %v1615_v47  ;;  %v1478_v16 = vsub.f32 %v4926_v12, %v4221_v9 }
 0x151   : > { %v1936_v38 = vmul.f32 1.442695, %v1910_v45  ;;  %v3014_v1 = vpop.eup %3013  ;;  %1561 = vmatpush.msra.mxu0 %v3012_v61  ;;  %v1781_v41 = vmul.f32 %v1764_v7, %v4930_v33  ;;  %v1892_v23 = vmul.f32 %v1875_v25, %v1875_v25  ;;  %v1746_v46 = vsub.f32 %v4933_v39, %v4274_v62 }
 0x152   : > { %3023 = vpow2.f32 %v1680_v42  ;;  %v3016_v11 = vpop.eup %3015  ;;  %1821 = vmatpush.msrb.mxu2 %v3014_v1  ;;  %v1538_v0 = vmul.f32 1.442695, %v1513_v59  ;;  %v1649_v4 = vmul.f32 %v1632_v54, %v4930_v33  ;;  %v1495_v35 = vmul.f32 %v1478_v16, %v1478_v16 }
 0x153   : > { %3025 = vpow2.f32 %v1936_v38  ;;  %v3018_v19 = vpop.eup %3017  ;;  %1689 = vmatpush.msrb.mxu3 %v3016_v11  ;;  %v1810_v8 = vmul.f32 1.442695, %v1781_v41  ;;  %v1909_v51 = vmul.f32 %v1892_v23, %v4928_v40  ;;  %v1763_v26 = vmul.f32 %v1746_v46, %v1746_v46 }
 0x154   : > { %v1614_v53 = vsub.f32 %v4933_v39, %v4262_v58  ;;  %v3020_v45 = vpop.eup %3019  ;;  %1957 = vmatpush.msrb.mxu1 %v3018_v19  ;;  %3027 = vpow2.f32 %v1538_v0  ;;  %v1678_v5 = vmul.f32 1.442695, %v1649_v4  ;;  %v1512_v47 = vmul.f32 %v1495_v35, %v4931_v29 }
 0x155   : > { %v1874_v42 = vsub.f32 %v4926_v12, %v4268_v18  ;;  %v3022_v7 = vpop.eup %3021  ;;  %1562 = vmatpush.msra.mxu0 %v3020_v45  ;;  %3029 = vpow2.f32 %v1810_v8  ;;  %v1934_v25 = vmul.f32 1.442695, %v1909_v51  ;;  %v1780_v61 = vmul.f32 %v1763_v26, %v4937_v63 }
 0x156   : > { %v1631_v38 = vmul.f32 %v1614_v53, %v1614_v53  ;;  %1822 = vmatpush.msrb.mxu2 %v3022_v7  ;;  %3031 = vpow2.f32 %v1678_v5  ;;  %v1536_v59 = vmul.f32 1.442695, %v1512_v47  ;;  %v1477_v16 = vsub.f32 %v4935_v56, %v4221_v9 }
 0x157   : > { %v1891_v54 = vmul.f32 %v1874_v42, %v1874_v42  ;;  %3033 = vpow2.f32 %v1934_v25  ;;  %v1808_v41 = vmul.f32 1.442695, %v1780_v61  ;;  %v1745_v46 = vsub.f32 %v4936_v28, %v4274_v62 }
 0x158   : > { %v3024_v1 = vpop.eup %3023  ;;  %v1648_v23 = vmul.f32 %v1631_v38, %v4937_v63  ;;  %3035 = vpow2.f32 %v1536_v59  ;;  %v1494_v4 = vmul.f32 %v1477_v16, %v1477_v16  ;;  %v1613_v35 = vsub.f32 %v4936_v28, %v4262_v58 }
 0x159   : > { %v3026_v11 = vpop.eup %3025  ;;  %1690 = vmatpush.msrb.mxu3 %v3024_v1  ;;  %v1908_v0 = vmul.f32 %v1891_v54, %v4931_v29  ;;  %3037 = vpow2.f32 %v1808_v41  ;;  %v1762_v8 = vmul.f32 %v1745_v46, %v1745_v46  ;;  %v1873_v51 = vsub.f32 %v4935_v56, %v4268_v18 }
 0x15a   : > { %1958 = vmatpush.msrb.mxu1 %v3026_v11  ;;  %v1676_v19 = vmul.f32 1.442695, %v1648_v23  ;;  %v3028_v26 = vpop.eup %3027  ;;  %v1511_v45 = vmul.f32 %v1494_v4, %v3828_v49  ;;  %v1630_v5 = vmul.f32 %v1613_v35, %v1613_v35  ;;  %v1476_v47 = vsub.f32 %v3776_v34, %v4221_v9 }
 0x15b   : > { %v1932_v53 = vmul.f32 1.442695, %v1908_v0  ;;  %v3030_v42 = vpop.eup %3029  ;;  %1563 = vmatpush.msra.mxu0 %v3028_v26  ;;  %v1779_v7 = vmul.f32 %v1762_v8, %v3690_v30  ;;  %v1890_v25 = vmul.f32 %v1873_v51, %v1873_v51  ;;  %v1744_v61 = vsub.f32 %v3645_v13, %v4274_v62 }
 0x15c   : > { %3039 = vpow2.f32 %v1676_v19  ;;  %v3032_v38 = vpop.eup %3031  ;;  %1823 = vmatpush.msrb.mxu2 %v3030_v42  ;;  %v1534_v59 = vmul.f32 1.442695, %v1511_v45  ;;  %v1647_v54 = vmul.f32 %v1630_v5, %v3690_v30  ;;  %v1493_v16 = vmul.f32 %v1476_v47, %v1476_v47 }
 0x15d   : > { %3041 = vpow2.f32 %v1932_v53  ;;  %v3034_v1 = vpop.eup %3033  ;;  %1691 = vmatpush.msrb.mxu3 %v3032_v38  ;;  %v1806_v41 = vmul.f32 1.442695, %v1779_v7  ;;  %v1907_v23 = vmul.f32 %v1890_v25, %v3828_v49  ;;  %v1761_v46 = vmul.f32 %v1744_v61, %v1744_v61 }
 0x15e   : > { %v1612_v11 = vsub.f32 %v3645_v13, %v4262_v58  ;;  %v3036_v0 = vpop.eup %3035  ;;  %1959 = vmatpush.msrb.mxu1 %v3034_v1  ;;  %3043 = vpow2.f32 %v1534_v59  ;;  %v1674_v4 = vmul.f32 1.442695, %v1647_v54  ;;  %v1510_v35 = vmul.f32 %v1493_v16, %v3878_v32 }
 0x15f   : > { %v1872_v19 = vsub.f32 %v3776_v34, %v4268_v18  ;;  %v3038_v8 = vpop.eup %3037  ;;  %1564 = vmatpush.msra.mxu0 %v3036_v0  ;;  %3045 = vpow2.f32 %v1806_v41  ;;  %v1930_v51 = vmul.f32 1.442695, %v1907_v23  ;;  %v1778_v26 = vmul.f32 %v1761_v46, %v4919_v52 }
 0x160   : > { %v1629_v53 = vmul.f32 %v1612_v11, %v1612_v11  ;;  %1824 = vmatpush.msrb.mxu2 %v3038_v8  ;;  %3047 = vpow2.f32 %v1674_v4  ;;  %v1532_v45 = vmul.f32 1.442695, %v1510_v35  ;;  %v1475_v47 = vsub.f32 %v4938_v43, %v4221_v9 }
 0x161   : > { %v1889_v5 = vmul.f32 %v1872_v19, %v1872_v19  ;;  %3049 = vpow2.f32 %v1930_v51  ;;  %v1804_v7 = vmul.f32 1.442695, %v1778_v26  ;;  %v1743_v61 = vsub.f32 %v4922_v6, %v4274_v62 }
 0x162   : > { %v3040_v42 = vpop.eup %3039  ;;  %v1646_v25 = vmul.f32 %v1629_v53, %v4919_v52  ;;  %3051 = vpow2.f32 %v1532_v45  ;;  %v1492_v54 = vmul.f32 %v1475_v47, %v1475_v47  ;;  %v1611_v16 = vsub.f32 %v4922_v6, %v4262_v58 }
 0x163   : > { %v3042_v38 = vpop.eup %3041  ;;  %1692 = vmatpush.msrb.mxu3 %v3040_v42  ;;  %v1906_v59 = vmul.f32 %v1889_v5, %v3878_v32  ;;  %3053 = vpow2.f32 %v1804_v7  ;;  %v1760_v41 = vmul.f32 %v1743_v61, %v1743_v61  ;;  %v1871_v23 = vsub.f32 %v4938_v43, %v4268_v18 }
 0x164   : > { %1960 = vmatpush.msrb.mxu1 %v3042_v38  ;;  %v1672_v1 = vmul.f32 1.442695, %v1646_v25  ;;  %v3044_v46 = vpop.eup %3043  ;;  %v1509_v0 = vmul.f32 %v1492_v54, %v3735_v2  ;;  %v1628_v4 = vmul.f32 %v1611_v16, %v1611_v16  ;;  %v1474_v35 = vsub.f32 %v3696_v48, %v4221_v9 }
 0x165   : > { %v1928_v11 = vmul.f32 1.442695, %v1906_v59  ;;  %v3046_v19 = vpop.eup %3045  ;;  %1565 = vmatpush.msra.mxu0 %v3044_v46  ;;  %v1777_v8 = vmul.f32 %v1760_v41, %v4928_v40  ;;  %v1888_v51 = vmul.f32 %v1871_v23, %v1871_v23  ;;  %v1742_v26 = vsub.f32 %v4926_v12, %v4274_v62 }
 0x166   : > { %3055 = vpow2.f32 %v1672_v1  ;;  %v3048_v53 = vpop.eup %3047  ;;  %1825 = vmatpush.msrb.mxu2 %v3046_v19  ;;  %v1530_v45 = vmul.f32 1.442695, %v1509_v0  ;;  %v1645_v5 = vmul.f32 %v1628_v4, %v4928_v40  ;;  %v1491_v47 = vmul.f32 %v1474_v35, %v1474_v35 }
 0x167   : > { %3057 = vpow2.f32 %v1928_v11  ;;  %v3050_v42 = vpop.eup %3049  ;;  %1693 = vmatpush.msrb.mxu3 %v3048_v53  ;;  %v1802_v7 = vmul.f32 1.442695, %v1777_v8  ;;  %v1905_v25 = vmul.f32 %v1888_v51, %v3735_v2  ;;  %v1759_v61 = vmul.f32 %v1742_v26, %v1742_v26 }
 0x168   : > { %v1610_v38 = vsub.f32 %v4926_v12, %v4262_v58  ;;  %v3052_v59 = vpop.eup %3051  ;;  %1961 = vmatpush.msrb.mxu1 %v3050_v42  ;;  %3059 = vpow2.f32 %v1530_v45  ;;  %v1670_v54 = vmul.f32 1.442695, %v1645_v5  ;;  %v1508_v16 = vmul.f32 %v1491_v47, %v3778_v60 }
 0x169   : > { %v1870_v1 = vsub.f32 %v3696_v48, %v4268_v18  ;;  %v3054_v41 = vpop.eup %3053  ;;  %1566 = vmatpush.msra.mxu0 %v3052_v59  ;;  %3061 = vpow2.f32 %v1802_v7  ;;  %v1926_v23 = vmul.f32 1.442695, %v1905_v25  ;;  %v1776_v46 = vmul.f32 %v1759_v61, %v4931_v29 }
 0x16a   : > { %v1627_v11 = vmul.f32 %v1610_v38, %v1610_v38  ;;  %1826 = vmatpush.msrb.mxu2 %v3054_v41  ;;  %3063 = vpow2.f32 %v1670_v54  ;;  %v1528_v0 = vmul.f32 1.442695, %v1508_v16  ;;  %v1473_v35 = vsub.f32 %v3871_v14, %v4221_v9 }
 0x16b   : > { %v1887_v4 = vmul.f32 %v1870_v1, %v1870_v1  ;;  %3065 = vpow2.f32 %v1926_v23  ;;  %v1800_v8 = vmul.f32 1.442695, %v1776_v46  ;;  %v1741_v26 = vsub.f32 %v4935_v56, %v4274_v62 }
 0x16c   : > { %v3056_v19 = vpop.eup %3055  ;;  %v1644_v51 = vmul.f32 %v1627_v11, %v4931_v29  ;;  %3067 = vpow2.f32 %v1528_v0  ;;  %v1490_v5 = vmul.f32 %v1473_v35, %v1473_v35  ;;  %v1609_v47 = vsub.f32 %v4935_v56, %v4262_v58 }
 0x16d   : > { %v3058_v53 = vpop.eup %3057  ;;  %1694 = vmatpush.msrb.mxu3 %v3056_v19  ;;  %v1904_v45 = vmul.f32 %v1887_v4, %v3778_v60  ;;  %3069 = vpow2.f32 %v1800_v8  ;;  %v1758_v7 = vmul.f32 %v1741_v26, %v1741_v26  ;;  %v1869_v25 = vsub.f32 %v3871_v14, %v4268_v18 }
 0x16e   : > { %1962 = vmatpush.msrb.mxu1 %v3058_v53  ;;  %v1668_v42 = vmul.f32 1.442695, %v1644_v51  ;;  %v3060_v61 = vpop.eup %3059  ;;  %v1507_v59 = vmul.f32 %v1490_v5, %v3974_v44  ;;  %v1626_v54 = vmul.f32 %v1609_v47, %v1609_v47  ;;  %v1472_v16 = vsub.f32 %v4916_v24, %v4221_v9 }
 0x16f   : > { %v1924_v38 = vmul.f32 1.442695, %v1904_v45  ;;  %v3062_v1 = vpop.eup %3061  ;;  %1567 = vmatpush.msra.mxu0 %v3060_v61  ;;  %v1775_v41 = vmul.f32 %v1758_v7, %v3828_v49  ;;  %v1886_v23 = vmul.f32 %v1869_v25, %v1869_v25  ;;  %v1740_v46 = vsub.f32 %v3776_v34, %v4274_v62 }
 0x170   : > { %3071 = vpow2.f32 %v1668_v42  ;;  %v3064_v11 = vpop.eup %3063  ;;  %1827 = vmatpush.msrb.mxu2 %v3062_v1  ;;  %v1526_v0 = vmul.f32 1.442695, %v1507_v59  ;;  %v1643_v4 = vmul.f32 %v1626_v54, %v3828_v49  ;;  %v1489_v35 = vmul.f32 %v1472_v16, %v1472_v16 }
 0x171   : > { %3073 = vpow2.f32 %v1924_v38  ;;  %v3066_v19 = vpop.eup %3065  ;;  %1695 = vmatpush.msrb.mxu3 %v3064_v11  ;;  %v1798_v8 = vmul.f32 1.442695, %v1775_v41  ;;  %v1903_v51 = vmul.f32 %v1886_v23, %v3974_v44  ;;  %v1757_v26 = vmul.f32 %v1740_v46, %v1740_v46 }
 0x172   : > { %v1608_v53 = vsub.f32 %v3776_v34, %v4262_v58  ;;  %v3068_v45 = vpop.eup %3067  ;;  %1963 = vmatpush.msrb.mxu1 %v3066_v19  ;;  %3075 = vpow2.f32 %v1526_v0  ;;  %v1666_v5 = vmul.f32 1.442695, %v1643_v4  ;;  %v1506_v47 = vmul.f32 %v1489_v35, %v3961_v31 }
 0x173   : > { %v1868_v42 = vsub.f32 %v4916_v24, %v4268_v18  ;;  %v3070_v7 = vpop.eup %3069  ;;  %1568 = vmatpush.msra.mxu0 %v3068_v45  ;;  %3077 = vpow2.f32 %v1798_v8  ;;  %v1922_v25 = vmul.f32 1.442695, %v1903_v51  ;;  %v1774_v61 = vmul.f32 %v1757_v26, %v3878_v32 }
 0x174   : > { %v1625_v38 = vmul.f32 %v1608_v53, %v1608_v53  ;;  %1828 = vmatpush.msrb.mxu2 %v3070_v7  ;;  %3079 = vpow2.f32 %v1666_v5  ;;  %v1524_v59 = vmul.f32 1.442695, %v1506_v47  ;;  %v1471_v16 = vsub.f32 %v3977_v55, %v4221_v9 }
 0x175   : > { %v1885_v54 = vmul.f32 %v1868_v42, %v1868_v42  ;;  %3081 = vpow2.f32 %v1922_v25  ;;  %v1796_v41 = vmul.f32 1.442695, %v1774_v61  ;;  %v1739_v46 = vsub.f32 %v4938_v43, %v4274_v62  ;;  %v4473_v61 = vld [vmem:[%s3417_s13 + $0xc] ss:$0 sm:$0xff] }
 0x176   : > { %v3072_v1 = vpop.eup %3071  ;;  %v1642_v23 = vmul.f32 %v1625_v38, %v3878_v32  ;;  %3083 = vpow2.f32 %v1524_v59  ;;  %v1488_v4 = vmul.f32 %v1471_v16, %v1471_v16  ;;  %v1607_v35 = vsub.f32 %v4938_v43, %v4262_v58 }
 0x177   : > { %v3074_v11 = vpop.eup %3073  ;;  %1696 = vmatpush.msrb.mxu3 %v3072_v1  ;;  %v1902_v0 = vmul.f32 %v1885_v54, %v3961_v31  ;;  %3085 = vpow2.f32 %v1796_v41  ;;  %v1756_v19 = vmul.f32 %v1739_v46, %v1739_v46  ;;  %v1867_v8 = vsub.f32 %v3977_v55, %v4268_v18 }
 0x178   : > { %1964 = vmatpush.msrb.mxu1 %v3074_v11  ;;  %v1664_v9 = vmul.f32 1.442695, %v1642_v23  ;;  %v3076_v51 = vpop.eup %3075  ;;  %v1505_v53 = vmul.f32 %v1488_v4, %v4015_v37  ;;  %v1624_v45 = vmul.f32 %v1607_v35, %v1607_v35  ;;  %v1883_v5 = vsub.f32 %v4939_v17, %v4268_v18  ;;  %v4477_v18 = vld [vmem:[%s3417_s13 + $0xe] ss:$0 sm:$0xff] }
 0x179   : > { %v1920_v26 = vmul.f32 1.442695, %v1902_v0  ;;  %v3078_v47 = vpop.eup %3077  ;;  %1569 = vmatpush.msra.mxu0 %v3076_v51  ;;  %v1773_v42 = vmul.f32 %v1756_v19, %v3735_v2  ;;  %v1884_v7 = vmul.f32 %v1867_v8, %v1867_v8  ;;  %v1738_v25 = vsub.f32 %v3696_v48, %v4274_v62  ;;  %v4483_v0 = vld [vmem:[%s3417_s13 + $0xf] ss:$0 sm:$0xff] }
 0x17a   : > { %3087 = vpow2.f32 %v1664_v9  ;;  %v3080_v38 = vpop.eup %3079  ;;  %1829 = vmatpush.msrb.mxu2 %v3078_v47  ;;  %v1522_v59 = vmul.f32 1.442695, %v1505_v53  ;;  %v1641_v54 = vmul.f32 %v1624_v45, %v3735_v2  ;;  %v1900_v16 = vmul.f32 %v1883_v5, %v1883_v5 }
 0x17b   : > { %3089 = vpow2.f32 %v1920_v26  ;;  %v3082_v1 = vpop.eup %3081  ;;  %1697 = vmatpush.msrb.mxu3 %v3080_v38  ;;  %v1794_v41 = vmul.f32 1.442695, %v1773_v42  ;;  %v1901_v23 = vmul.f32 %v1884_v7, %v4015_v37  ;;  %v1755_v46 = vmul.f32 %v1738_v25, %v1738_v25 }
 0x17c   : > { %v2015_v11 = vsub.f32 %v4939_v17, %v4473_v61  ;;  %v3084_v4 = vpop.eup %3083  ;;  %1965 = vmatpush.msrb.mxu1 %v3082_v1  ;;  %3091 = vpow2.f32 %v1522_v59  ;;  %v1662_v35 = vmul.f32 1.442695, %v1641_v54  ;;  %v1917_v9 = vmul.f32 %v1900_v16, %v4940_v3 }
 0x17d   : > { %v2279_v19 = vsub.f32 %v4939_v17, %v4477_v18  ;;  %v3086_v8 = vpop.eup %3085  ;;  %1570 = vmatpush.msra.mxu0 %v3084_v4  ;;  %3093 = vpow2.f32 %v1794_v41  ;;  %v1918_v51 = vmul.f32 1.442695, %v1901_v23  ;;  %v1772_v26 = vmul.f32 %v1755_v46, %v3778_v60 }
 0x17e   : > { %v2032_v53 = vmul.f32 %v2015_v11, %v2015_v11  ;;  %1830 = vmatpush.msrb.mxu2 %v3086_v8  ;;  %3095 = vpow2.f32 %v1662_v35  ;;  %v1950_v45 = vmul.f32 1.442695, %v1917_v9  ;;  %v1606_v47 = vsub.f32 %v3696_v48, %v4262_v58 }
 0x17f   : > { %v2296_v5 = vmul.f32 %v2279_v19, %v2279_v19  ;;  %3097 = vpow2.f32 %v1918_v51  ;;  %v1792_v7 = vmul.f32 1.442695, %v1772_v26  ;;  %v2410_v38 = vsub.f32 %v4941_v57, %v4483_v0 }
 0x180   : > { %v3088_v42 = vpop.eup %3087  ;;  %v2049_v25 = vmul.f32 %v2032_v53, %v4940_v3  ;;  %3099 = vpow2.f32 %v1950_v45  ;;  %v1623_v16 = vmul.f32 %v1606_v47, %v1606_v47  ;;  %v1737_v1 = vsub.f32 %v3871_v14, %v4274_v62 }
 0x181   : > { %v3090_v59 = vpop.eup %3089  ;;  %1698 = vmatpush.msrb.mxu3 %v3088_v42  ;;  %v2313_v54 = vmul.f32 %v2296_v5, %v4940_v3  ;;  %3101 = vpow2.f32 %v1792_v7  ;;  %v2427_v23 = vmul.f32 %v2410_v38, %v2410_v38  ;;  %v1605_v46 = vsub.f32 %v3871_v14, %v4262_v58 }
 0x182   : > { %1966 = vmatpush.msrb.mxu1 %v3090_v59  ;;  %v2082_v41 = vmul.f32 1.442695, %v2049_v25  ;;  %v3092_v11 = vpop.eup %3091  ;;  %v1640_v35 = vmul.f32 %v1623_v16, %v3778_v60  ;;  %v1754_v9 = vmul.f32 %v1737_v1, %v1737_v1  ;;  %v2409_v19 = vsub.f32 %v3586_v15, %v4483_v0  ;;  %v3258_v59 = vld [vmem:[%s3417_s13 + $0x9] ss:$0 sm:$0xff] }
 0x183   : > { %v2346_v4 = vmul.f32 1.442695, %v2313_v54  ;;  %v3094_v8 = vpop.eup %3093  ;;  %1571 = vmatpush.msra.mxu0 %v3092_v11  ;;  %v2444_v51 = vmul.f32 %v2427_v23, %v3582_v10  ;;  %v1622_v26 = vmul.f32 %v1605_v46, %v1605_v46  ;;  %v1736_v53 = vsub.f32 %v4916_v24, %v4274_v62  ;;  %v4514_v23 = vld [vmem:[%s3417_s13 + $0xd] ss:$0 sm:$0xff] }
 0x184   : > { %3103 = vpow2.f32 %v2082_v41  ;;  %v3096_v45 = vpop.eup %3095  ;;  %1831 = vmatpush.msrb.mxu2 %v3094_v8  ;;  %1572 = vmatmul.f32.vlgmr.msra.gmra.mxu0 %v4925_v21  ;;  %v1660_v58 = vmul.f32 1.442695, %v1640_v35  ;;  %v1771_v5 = vmul.f32 %v1754_v9, %v3974_v44  ;;  %v2426_v47 = vmul.f32 %v2409_v19, %v2409_v19  ;;  %v3259_v8 = vld [vmem:[%s3417_s13 + $0xa] ss:$0 sm:$0xff] }
 0x185   : > { %3105 = vpow2.f32 %v2346_v4  ;;  %v3098_v42 = vpop.eup %3097  ;;  %1699 = vmatpush.msrb.mxu3 %v3096_v45  ;;  %v2476_v7 = vmul.f32 1.442695, %v2444_v51  ;;  %v1639_v25 = vmul.f32 %v1622_v26, %v3974_v44  ;;  %v1753_v38 = vmul.f32 %v1736_v53, %v1736_v53 }
 0x186   : > { %v1604_v54 = vsub.f32 %v4916_v24, %v3258_v59  ;;  %v3100_v62 = vpop.eup %3099  ;;  %1967 = vmatpush.msrb.mxu1 %v3098_v42  ;;  %3107 = vpow2.f32 %v1660_v58  ;;  %v1790_v16 = vmul.f32 1.442695, %v1771_v5  ;;  %v2443_v1 = vmul.f32 %v2426_v47, %v3511_v36 }
 0x187   : > { %v2408_v41 = vsub.f32 %v4914_v20, %v4483_v0  ;;  %v3102_v46 = vpop.eup %3101  ;;  %1987 = vmatpush.msrb.mxu0 %v3100_v62  ;;  %1968 = vmatmul.f32.vlgmr.msrb.gmra.mxu1 %v4925_v21  ;;  %3109 = vpow2.f32 %v2476_v7  ;;  %v1658_v11 = vmul.f32 1.442695, %v1639_v25  ;;  %v1770_v4 = vmul.f32 %v1753_v38, %v3961_v31 }
 0x188   : > { %v1621_v35 = vmul.f32 %v1604_v54, %v1604_v54  ;;  %1832 = vmatpush.msrb.mxu2 %v3102_v46  ;;  %3111 = vpow2.f32 %v1790_v16  ;;  %v2474_v9 = vmul.f32 1.442695, %v2443_v1  ;;  %v1735_v51 = vsub.f32 %v3977_v55, %v3259_v8 }
 0x189   : > { %v2425_v19 = vmul.f32 %v2408_v41, %v2408_v41  ;;  %3113 = vpow2.f32 %v1658_v11  ;;  %v1788_v53 = vmul.f32 1.442695, %v1770_v4  ;;  %v1603_v58 = vsub.f32 %v3977_v55, %v3258_v59 }
 0x18a   : > { %v3104_v26 = vpop.eup %3103  ;;  %v1638_v45 = vmul.f32 %v1621_v35, %v3961_v31  ;;  %3115 = vpow2.f32 %v2474_v9  ;;  %v1752_v42 = vmul.f32 %v1735_v51, %v1735_v51  ;;  %v2146_v7 = vsub.f32 %v4941_v57, %v4514_v23 }
 0x18b   : > { %v3106_v5 = vpop.eup %3105  ;;  %2119 = vmatpush.msra.mxu0 %v3104_v26  ;;  %v2442_v47 = vmul.f32 %v2425_v19, %v4920_v22  ;;  %3117 = vpow2.f32 %v1788_v53  ;;  %v1620_v38 = vmul.f32 %v1603_v58, %v1603_v58  ;;  %v2147_v54 = vsub.f32 %v4939_v17, %v4514_v23 }
 0x18c   : > { %2383 = vmatpush.msra.mxu1 %v3106_v5  ;;  %v1656_v25 = vmul.f32 1.442695, %v1638_v45  ;;  %v3108_v62 = vpop.eup %3107  ;;  %v1769_v59 = vmul.f32 %v1752_v42, %v4015_v37  ;;  %2632 = vmatmul.msk.f32.vlgmr.msrb.gmra.mxu0 %vm494_vm0, %v3816_v27  ;;  %v2163_v1 = vmul.f32 %v2146_v7, %v2146_v7  ;;  %v2407_v41 = vsub.f32 %v4924_v50, %v4483_v0 }
 0x18d   : > { %v2472_v16 = vmul.f32 1.442695, %v2442_v47  ;;  %v3110_v46 = vpop.eup %3109  ;;  %1700 = vmatpush.msrb.mxu3 %v3108_v62  ;;  %v1637_v11 = vmul.f32 %v1620_v38, %v4015_v37  ;;  %v2164_v4 = vmul.f32 %v2147_v54, %v2147_v54  ;;  %v2014_v35 = vsub.f32 %v4941_v57, %v4473_v61 }
 0x18e   : > { %3119 = vpow2.f32 %v1656_v25  ;;  %v3112_v9 = vpop.eup %3111  ;;  %2480 = vmatpush.msrb.mxu1 %v3110_v46  ;;  %v1786_v19 = vmul.f32 1.442695, %v1769_v59  ;;  %v2180_v8 = vmul.f32 %v2163_v1, %v3582_v10  ;;  %v2424_v51 = vmul.f32 %v2407_v41, %v2407_v41 }
 0x18f   : > { %3121 = vpow2.f32 %v2472_v16  ;;  %v3114_v26 = vpop.eup %3113  ;;  %1833 = vmatpush.msrb.mxu2 %v3112_v9  ;;  %v1654_v53 = vmul.f32 1.442695, %v1637_v11  ;;  %v2181_v45 = vmul.f32 %v2164_v4, %v4940_v3  ;;  %v2031_v58 = vmul.f32 %v2014_v35, %v2014_v35  ;;  %2641 = vmatmul.msk.f32.vlgmr.msra.gmra.mxu1 %vm494_vm0, %v3816_v27 }
 0x190   : > { %v2278_v5 = vsub.f32 %v4941_v57, %v4477_v18  ;;  %v3116_v47 = vpop.eup %3115  ;;  %1701 = vmatpush.msrb.mxu3 %v3114_v26  ;;  %3123 = vpow2.f32 %v1786_v19  ;;  %v2212_v42 = vmul.f32 1.442695, %v2180_v8  ;;  %v2441_v7 = vmul.f32 %v2424_v51, %v4930_v33 }
 0x191   : > { %v2145_v25 = vsub.f32 %v3586_v15, %v4514_v23  ;;  %v3118_v38 = vpop.eup %3117  ;;  %2481 = vmatpush.msrb.mxu1 %v3116_v47  ;;  %3125 = vpow2.f32 %v1654_v53  ;;  %v2214_v54 = vmul.f32 1.442695, %v2181_v45  ;;  %v2048_v62 = vmul.f32 %v2031_v58, %v3582_v10 }
 0x192   : > { %v2295_v16 = vmul.f32 %v2278_v5, %v2278_v5  ;;  %1834 = vmatpush.msrb.mxu2 %v3118_v38  ;;  %3127 = vpow2.f32 %v2212_v42  ;;  %v2470_v57 = vmul.f32 1.442695, %v2441_v7  ;;  %v2406_v1 = vsub.f32 %v4933_v39, %v4483_v0 }
 0x193   : > { %v2162_v59 = vmul.f32 %v2145_v25, %v2145_v25  ;;  %3129 = vpow2.f32 %v2214_v54  ;;  %v2080_v46 = vmul.f32 1.442695, %v2048_v62  ;;  %v2013_v4 = vsub.f32 %v3586_v15, %v4473_v61 }
 0x194   : > { %v3120_v41 = vpop.eup %3119  ;;  %v2312_v11 = vmul.f32 %v2295_v16, %v3582_v10  ;;  %3131 = vpow2.f32 %v2470_v57  ;;  %v2423_v19 = vmul.f32 %v2406_v1, %v2406_v1  ;;  %v2277_v8 = vsub.f32 %v3586_v15, %v4477_v18  ;;  %2635 = vmatmul.msk.f32.vlgmr.msra.gmra.mxu0 %vm494_vm0, %v3816_v27 }
 0x195   : > { %v3122_v35 = vpop.eup %3121  ;;  %1702 = vmatpush.msrb.mxu3 %v3120_v41  ;;  %v2179_v9 = vmul.f32 %v2162_v59, %v3511_v36  ;;  %3133 = vpow2.f32 %v2080_v46  ;;  %v2030_v26 = vmul.f32 %v2013_v4, %v2013_v4  ;;  %v2144_v10 = vsub.f32 %v4914_v20, %v4514_v23 }
 0x196   : > { %2482 = vmatpush.msrb.mxu1 %v3122_v35  ;;  %v2344_v51 = vmul.f32 1.442695, %v2312_v11  ;;  %v3124_v53 = vpop.eup %3123  ;;  %v2440_v58 = vmul.f32 %v2423_v19, %v4937_v63  ;;  %v2294_v5 = vmul.f32 %v2277_v8, %v2277_v8  ;;  %v2405_v47 = vsub.f32 %v4936_v28, %v4483_v0 }
 0x197   : > { %v2210_v45 = vmul.f32 1.442695, %v2179_v9  ;;  %v3126_v42 = vpop.eup %3125  ;;  %1835 = vmatpush.msrb.mxu2 %v3124_v53  ;;  %v2047_v15 = vmul.f32 %v2030_v26, %v3511_v36  ;;  %v2161_v7 = vmul.f32 %v2144_v10, %v2144_v10  ;;  %v2012_v25 = vsub.f32 %v4914_v20, %v4473_v61 }
 0x198   : > { %3135 = vpow2.f32 %v2344_v51  ;;  %v3128_v38 = vpop.eup %3127  ;;  %1703 = vmatpush.msrb.mxu3 %v3126_v42  ;;  %1836 = vmatmul.f32.vlgmr.msrb.gmra.mxu2 %v4925_v21  ;;  %v2468_v54 = vmul.f32 1.442695, %v2440_v58  ;;  %v2311_v62 = vmul.f32 %v2294_v5, %v3511_v36  ;;  %v2422_v16 = vmul.f32 %v2405_v47, %v2405_v47 }
 0x199   : > { %3137 = vpow2.f32 %v2210_v45  ;;  %v3130_v57 = vpop.eup %3129  ;;  %2216 = vmatpush.msrb.mxu0 %v3128_v38  ;;  %1704 = vmatmul.f32.vlgmr.msrb.gmra.mxu3 %v4925_v21  ;;  %v2078_v59 = vmul.f32 1.442695, %v2047_v15  ;;  %v2178_v1 = vmul.f32 %v2161_v7, %v4920_v22  ;;  %v2029_v41 = vmul.f32 %v2012_v25, %v2012_v25 }
 0x19a   : > { %v2276_v46 = vsub.f32 %v4914_v20, %v4477_v18  ;;  %v3132_v11 = vpop.eup %3131  ;;  %2251 = vmatpush.msra.mxu2 %v3130_v57  ;;  %3139 = vpow2.f32 %v2468_v54  ;;  %v2342_v4 = vmul.f32 1.442695, %v2311_v62  ;;  %v2439_v35 = vmul.f32 %v2422_v16, %v3690_v30 }
 0x19b   : > { %v2143_v36 = vsub.f32 %v4924_v50, %v4514_v23  ;;  %v3134_v9 = vpop.eup %3133  ;;  %2483 = vmatpush.msrb.mxu1 %v3132_v11  ;;  %3141 = vpow2.f32 %v2078_v59  ;;  %v2208_v19 = vmul.f32 1.442695, %v2178_v1  ;;  %v2046_v8 = vmul.f32 %v2029_v41, %v4920_v22 }
 0x19c   : > { %v2293_v51 = vmul.f32 %v2276_v46, %v2276_v46  ;;  %2084 = vmatpush.msra.mxu3 %v3134_v9  ;;  %3143 = vpow2.f32 %v2342_v4  ;;  %v2466_v26 = vmul.f32 1.442695, %v2439_v35  ;;  %v2404_v10 = vsub.f32 %v3645_v13, %v4483_v0 }
 0x19d   : > { %v2160_v20 = vmul.f32 %v2143_v36, %v2143_v36  ;;  %3145 = vpow2.f32 %v2208_v19  ;;  %v2076_v45 = vmul.f32 1.442695, %v2046_v8  ;;  %v2011_v5 = vsub.f32 %v4924_v50, %v4473_v61 }
 0x19e   : > { %v3136_v53 = vpop.eup %3135  ;;  %v2310_v58 = vmul.f32 %v2293_v51, %v4920_v22  ;;  %3147 = vpow2.f32 %v2466_v26  ;;  %v2421_v15 = vmul.f32 %v2404_v10, %v2404_v10  ;;  %v2275_v7 = vsub.f32 %v4924_v50, %v4477_v18 }
 0x19f   : > { %v3138_v47 = vpop.eup %3137  ;;  %2348 = vmatpush.msrb.mxu2 %v3136_v53  ;;  %v2177_v42 = vmul.f32 %v2160_v20, %v4930_v33  ;;  %3149 = vpow2.f32 %v2076_v45  ;;  %v2028_v38 = vmul.f32 %v2011_v5, %v2011_v5  ;;  %v2142_v54 = vsub.f32 %v4933_v39, %v4514_v23 }
 0x1a0   : > { %2217 = vmatpush.msrb.mxu0 %v3138_v47  ;;  %v2340_v25 = vmul.f32 1.442695, %v2310_v58  ;;  %v3140_v22 = vpop.eup %3139  ;;  %v2438_v16 = vmul.f32 %v2421_v15, %v4919_v52  ;;  %v2292_v57 = vmul.f32 %v2275_v7, %v2275_v7  ;;  %v2403_v59 = vsub.f32 %v4922_v6, %v4483_v0  ;;  %2638 = vmatmul.msk.f32.vlgmr.msra.gmra.mxu2 %vm494_vm0, %v3816_v27 }
 0x1a1   : > { %v2206_v62 = vmul.f32 1.442695, %v2177_v42  ;;  %v3142_v1 = vpop.eup %3141  ;;  %2484 = vmatpush.msrb.mxu1 %v3140_v22  ;;  %v2045_v50 = vmul.f32 %v2028_v38, %v4930_v33  ;;  %v2159_v41 = vmul.f32 %v2142_v54, %v2142_v54  ;;  %v2010_v46 = vsub.f32 %v4933_v39, %v4473_v61 }
 0x1a2   : > { %3151 = vpow2.f32 %v2340_v25  ;;  %v3144_v11 = vpop.eup %3143  ;;  %2085 = vmatpush.msra.mxu3 %v3142_v1  ;;  %v2464_v4 = vmul.f32 1.442695, %v2438_v16  ;;  %v2309_v35 = vmul.f32 %v2292_v57, %v4930_v33  ;;  %v2420_v36 = vmul.f32 %v2403_v59, %v2403_v59 }
 0x1a3   : > { %3153 = vpow2.f32 %v2206_v62  ;;  %v3146_v9 = vpop.eup %3145  ;;  %2349 = vmatpush.msrb.mxu2 %v3144_v11  ;;  %v2074_v19 = vmul.f32 1.442695, %v2045_v50  ;;  %v2176_v8 = vmul.f32 %v2159_v41, %v4937_v63  ;;  %v2027_v51 = vmul.f32 %v2010_v46, %v2010_v46 }
 0x1a4   : > { %v2274_v26 = vsub.f32 %v4933_v39, %v4477_v18  ;;  %v3148_v20 = vpop.eup %3147  ;;  %2218 = vmatpush.msrb.mxu0 %v3146_v9  ;;  %3155 = vpow2.f32 %v2464_v4  ;;  %v2338_v10 = vmul.f32 1.442695, %v2309_v35  ;;  %v2437_v53 = vmul.f32 %v2420_v36, %v4928_v40 }
 0x1a5   : > { %v2141_v45 = vsub.f32 %v4936_v28, %v4514_v23  ;;  %v3150_v33 = vpop.eup %3149  ;;  %2485 = vmatpush.msrb.mxu1 %v3148_v20  ;;  %3157 = vpow2.f32 %v2074_v19  ;;  %v2204_v58 = vmul.f32 1.442695, %v2176_v8  ;;  %v2044_v5 = vmul.f32 %v2027_v51, %v4937_v63 }
 0x1a6   : > { %v2291_v47 = vmul.f32 %v2274_v26, %v2274_v26  ;;  %2086 = vmatpush.msra.mxu3 %v3150_v33  ;;  %3159 = vpow2.f32 %v2338_v10  ;;  %v2462_v42 = vmul.f32 1.442695, %v2437_v53  ;;  %v2402_v15 = vsub.f32 %v4926_v12, %v4483_v0 }
 0x1a7   : > { %v2158_v39 = vmul.f32 %v2141_v45, %v2141_v45  ;;  %3161 = vpow2.f32 %v2204_v58  ;;  %v2072_v25 = vmul.f32 1.442695, %v2044_v5  ;;  %v2009_v54 = vsub.f32 %v4936_v28, %v4473_v61 }
 0x1a8   : > { %v3152_v7 = vpop.eup %3151  ;;  %v2308_v38 = vmul.f32 %v2291_v47, %v4937_v63  ;;  %3163 = vpow2.f32 %v2462_v42  ;;  %v2419_v16 = vmul.f32 %v2402_v15, %v2402_v15  ;;  %v2273_v57 = vsub.f32 %v4936_v28, %v4477_v18 }
 0x1a9   : > { %v3154_v22 = vpop.eup %3153  ;;  %2350 = vmatpush.msrb.mxu2 %v3152_v7  ;;  %v2175_v62 = vmul.f32 %v2158_v39, %v3690_v30  ;;  %3165 = vpow2.f32 %v2072_v25  ;;  %v2026_v1 = vmul.f32 %v2009_v54, %v2009_v54  ;;  %v2140_v50 = vsub.f32 %v3645_v13, %v4514_v23 }
 0x1aa   : > { %2219 = vmatpush.msrb.mxu0 %v3154_v22  ;;  %v2336_v59 = vmul.f32 1.442695, %v2308_v38  ;;  %v3156_v63 = vpop.eup %3155  ;;  %v2436_v46 = vmul.f32 %v2419_v16, %v4931_v29  ;;  %v2290_v11 = vmul.f32 %v2273_v57, %v2273_v57  ;;  %v2401_v4 = vsub.f32 %v4935_v56, %v4483_v0 }
 0x1ab   : > { %v2202_v41 = vmul.f32 1.442695, %v2175_v62  ;;  %v3158_v35 = vpop.eup %3157  ;;  %2486 = vmatpush.msrb.mxu1 %v3156_v63  ;;  %v2043_v28 = vmul.f32 %v2026_v1, %v3690_v30  ;;  %v2157_v36 = vmul.f32 %v2140_v50, %v2140_v50  ;;  %v2008_v9 = vsub.f32 %v3645_v13, %v4473_v61 }
 0x1ac   : > { %3167 = vpow2.f32 %v2336_v59  ;;  %v3160_v19 = vpop.eup %3159  ;;  %2087 = vmatpush.msra.mxu3 %v3158_v35  ;;  %v2460_v8 = vmul.f32 1.442695, %v2436_v46  ;;  %v2307_v51 = vmul.f32 %v2290_v11, %v3690_v30  ;;  %v2418_v26 = vmul.f32 %v2401_v4, %v2401_v4 }
 0x1ad   : > { %3169 = vpow2.f32 %v2202_v41  ;;  %v3162_v20 = vpop.eup %3161  ;;  %2351 = vmatpush.msrb.mxu2 %v3160_v19  ;;  %v2070_v10 = vmul.f32 1.442695, %v2043_v28  ;;  %v2174_v53 = vmul.f32 %v2157_v36, %v4919_v52  ;;  %v2025_v45 = vmul.f32 %v2008_v9, %v2008_v9 }
 0x1ae   : > { %v2272_v33 = vsub.f32 %v3645_v13, %v4477_v18  ;;  %v3164_v58 = vpop.eup %3163  ;;  %2220 = vmatpush.msrb.mxu0 %v3162_v20  ;;  %3171 = vpow2.f32 %v2460_v8  ;;  %v2334_v5 = vmul.f32 1.442695, %v2307_v51  ;;  %v2435_v47 = vmul.f32 %v2418_v26, %v3828_v49 }
 0x1af   : > { %v2139_v42 = vsub.f32 %v4922_v6, %v4514_v23  ;;  %v3166_v30 = vpop.eup %3165  ;;  %2487 = vmatpush.msrb.mxu1 %v3164_v58  ;;  %3173 = vpow2.f32 %v2070_v10  ;;  %v2200_v39 = vmul.f32 1.442695, %v2174_v53  ;;  %v2042_v15 = vmul.f32 %v2025_v45, %v4919_v52 }
 0x1b0   : > { %v2289_v7 = vmul.f32 %v2272_v33, %v2272_v33  ;;  %2088 = vmatpush.msra.mxu3 %v3166_v30  ;;  %3175 = vpow2.f32 %v2334_v5  ;;  %v2458_v25 = vmul.f32 1.442695, %v2435_v47  ;;  %v2400_v38 = vsub.f32 %v3776_v34, %v4483_v0 }
 0x1b1   : > { %v2156_v13 = vmul.f32 %v2139_v42, %v2139_v42  ;;  %3177 = vpow2.f32 %v2200_v39  ;;  %v2068_v22 = vmul.f32 1.442695, %v2042_v15  ;;  %v2007_v16 = vsub.f32 %v4922_v6, %v4473_v61 }
 0x1b2   : > { %v3168_v54 = vpop.eup %3167  ;;  %v2306_v62 = vmul.f32 %v2289_v7, %v4919_v52  ;;  %3179 = vpow2.f32 %v2458_v25  ;;  %v2417_v1 = vmul.f32 %v2400_v38, %v2400_v38  ;;  %v2271_v50 = vsub.f32 %v4922_v6, %v4477_v18 }
 0x1b3   : > { %v3170_v57 = vpop.eup %3169  ;;  %2352 = vmatpush.msrb.mxu2 %v3168_v54  ;;  %v2173_v59 = vmul.f32 %v2156_v13, %v4928_v40  ;;  %3181 = vpow2.f32 %v2068_v22  ;;  %v2024_v41 = vmul.f32 %v2007_v16, %v2007_v16  ;;  %v2138_v46 = vsub.f32 %v4926_v12, %v4514_v23 }
 0x1b4   : > { %2221 = vmatpush.msrb.mxu0 %v3170_v57  ;;  %v2332_v63 = vmul.f32 1.442695, %v2306_v62  ;;  %v3172_v52 = vpop.eup %3171  ;;  %v2434_v4 = vmul.f32 %v2417_v1, %v3878_v32  ;;  %v2288_v35 = vmul.f32 %v2271_v50, %v2271_v50  ;;  %v2399_v28 = vsub.f32 %v4938_v43, %v4483_v0 }
 0x1b5   : > { %v2198_v11 = vmul.f32 1.442695, %v2173_v59  ;;  %v3174_v36 = vpop.eup %3173  ;;  %2488 = vmatpush.msrb.mxu1 %v3172_v52  ;;  %v2041_v6 = vmul.f32 %v2024_v41, %v4928_v40  ;;  %v2155_v9 = vmul.f32 %v2138_v46, %v2138_v46  ;;  %v2006_v19 = vsub.f32 %v4926_v12, %v4473_v61 }
 0x1b6   : > { %3183 = vpow2.f32 %v2332_v63  ;;  %v3176_v8 = vpop.eup %3175  ;;  %2089 = vmatpush.msra.mxu3 %v3174_v36  ;;  %v2456_v51 = vmul.f32 1.442695, %v2434_v4  ;;  %v2305_v26 = vmul.f32 %v2288_v35, %v4928_v40  ;;  %v2416_v20 = vmul.f32 %v2399_v28, %v2399_v28 }
 0x1b7   : > { %3185 = vpow2.f32 %v2198_v11  ;;  %v3178_v10 = vpop.eup %3177  ;;  %2353 = vmatpush.msrb.mxu2 %v3176_v8  ;;  %v2066_v53 = vmul.f32 1.442695, %v2041_v6  ;;  %v2172_v45 = vmul.f32 %v2155_v9, %v4931_v29  ;;  %v2023_v33 = vmul.f32 %v2006_v19, %v2006_v19 }
 0x1b8   : > { %v2270_v58 = vsub.f32 %v4926_v12, %v4477_v18  ;;  %v3180_v5 = vpop.eup %3179  ;;  %2222 = vmatpush.msrb.mxu0 %v3178_v10  ;;  %3187 = vpow2.f32 %v2456_v51  ;;  %v2330_v47 = vmul.f32 1.442695, %v2305_v26  ;;  %v2433_v42 = vmul.f32 %v2416_v20, %v3735_v2 }
 0x1b9   : > { %v2137_v30 = vsub.f32 %v4935_v56, %v4514_v23  ;;  %v3182_v40 = vpop.eup %3181  ;;  %2489 = vmatpush.msrb.mxu1 %v3180_v5  ;;  %3189 = vpow2.f32 %v2066_v53  ;;  %v2196_v39 = vmul.f32 1.442695, %v2172_v45  ;;  %v2040_v15 = vmul.f32 %v2023_v33, %v4931_v29 }
 0x1ba   : > { %v2287_v7 = vmul.f32 %v2270_v58, %v2270_v58  ;;  %2090 = vmatpush.msra.mxu3 %v3182_v40  ;;  %3191 = vpow2.f32 %v2330_v47  ;;  %v2454_v25 = vmul.f32 1.442695, %v2433_v42  ;;  %v2398_v13 = vsub.f32 %v3696_v48, %v4483_v0 }
 0x1bb   : > { %v2154_v12 = vmul.f32 %v2137_v30, %v2137_v30  ;;  %3193 = vpow2.f32 %v2196_v39  ;;  %v2064_v54 = vmul.f32 1.442695, %v2040_v15  ;;  %v2005_v62 = vsub.f32 %v4935_v56, %v4473_v61 }
 0x1bc   : > { %v3184_v38 = vpop.eup %3183  ;;  %v2304_v22 = vmul.f32 %v2287_v7, %v4931_v29  ;;  %3195 = vpow2.f32 %v2454_v25  ;;  %v2415_v59 = vmul.f32 %v2398_v13, %v2398_v13  ;;  %v2269_v1 = vsub.f32 %v4935_v56, %v4477_v18 }
 0x1bd   : > { %v3186_v16 = vpop.eup %3185  ;;  %2354 = vmatpush.msrb.mxu2 %v3184_v38  ;;  %v2171_v57 = vmul.f32 %v2154_v12, %v3828_v49  ;;  %3197 = vpow2.f32 %v2064_v54  ;;  %v2022_v63 = vmul.f32 %v2005_v62, %v2005_v62  ;;  %v2136_v41 = vsub.f32 %v3776_v34, %v4514_v23 }
 0x1be   : > { %2223 = vmatpush.msrb.mxu0 %v3186_v16  ;;  %v2328_v50 = vmul.f32 1.442695, %v2304_v22  ;;  %v3188_v29 = vpop.eup %3187  ;;  %v2432_v52 = vmul.f32 %v2415_v59, %v3778_v60  ;;  %v2286_v11 = vmul.f32 %v2269_v1, %v2269_v1  ;;  %v2397_v4 = vsub.f32 %v3871_v14, %v4483_v0 }
 0x1bf   : > { %v2194_v46 = vmul.f32 1.442695, %v2171_v57  ;;  %v3190_v35 = vpop.eup %3189  ;;  %2490 = vmatpush.msrb.mxu1 %v3188_v29  ;;  %v2039_v56 = vmul.f32 %v2022_v63, %v3828_v49  ;;  %v2153_v28 = vmul.f32 %v2136_v41, %v2136_v41  ;;  %v2004_v36 = vsub.f32 %v3776_v34, %v4473_v61 }
 0x1c0   : > { %3199 = vpow2.f32 %v2328_v50  ;;  %v3192_v6 = vpop.eup %3191  ;;  %2091 = vmatpush.msra.mxu3 %v3190_v35  ;;  %v2452_v9 = vmul.f32 1.442695, %v2432_v52  ;;  %v2303_v19 = vmul.f32 %v2286_v11, %v3828_v49  ;;  %v2414_v8 = vmul.f32 %v2397_v4, %v2397_v4 }
 0x1c1   : > { %3201 = vpow2.f32 %v2194_v46  ;;  %v3194_v51 = vpop.eup %3193  ;;  %2355 = vmatpush.msrb.mxu2 %v3192_v6  ;;  %v2062_v26 = vmul.f32 1.442695, %v2039_v56  ;;  %v2170_v20 = vmul.f32 %v2153_v28, %v3878_v32  ;;  %v2021_v10 = vmul.f32 %v2004_v36, %v2004_v36 }
 0x1c2   : > { %v2268_v53 = vsub.f32 %v3776_v34, %v4477_v18  ;;  %v3196_v45 = vpop.eup %3195  ;;  %2224 = vmatpush.msrb.mxu0 %v3194_v51  ;;  %3203 = vpow2.f32 %v2452_v9  ;;  %v2326_v33 = vmul.f32 1.442695, %v2303_v19  ;;  %v2431_v58 = vmul.f32 %v2414_v8, %v3974_v44 }
 0x1c3   : > { %v2135_v5 = vsub.f32 %v4938_v43, %v4514_v23  ;;  %v3198_v49 = vpop.eup %3197  ;;  %2491 = vmatpush.msrb.mxu1 %v3196_v45  ;;  %3205 = vpow2.f32 %v2062_v26  ;;  %v2192_v47 = vmul.f32 1.442695, %v2170_v20  ;;  %v2038_v42 = vmul.f32 %v2021_v10, %v3878_v32  ;;  %v4697_v45 = vpop.f32.mrf.mxu0 }
 0x1c4   : > { %v2285_v30 = vmul.f32 %v2268_v53, %v2268_v53  ;;  %2092 = vmatpush.msra.mxu3 %v3198_v49  ;;  %3207 = vpow2.f32 %v2326_v33  ;;  %v2450_v40 = vmul.f32 1.442695, %v2431_v58  ;;  %v2396_v39 = vsub.f32 %v4916_v24, %v4483_v0 }
 0x1c5   : > { %v2152_v34 = vmul.f32 %v2135_v5, %v2135_v5  ;;  %3209 = vpow2.f32 %v2192_v47  ;;  %v2060_v7 = vmul.f32 1.442695, %v2038_v42  ;;  %v2003_v12 = vsub.f32 %v4938_v43, %v4473_v61  ;;  %v4701_v5 = vpop.f32.mrf.mxu1 }
 0x1c6   : > { %v3200_v15 = vpop.eup %3199  ;;  %v2302_v25 = vmul.f32 %v2285_v30, %v3878_v32  ;;  %3211 = vpow2.f32 %v2450_v40  ;;  %v2413_v54 = vmul.f32 %v2396_v39, %v2396_v39  ;;  %v2267_v22 = vsub.f32 %v4938_v43, %v4477_v18  ;;  %v4681_v32 = vpop.f32.mrf.mxu3 }
 0x1c7   : > { %v3202_v13 = vpop.eup %3201  ;;  %2356 = vmatpush.msrb.mxu2 %v3200_v15  ;;  %v2169_v38 = vmul.f32 %v2152_v34, %v3735_v2  ;;  %3213 = vpow2.f32 %v2060_v7  ;;  %v2020_v16 = vmul.f32 %v2003_v12, %v2003_v12  ;;  %v2134_v57 = vsub.f32 %v3696_v48, %v4514_v23 }
 0x1c8   : > { %2225 = vmatpush.msrb.mxu0 %v3202_v13  ;;  %v2324_v62 = vmul.f32 1.442695, %v2302_v25  ;;  %v3204_v59 = vpop.eup %3203  ;;  %v2430_v50 = vmul.f32 %v2413_v54, %v3961_v31  ;;  %v2284_v63 = vmul.f32 %v2267_v22, %v2267_v22  ;;  %v2395_v41 = vsub.f32 %v3977_v55, %v4483_v0 }
 0x1c9   : > { %v2190_v1 = vmul.f32 1.442695, %v2169_v38  ;;  %v3206_v29 = vpop.eup %3205  ;;  %2492 = vmatpush.msrb.mxu1 %v3204_v59  ;;  %v2037_v43 = vmul.f32 %v2020_v16, %v3735_v2  ;;  %v2151_v46 = vmul.f32 %v2134_v57, %v2134_v57  ;;  %v2002_v52 = vsub.f32 %v3696_v48, %v4473_v61 }
 0x1ca   : > { %3215 = vpow2.f32 %v2324_v62  ;;  %v3208_v11 = vpop.eup %3207  ;;  %2093 = vmatpush.msra.mxu3 %v3206_v29  ;;  %v2448_v4 = vmul.f32 1.442695, %v2430_v50  ;;  %v2301_v35 = vmul.f32 %v2284_v63, %v3735_v2  ;;  %v2412_v56 = vmul.f32 %v2395_v41, %v2395_v41  ;;  %v649_v62 = vpop.f32.mrf.mxu2 }
 0x1cb   : > { %3217 = vpow2.f32 %v2190_v1  ;;  %v3210_v28 = vpop.eup %3209  ;;  %2357 = vmatpush.msrb.mxu2 %v3208_v11  ;;  %v2058_v36 = vmul.f32 1.442695, %v2037_v43  ;;  %v2168_v0 = vmul.f32 %v2151_v46, %v3778_v60  ;;  %v2019_v6 = vmul.f32 %v2002_v52, %v2002_v52  ;;  %v3260_v43 = vld [vmem:[%s3417_s13 + $0xc] ss:$0 sm:$0xff] }
 0x1cc   : > { %v2266_v9 = vsub.f32 %v3696_v48, %v4477_v18  ;;  %v3212_v19 = vpop.eup %3211  ;;  %2226 = vmatpush.msrb.mxu0 %v3210_v28  ;;  %3219 = vpow2.f32 %v2448_v4  ;;  %v2322_v8 = vmul.f32 1.442695, %v2301_v35  ;;  %v2429_v51 = vmul.f32 %v2412_v56, %v4015_v37  ;;  %v3261_v35 = vld [vmem:[%s3417_s13 + $0xe] ss:$0 sm:$0xff] }
 0x1cd   : > { %v2133_v26 = vsub.f32 %v3871_v14, %v4514_v23  ;;  %v3214_v2 = vpop.eup %3213  ;;  %2493 = vmatpush.msrb.mxu1 %v3212_v19  ;;  %3221 = vpow2.f32 %v2058_v36  ;;  %v2188_v20 = vmul.f32 1.442695, %v2168_v0  ;;  %v2036_v10 = vmul.f32 %v2019_v6, %v3778_v60  ;;  %v4731_v28 = vpop.f32.mrf.mxu1 }
 0x1ce   : > { %v2283_v53 = vmul.f32 %v2266_v9, %v2266_v9  ;;  %2094 = vmatpush.msra.mxu3 %v3214_v2  ;;  %3223 = vpow2.f32 %v2322_v8  ;;  %v2446_v48 = vmul.f32 1.442695, %v2429_v51  ;;  %v2001_v58 = vsub.f32 %v3871_v14, %v4473_v61  ;;  %v4706_v40 = vpop.f32.mrf.mxu3  ;;  %v3262_v51 = vld [vmem:[%s3417_s13 + $0xf] ss:$0 sm:$0xff]  ;;  %s4747_s13 = scalar_lea.vmem [#allocation2], %s4729_s12 }
 0x1cf   : > { %v2150_v33 = vmul.f32 %v2133_v26, %v2133_v26  ;;  %3225 = vpow2.f32 %v2188_v20  ;;  %v2056_v47 = vmul.f32 1.442695, %v2036_v10  ;;  %v2265_v30 = vsub.f32 %v3871_v14, %v4477_v18  ;;  %s2535_s22 = sshll.u32 %s4747_s13, 4  ;;  %s2536_s22 = int_to_ptr.vmem [resolvable:$true] %s2535_s22 }
 0x1d0   : > { %v3216_v49 = vpop.eup %3215  ;;  %v2300_v42 = vmul.f32 %v2283_v53, %v3778_v60  ;;  %3227 = vpow2.f32 %v2446_v48  ;;  %v2018_v15 = vmul.f32 %v2001_v58, %v2001_v58  ;;  %v2132_v7 = vsub.f32 %v4916_v24, %v4514_v23 }
 0x1d1   : > { %v3218_v34 = vpop.eup %3217  ;;  %2358 = vmatpush.msrb.mxu2 %v3216_v49  ;;  %v2167_v39 = vmul.f32 %v2150_v33, %v3974_v44  ;;  %3229 = vpow2.f32 %v2056_v47  ;;  %v2282_v12 = vmul.f32 %v2265_v30, %v2265_v30  ;;  %v2000_v60 = vsub.f32 %v4916_v24, %v4473_v61 }
 0x1d2   : > { %2227 = vmatpush.msrb.mxu0 %v3218_v34  ;;  %v2320_v25 = vmul.f32 1.442695, %v2300_v42  ;;  %v3220_v14 = vpop.eup %3219  ;;  %v2035_v38 = vmul.f32 %v2018_v15, %v3974_v44  ;;  %v2149_v54 = vmul.f32 %v2132_v7, %v2132_v7  ;;  %v2264_v22 = vsub.f32 %v4916_v24, %v4477_v18  ;;  %v1045_v49 = vpop.f32.mrf.mxu2 }
 0x1d3   : > { %v2186_v13 = vmul.f32 1.442695, %v2167_v39  ;;  %v3222_v16 = vpop.eup %3221  ;;  %2494 = vmatpush.msrb.mxu1 %v3220_v14  ;;  %v2299_v57 = vmul.f32 %v2282_v12, %v3974_v44  ;;  %v2017_v59 = vmul.f32 %v2000_v60, %v2000_v60  ;;  %v2131_v1 = vsub.f32 %v3977_v55, %v4514_v23  ;;  %v534_v23 = vpop.f32.mrf.mxu0 }
 0x1d4   : > { %3231 = vpow2.f32 %v2320_v25  ;;  %v3224_v61 = vpop.eup %3223  ;;  %2095 = vmatpush.msra.mxu3 %v3222_v16  ;;  %v2054_v50 = vmul.f32 1.442695, %v2035_v38  ;;  %v2166_v63 = vmul.f32 %v2149_v54, %v3961_v31  ;;  %v2281_v24 = vmul.f32 %v2264_v22, %v2264_v22 }
 0x1d5   : > { %3233 = vpow2.f32 %v2186_v13  ;;  %v3226_v18 = vpop.eup %3225  ;;  %2359 = vmatpush.msrb.mxu2 %v3224_v61  ;;  %v2318_v41 = vmul.f32 1.442695, %v2299_v57  ;;  %v2034_v29 = vmul.f32 %v2017_v59, %v3961_v31  ;;  %v2148_v44 = vmul.f32 %v2131_v1, %v2131_v1  ;;  %v1329_v25 = vpop.f32.mrf.mxu1 }
 0x1d6   : > { %v1999_v46 = vsub.f32 %v3977_v55, %v3260_v43  ;;  %v3228_v52 = vpop.eup %3227  ;;  %2228 = vmatpush.msrb.mxu0 %v3226_v18  ;;  %3235 = vpow2.f32 %v2054_v50  ;;  %v2184_v11 = vmul.f32 1.442695, %v2166_v63  ;;  %v2298_v4 = vmul.f32 %v2281_v24, %v3961_v31  ;;  %v913_v19 = vpop.f32.mrf.mxu3 }
 0x1d7   : > { %v2263_v56 = vsub.f32 %v3977_v55, %v3261_v35  ;;  %v3230_v36 = vpop.eup %3229  ;;  %2495 = vmatpush.msrb.mxu1 %v3228_v52  ;;  %3237 = vpow2.f32 %v2318_v41  ;;  %v2052_v0 = vmul.f32 1.442695, %v2034_v29  ;;  %v2165_v6 = vmul.f32 %v2148_v44, %v4015_v37 }
 0x1d8   : > { %v2016_v9 = vmul.f32 %v1999_v46, %v1999_v46  ;;  %2096 = vmatpush.msra.mxu3 %v3230_v36  ;;  %3239 = vpow2.f32 %v2184_v11  ;;  %v2316_v31 = vmul.f32 1.442695, %v2298_v4  ;;  %v2411_v55 = vsub.f32 %v4939_v17, %v3262_v51  ;;  %2496 = vmatmul.f32.vlgmr.msrb.gmra.mxu1 %v4925_v21 }
 0x1d9   : > { %v2280_v8 = vmul.f32 %v2263_v56, %v2263_v56  ;;  %3241 = vpow2.f32 %v2052_v0  ;;  %v2182_v2 = vmul.f32 1.442695, %v2165_v6  ;;  %v537_v10 = vlaneseq }
 0x1da   : > { %v3232_v26 = vpop.eup %3231  ;;  %v2033_v20 = vmul.f32 %v2016_v9, %v4015_v37  ;;  %3243 = vpow2.f32 %v2316_v31  ;;  %v2428_v33 = vmul.f32 %v2411_v55, %v2411_v55  ;;  %v670_v58 = vadd.f32 %v4681_v32, %v649_v62  ;;  %v1461_v54 = vpop.f32.mrf.mxu2 }
 0x1db   : > { %v3234_v53 = vpop.eup %3233  ;;  %2360 = vmatpush.msrb.mxu2 %v3232_v26  ;;  %v2297_v48 = vmul.f32 %v2280_v8, %v4015_v37  ;;  %3245 = vpow2.f32 %v2182_v2  ;;  %vm4740_vm1 = vcmp.lt.s32.totalorder %v537_v10, 128  ;;  %v535_v42 = vadd.f32 %v534_v23, %v4697_v45  ;;  %v933_v45 = vpop.f32.mrf.mxu0 }
 0x1dc   : > { %2229 = vmatpush.msrb.mxu0 %v3234_v53  ;;  %v2050_v17 = vmul.f32 1.442695, %v2033_v20  ;;  %v3236_v30 = vpop.eup %3235  ;;  %v2445_v39 = vmul.f32 %v2428_v33, %v4940_v3  ;;  %2603 = vst.msk [vmem:[%s4747_s13 + $0x1] sm:$0x1] %vm4740_vm1, %v670_v58  ;;  %v802_v37 = vadd.f32 %v4706_v40, %v4701_v5  ;;  %v934_v7 = vadd.f32 %v933_v45, %v913_v19 }
 0x1dd   : > { %v2314_v34 = vmul.f32 1.442695, %v2297_v48  ;;  %v3238_v32 = vpop.eup %3237  ;;  %2097 = vmatpush.msra.mxu3 %v3236_v30  ;;  %541 = vst.msk [vmem:[%s4747_s13] sm:$0x1] %vm4740_vm1, %v535_v42  ;;  %v1441_v57 = vpop.f32.mrf.mxu1 }
 0x1de   : > { %3247 = vpow2.f32 %v2050_v17  ;;  %v3240_v3 = vpop.eup %3239  ;;  %2361 = vmatpush.msrb.mxu2 %v3238_v32  ;;  %v2478_v15 = vmul.f32 1.442695, %v2445_v39  ;;  %2606 = vst.msk [vmem:[%s4747_s13 + $0x2] sm:$0x1] %vm4740_vm1, %v802_v37  ;;  %v1065_v5 = vpop.f32.mrf.mxu3  ;;  %v1462_v59 = vadd.f32 %v1461_v54, %v1441_v57 }
 0x1df   : > { %3249 = vpow2.f32 %v2314_v34  ;;  %v3242_v12 = vpop.eup %3241  ;;  %2230 = vmatpush.msrb.mxu0 %v3240_v3  ;;  %2609 = vst.msk [vmem:[%s4747_s13 + $0x3] sm:$0x1] %vm4740_vm1, %v934_v7  ;;  %v1066_v60 = vadd.f32 %v1065_v5, %v1045_v49 }
 0x1e0   : > { %v3244_v40 = vpop.eup %3243  ;;  %2098 = vmatpush.msra.mxu3 %v3242_v12  ;;  %3251 = vpow2.f32 %v2478_v15  ;;  %2621 = vst.msk [vmem:[%s4747_s13 + $0x7] sm:$0x1] %vm4740_vm1, %v1462_v59 }
 0x1e1   : > { %v3246_v14 = vpop.eup %3245  ;;  %2362 = vmatpush.msrb.mxu2 %v3244_v40  ;;  %2612 = vst.msk [vmem:[%s4747_s13 + $0x4] sm:$0x1] %vm4740_vm1, %v1066_v60 }
 0x1e2   : > { %2231 = vmatpush.msrb.mxu0 %v3246_v14  ;;  %v1593_v50 = vpop.f32.mrf.mxu2 }
 0x1e3   : > { %2232 = vmatmul.f32.vlgmr.msrb.gmra.mxu0 %v4925_v21  ;;  %v1177_v22 = vpop.f32.mrf.mxu0 }
 0x1e4   : > { %v3248_v13 = vpop.eup %3247  ;;  %v1198_v16 = vadd.f32 %v4731_v28, %v1177_v22 }
 0x1e5   : > { %v3250_v38 = vpop.eup %3249  ;;  %2099 = vmatpush.msra.mxu3 %v3248_v13 }
 0x1e6   : > { %2363 = vmatpush.msrb.mxu2 %v3250_v38  ;;  %2100 = vmatmul.f32.vlgmr.msra.gmra.mxu3 %v4925_v21  ;;  %v3252_v62 = vpop.eup %3251  ;;  %v1309_v1 = vpop.f32.mrf.mxu3  ;;  %2615 = vst.msk [vmem:[%s4747_s13 + $0x5] sm:$0x1] %vm4740_vm1, %v1198_v16 }
 0x1e7   : > { %2364 = vmatmul.f32.vlgmr.msrb.gmra.mxu2 %v4925_v21  ;;  %2515 = vmatpush.msrb.mxu3 %v3252_v62  ;;  %v1330_v61 = vadd.f32 %v1329_v25, %v1309_v1  ;;  %v1857_v21 = vpop.f32.mrf.mxu1 }
 0x1e9   : > { %2618 = vst.msk [vmem:[%s4747_s13 + $0x6] sm:$0x1] %vm4740_vm1, %v1330_v61 }
 0x1ea   : > { %v1725_v44 = vpop.f32.mrf.mxu2 }
 0x1ee   : > { %2644 = vmatmul.msk.f32.vlgmr.msrb.gmra.mxu3 %vm494_vm0, %v3816_v27 }
 0x201   : > { %v1573_v63 = vpop.f32.mrf.mxu0 }
 0x202   : > { %v1594_v24 = vadd.f32 %v1593_v50, %v1573_v63 }
 0x204   : > { %2624 = vst.msk [vmem:[%s4747_s13 + $0x8] sm:$0x1] %vm4740_vm1, %v1594_v24  ;;  %v1969_v18 = vpop.f32.mrf.mxu1 }
 0x209   : > { %v1989_v41 = vpop.f32.mrf.mxu0 }
 0x20a   : > { %v1990_v29 = vadd.f32 %v1989_v41, %v1969_v18 }
 0x20c   : > { %2633 = vst.msk [vmem:[%s4747_s13 + $0xb] sm:$0x1] %vm4740_vm1, %v1990_v29  ;;  %v2385_v56 = vpop.f32.mrf.mxu1 }
 0x211   : > { %v2121_v52 = vpop.f32.mrf.mxu0 }
 0x21b   : > { %v1837_v43 = vpop.f32.mrf.mxu2 }
 0x21c   : > { %v1705_v46 = vpop.f32.mrf.mxu3  ;;  %v1858_v27 = vadd.f32 %v1857_v21, %v1837_v43 }
 0x21d   : > { %v1726_v23 = vadd.f32 %v1725_v44, %v1705_v46 }
 0x21e   : > { %2630 = vst.msk [vmem:[%s4747_s13 + $0xa] sm:$0x1] %vm4740_vm1, %v1858_v27 }
 0x21f   : > { %2627 = vst.msk [vmem:[%s4747_s13 + $0x9] sm:$0x1] %vm4740_vm1, %v1726_v23 }
 0x223   : > { %v2253_v11 = vpop.f32.mrf.mxu2 }
 0x255   : > { %v2497_v9 = vpop.f32.mrf.mxu1 }
 0x260   : > { %v2233_v4 = vpop.f32.mrf.mxu0 }
 0x261   : > { %v2254_v35 = vadd.f32 %v2253_v11, %v2233_v4 }
 0x263   : > { %2639 = vst.msk [vmem:[%s4747_s13 + $0xd] sm:$0x1] %vm4740_vm1, %v2254_v35 }
 0x269   : > { %v2101_v28 = vpop.f32.mrf.mxu3 }
 0x26a   : > { %v2122_v36 = vadd.f32 %v2121_v52, %v2101_v28  ;;  %v2365_v0 = vpop.f32.mrf.mxu2 }
 0x26b   : > { %v2386_v6 = vadd.f32 %v2385_v56, %v2365_v0 }
 0x26c   : > { %2636 = vst.msk [vmem:[%s4747_s13 + $0xc] sm:$0x1] %vm4740_vm1, %v2122_v36 }
 0x26d   : > { %2642 = vst.msk [vmem:[%s4747_s13 + $0xe] sm:$0x1] %vm4740_vm1, %v2386_v6 }
 0x271   : > { %v2517_v19 = vpop.f32.mrf.mxu3 }
 0x272   : > { %v2518_v31 = vadd.f32 %v2517_v19, %v2497_v9 }
 0x274   : > { %2645 = vst.msk [vmem:[%s4747_s13 + $0xf] sm:$0x1] %vm4740_vm1, %v2518_v31 }
 0x275   : > { %3290 = shalt.err (!%p3287_p3)
}
 0x276   : > { %2650 = dma.vmem_to_hbm [thread:$0]  (%p3388_p5), %s2536_s22, 256, %s2538_s23, %s2523_s27  }
 0x277 PF: > { %p2656_p4 = scmp.ge.s32.totalorder %s3325_s18, 2  ;;  %s2549_s9 = sand.u32 1, %s3313_s15  }
 0x278   : > { %s2550_s10 = scalar_lea.sflag [#allocation3], %s2549_s9 }
 0x279   : > { %p2653_p7 = pnand %p2656_p4, %p3392_p6 }
 0x27b   : > { %p2654_p8 = pneg %p2653_p7 }
 0x27d   : > { %3308 = dma.done.wait (%p2654_p8), %s2550_s10, 256  }
 0x27e   : > { %3310 = vsyncadd (%p2654_p8), %s2550_s10, 4294967040  ;;  %p14_p9 = scmp.ge.s32.totalorder %s3376_s21, 4   ;;  %s4944_s15 = smov %s3317_s16 }
 0x27f   : > { %s4945_s16 = smov %s3321_s17  ;;  %s4946_s17 = smov %s3386_s24 }
 0x280   : > { %s4947_s18 = smov %s3376_s21  ;;  %16 = sbr.rel (!%p14_p9) target bundleno = 3 (0x3), region = 101 }
 0x285   :  { %2556 = vsyncpa [#allocation3], 1 }
 0x286   :  { %2558 = vsyncpa [#allocation3 + $0x1], 1 }

</bundles_post_ra>
